<compile_context>
chip_gen: v7x
topology: tpu7x:2x2x1
jax: 0.10.0
libtpu: 0.0.40
codegen_flags: <defaults>
</compile_context>

<pallas_src>
import functools

import jax
import jax.numpy as jnp
import numpy as np
from jax import lax
from jax.experimental import pallas as pl
from jax.experimental.pallas import tpu as pltpu


def _round_up(x, m):
    return (x + m - 1) // m * m


# ---------------------------------------------------------------------------
# The recurrent kernel.  grid = (direction, time); direction is "parallel",
# time is "arbitrary" (state carried in VMEM scratch).
#
# Layout: rows = gate / hidden channels, lanes = padded-flat pixel index
#   q = b*Hp*Wp + yp*Wp + xp   (zero-padded image, row-major), column j <-> q=j.
# ---------------------------------------------------------------------------
def _recurrent_kernel(xcol_ref, wx_ref, wh_ref, b_ref, mask_ref,
                      out_ref, cT_ref, hp_ref, c_ref,
                      *, Chid, k, Wp, Ng, Lh, off):
    t = pl.program_id(1)
    p = (k - 1) // 2

    @pl.when(t == 0)
    def _init():
        hp_ref[...] = jnp.zeros_like(hp_ref)   # zero margins == conv padding
        c_ref[...] = jnp.zeros_like(c_ref)

    # ---- gates = Wx @ xcol + b + Wh @ im2col(hidden)  (two MXU matmuls) ----
    gates = jnp.dot(wx_ref[...], xcol_ref[...],
                    preferred_element_type=jnp.float32) + b_ref[...]

    hp = hp_ref[...]                                       # (Chid, Lh)

    def tap(dy, dx):
        a = off + (dy - p) * Wp + (dx - p)                 # static, >= 0
        return hp[:, a:a + Ng]

    taps = [tap(dy, dx) for dy in range(k) for dx in range(k)]
    # Sublane concat at multiples of Chid (vreg-aligned) -> K = k*k*Chid matmul.
    h_col = jnp.concatenate(taps, axis=0) if len(taps) > 1 else taps[0]
    gates = gates + jnp.dot(wh_ref[...], h_col,
                            preferred_element_type=jnp.float32)

    # ---- pointwise LSTM math, fully lane-dense (pixels on lanes) -----------
    # PyTorch chunk(4, 1) channel order: in, remember(f), out, cell(g).
    sig = jax.nn.sigmoid(gates[:3 * Chid, :])              # i, f, o in one pass
    g_g = jnp.tanh(gates[3 * Chid:, :])                    # cell gate
    i_g = sig[:Chid, :]
    f_g = sig[Chid:2 * Chid, :]
    o_g = sig[2 * Chid:3 * Chid, :]

    c_new = f_g * c_ref[...] + i_g * g_g
    h_new = o_g * jnp.tanh(c_new)
    c_ref[...] = c_new

    # Write hidden back with a zero halo: mask kills padding / tail columns,
    # placed at lane offset `off` inside the margined buffer via one aligned
    # full-width store (lane-concat with zero margins).
    h_store = h_new * mask_ref[...]
    pieces = []
    if off > 0:
        pieces.append(jnp.zeros((Chid, off), jnp.float32))
    pieces.append(h_store)
    if Lh - off - Ng > 0:
        pieces.append(jnp.zeros((Chid, Lh - off - Ng), jnp.float32))
    hp_ref[...] = jnp.concatenate(pieces, axis=1) if len(pieces) > 1 else pieces[0]

    # Lane-dense output store (Ng is a multiple of 128); wrapper strips padding.
    out_ref[...] = h_new

    @pl.when(t == pl.num_programs(1) - 1)
    def _fin():
        cT_ref[...] = c_new


# ---------------------------------------------------------------------------
# Public wrapper (PyTorch NCHW in / out).
# ---------------------------------------------------------------------------
def bi_conv_lstm_forward(x_nchw, params):
    """params: list (per direction) of (conv_weight (4h, Cin+h, k, k), bias (4h,)).
    x_nchw: (seq, B, Cin, H, W).  Zero initial state (matches state=None)."""
    x_nchw = x_nchw.astype(jnp.float32)
    seq, B, Cin, H, W = x_nchw.shape
    D = len(params)
    k = params[0][0].shape[-1]
    Chid = params[0][0].shape[0] // 4
    p = (k - 1) // 2
    Hp, Wp = H + 2 * p, W + 2 * p
    Q = B * Hp * Wp                        # padded-flat pixel count
    off = p * Wp + p                       # largest conv tap shift
    Ng = _round_up(off + Q, 128)           # lane width of gates / state / outputs
    Lh = _round_up(Ng + 2 * off, 128)      # lane width of margined hidden buffer
    kkc = k * k * Cin
    kkh = k * k * Chid

    assert Chid % 8 == 0, "hidden_size must be a multiple of 8 for this kernel"

    # --- im2col of the input, laid out as (seq, k*k*Cin, Ng) lane-dense cols ---
    x_nhwc = jnp.transpose(x_nchw, (0, 1, 3, 4, 2))
    x_sp = jnp.pad(x_nhwc, ((0, 0), (0, 0), (p, p), (p, p), (0, 0)))
    xtaps = [x_sp[:, :, dy:dy + H, dx:dx + W, :]
             for dy in range(k) for dx in range(k)]
    xcol = jnp.concatenate(xtaps, axis=-1)                       # (seq,B,H,W,kkc)
    xcol = jnp.pad(xcol, ((0, 0), (0, 0), (p, p), (p, p), (0, 0)))
    xcolT = jnp.transpose(xcol, (0, 4, 1, 2, 3)).reshape(seq, kkc, Q)
    xcolT = jnp.pad(xcolT, ((0, 0), (0, 0), (0, Ng - Q)))        # (seq,kkc,Ng)

    # --- weights: rows = gate channels (i,f,o,g), cols ordered (dy,dx,cin) ---
    wx_l, wh_l, b_l = [], [], []
    for w_pt, b_pt in params:
        w = w_pt.astype(jnp.float32)
        wx_l.append(jnp.transpose(w[:, :Cin], (0, 2, 3, 1)).reshape(4 * Chid, kkc))
        wh_l.append(jnp.transpose(w[:, Cin:], (0, 2, 3, 1)).reshape(4 * Chid, kkh))
        b_l.append(b_pt.astype(jnp.float32).reshape(4 * Chid, 1))
    wx_all = jnp.stack(wx_l)          # (D, 4h, kkc)
    wh_all = jnp.stack(wh_l)          # (D, 4h, kkh)
    b_all = jnp.stack(b_l)            # (D, 4h, 1)

    # interior-column mask (real pixel vs. zero halo / tail padding)
    qidx = jnp.arange(Ng)
    xp = qidx % Wp
    yp = (qidx // Wp) % Hp
    valid = ((qidx < Q) & (xp >= p) & (xp < Wp - p) & (yp >= p) & (yp < Hp - p))
    mask = jnp.broadcast_to(valid.astype(jnp.float32)[None, :], (Chid, Ng))

    kernel = functools.partial(_recurrent_kernel, Chid=Chid, k=k, Wp=Wp,
                               Ng=Ng, Lh=Lh, off=off)

    def xcol_map(d, t):
        # forward (d=0) reads step t, backward (d=1) reads step seq-1-t; the
        # time reversal lives purely in the index_map (no flipped copy in HBM).
        return (t + d * (seq - 1 - 2 * t), 0, 0)

    grid_spec = pltpu.PrefetchScalarGridSpec(
        num_scalar_prefetch=0,
        grid=(D, seq),
        in_specs=[
            pl.BlockSpec((pl.Squeezed(), kkc, Ng), xcol_map),
            pl.BlockSpec((pl.Squeezed(), 4 * Chid, kkc), lambda d, t: (d, 0, 0)),
            pl.BlockSpec((pl.Squeezed(), 4 * Chid, kkh), lambda d, t: (d, 0, 0)),
            pl.BlockSpec((pl.Squeezed(), 4 * Chid, 1), lambda d, t: (d, 0, 0)),
            pl.BlockSpec((Chid, Ng), lambda d, t: (0, 0)),
        ],
        out_specs=[
            pl.BlockSpec((pl.Squeezed(), pl.Squeezed(), Chid, Ng),
                         lambda d, t: (d, t, 0, 0)),
            pl.BlockSpec((pl.Squeezed(), Chid, Ng), lambda d, t: (d, 0, 0)),
        ],
        scratch_shapes=[
            pltpu.VMEM((Chid, Lh), jnp.float32),   # margined hidden buffer
            pltpu.VMEM((Chid, Ng), jnp.float32),   # cell state
        ],
    )

    out_raw, cT_raw = pl.pallas_call(
        kernel,
        out_shape=(
            jax.ShapeDtypeStruct((D, seq, Chid, Ng), jnp.float32),
            jax.ShapeDtypeStruct((D, Chid, Ng), jnp.float32),
        ),
        grid_spec=grid_spec,
        compiler_params=pltpu.CompilerParams(
            dimension_semantics=("parallel", "arbitrary"),
            vmem_limit_bytes=32 * 1024 * 1024,
        ),
    )(xcolT, wx_all, wh_all, b_all, mask)

    # --- unpack padded-flat columns back to (B, H, W) ---
    def extract(a):
        a = a[..., :Q].reshape(a.shape[:-1] + (B, Hp, Wp))
        return a[..., p:p + H, p:p + W]

    out_int = extract(out_raw)                    # (D, seq, Chid, B, H, W)
    # NOTE: backward-direction outputs stay in processing (reversed-time) order,
    # exactly as the PyTorch reference concatenates them.
    out = jnp.transpose(out_int, (1, 3, 0, 2, 4, 5)).reshape(seq, B, D * Chid, H, W)

    c_int = extract(cT_raw)                       # (D, Chid, B, H, W)
    new_state = []
    for d in range(D):
        hT = jnp.transpose(out_int[d, seq - 1], (1, 0, 2, 3))   # (B, Chid, H, W)
        cT = jnp.transpose(c_int[d], (1, 0, 2, 3))
        new_state.append((hT, cT))
    return out, new_state


# ---------------------------------------------------------------------------
# Pure-JAX reference matching the PyTorch forward exactly.
# ---------------------------------------------------------------------------
def _ref_forward(x_nchw, params):
    seq, B, Cin, H, W = x_nchw.shape
    x = jnp.transpose(x_nchw, (0, 1, 3, 4, 2)).astype(jnp.float32)
    outs, states = [], []
    for d, (w_pt, b_pt) in enumerate(params):
        hid = w_pt.shape[0] // 4
        w = jnp.transpose(w_pt, (2, 3, 1, 0))          # HWIO
        h = jnp.zeros((B, H, W, hid), jnp.float32)
        c = jnp.zeros((B, H, W, hid), jnp.float32)
        steps = range(seq) if d == 0 else range(seq - 1, -1, -1)
        dir_out = []
        for j in steps:
            inp = jnp.concatenate([x[j], h], axis=-1)
            g = lax.conv_general_dilated(
                inp, w, (1, 1), 'SAME',
                dimension_numbers=('NHWC', 'HWIO', 'NHWC')) + b_pt
            i_g = jax.nn.sigmoid(g[..., 0 * hid:1 * hid])
            f_g = jax.nn.sigmoid(g[..., 1 * hid:2 * hid])
            o_g = jax.nn.sigmoid(g[..., 2 * hid:3 * hid])
            g_g = jnp.tanh(g[..., 3 * hid:4 * hid])
            c = f_g * c + i_g * g_g
            h = o_g * jnp.tanh(c)
            dir_out.append(h)
        outs.append(jnp.stack(dir_out, axis=0))
        states.append((jnp.transpose(h, (0, 3, 1, 2)),
                       jnp.transpose(c, (0, 3, 1, 2))))
    out = jnp.concatenate(outs, axis=-1)
    return jnp.transpose(out, (0, 1, 4, 2, 3)), states


if __name__ == "__main__":
    # Shapes consistent with the module's forward: input_ (seq, B, input_size, H, W)
    seq, B, Cin, H, W = 8, 2, 4, 16, 16
    hid, ksize = 32, 3
    num_directions = 2   # bidirectional=True

    key = jax.random.PRNGKey(0)
    params = []
    for _ in range(num_directions):
        key, k1, k2 = jax.random.split(key, 3)
        w = 0.1 * jax.random.normal(k1, (4 * hid, Cin + hid, ksize, ksize),
                                    jnp.float32)
        b = 0.1 * jax.random.normal(k2, (4 * hid,), jnp.float32)
        params.append((w, b))

    key, kx = jax.random.split(key)
    x = jax.random.normal(kx, (seq, B, Cin, H, W), jnp.float32)

    out, new_state = bi_conv_lstm_forward(x, params)
    out = jax.block_until_ready(out)

    # Cross-check against the pure-JAX reference.
    out_ref, state_ref = _ref_forward(x, params)
    np.testing.assert_allclose(np.asarray(out), np.asarray(out_ref),
                               rtol=1e-4, atol=1e-4)
    for d in range(num_directions):
        np.testing.assert_allclose(np.asarray(new_state[d][0]),
                                   np.asarray(state_ref[d][0]),
                                   rtol=1e-4, atol=1e-4)
        np.testing.assert_allclose(np.asarray(new_state[d][1]),
                                   np.asarray(state_ref[d][1]),
                                   rtol=1e-4, atol=1e-4)

    assert out.shape == (seq, B, num_directions * hid, H, W)
    print("KERNEL_OK")
</pallas_src>

<mosaic_0001>
module attributes {stable_mosaic.version = 11 : i64} {
  func.func @_recurrent_kernel(%arg0: i32, %arg1: i32, %arg2: memref<1x36x768xf32, #tpu.memory_space<vmem>>, %arg3: memref<1x128x36xf32, #tpu.memory_space<vmem>>, %arg4: memref<1x128x288xf32, #tpu.memory_space<vmem>>, %arg5: memref<1x128x1xf32, #tpu.memory_space<vmem>>, %arg6: memref<32x768xf32, #tpu.memory_space<vmem>>, %arg7: memref<1x1x32x768xf32, #tpu.memory_space<vmem>>, %arg8: memref<1x32x768xf32, #tpu.memory_space<vmem>>, %arg9: memref<32x896xf32, #tpu.memory_space<vmem>>, %arg10: memref<32x768xf32, #tpu.memory_space<vmem>>) attributes {dimension_semantics = [#tpu.dimension_semantics<parallel>, #tpu.dimension_semantics<arbitrary>], iteration_bounds = array<i64: 2, 8>, scalar_prefetch = 0 : i64, scratch_operands = 2 : i64, tpu.core_type = #tpu.core_type<tc>, window_params = [{transform_indices = @transform_0, window_bounds = array<i64: 1, 36, 768>}, {transform_indices = @transform_1, window_bounds = array<i64: 1, 128, 36>}, {transform_indices = @transform_2, window_bounds = array<i64: 1, 128, 288>}, {transform_indices = @transform_3, window_bounds = array<i64: 1, 128, 1>}, {pipeline_mode = #tpu.pipeline_mode<synchronous>, transform_indices = @transform_4, window_bounds = array<i64: 32, 768>}, {transform_indices = @transform_5, window_bounds = array<i64: 1, 1, 32, 768>}, {transform_indices = @transform_6, window_bounds = array<i64: 1, 32, 768>}]} {
    %c0_i32 = arith.constant 0 : i32
    %0 = arith.cmpi eq, %arg1, %c0_i32 : i32
    %1 = arith.extui %0 : i1 to i32
    %c0_i32_0 = arith.constant 0 : i32
    %2 = arith.cmpi ne, %1, %c0_i32_0 : i32
    scf.if %2 {
      %cst_31 = arith.constant 0.000000e+00 : f32
      %57 = vector.broadcast %cst_31 : f32 to vector<32x896xf32>
      %c0_32 = arith.constant 0 : index
      %c0_33 = arith.constant 0 : index
      %58 = vector.load %arg9[%c0_32, %c0_33] : memref<32x896xf32, #tpu.memory_space<vmem>>, vector<32x896xf32>
      tpu.vector_store %arg9[%c0_32, %c0_33], %57 {strides = array<i32>} : memref<32x896xf32, #tpu.memory_space<vmem>>, vector<32x896xf32>,
      %cst_34 = arith.constant 0.000000e+00 : f32
      %59 = vector.broadcast %cst_34 : f32 to vector<32x768xf32>
      %c0_35 = arith.constant 0 : index
      %c0_36 = arith.constant 0 : index
      %60 = vector.load %arg10[%c0_35, %c0_36] : memref<32x768xf32, #tpu.memory_space<vmem>>, vector<32x768xf32>
      tpu.vector_store %arg10[%c0_35, %c0_36], %59 {strides = array<i32>} : memref<32x768xf32, #tpu.memory_space<vmem>>, vector<32x768xf32>,
    } else {
    }
    %c0 = arith.constant 0 : index
    %c0_1 = arith.constant 0 : index
    %c0_2 = arith.constant 0 : index
    %3 = vector.load %arg3[%c0, %c0_1, %c0_2] : memref<1x128x36xf32, #tpu.memory_space<vmem>>, vector<1x128x36xf32>
    %4 = vector.shape_cast %3 : vector<1x128x36xf32> to vector<128x36xf32>
    %c0_3 = arith.constant 0 : index
    %c0_4 = arith.constant 0 : index
    %c0_5 = arith.constant 0 : index
    %5 = vector.load %arg2[%c0_3, %c0_4, %c0_5] : memref<1x36x768xf32, #tpu.memory_space<vmem>>, vector<1x36x768xf32>
    %6 = vector.shape_cast %5 : vector<1x36x768xf32> to vector<36x768xf32>
    %cst = arith.constant dense<0.000000e+00> : vector<128x768xf32>
    %7 = tpu.matmul %4, %6, %cst {dimension_numbers = #tpu.dot_dimension_numbers<[1], [0], [0], [1], [0, 0, 1, 1], [], []>} : vector<128x36xf32>, vector<36x768xf32>, vector<128x768xf32> -> vector<128x768xf32>
    %c0_6 = arith.constant 0 : index
    %c0_7 = arith.constant 0 : index
    %c0_8 = arith.constant 0 : index
    %8 = vector.load %arg5[%c0_6, %c0_7, %c0_8] : memref<1x128x1xf32, #tpu.memory_space<vmem>>, vector<1x128x1xf32>
    %9 = vector.shape_cast %8 : vector<1x128x1xf32> to vector<128x1xf32>
    %10 = vector.broadcast %9 : vector<128x1xf32> to vector<128x768xf32>
    %11 = arith.addf %7, %10 : vector<128x768xf32>
    %c0_9 = arith.constant 0 : index
    %c0_10 = arith.constant 0 : index
    %12 = vector.load %arg9[%c0_9, %c0_10] : memref<32x896xf32, #tpu.memory_space<vmem>>, vector<32x896xf32>
    %13 = vector.extract_strided_slice %12 {offsets = [0, 0], sizes = [32, 768], strides = [1, 1]} : vector<32x896xf32> to vector<32x768xf32>
    %14 = vector.extract_strided_slice %12 {offsets = [0, 1], sizes = [32, 768], strides = [1, 1]} : vector<32x896xf32> to vector<32x768xf32>
    %15 = vector.extract_strided_slice %12 {offsets = [0, 2], sizes = [32, 768], strides = [1, 1]} : vector<32x896xf32> to vector<32x768xf32>
    %16 = vector.extract_strided_slice %12 {offsets = [0, 18], sizes = [32, 768], strides = [1, 1]} : vector<32x896xf32> to vector<32x768xf32>
    %17 = vector.extract_strided_slice %12 {offsets = [0, 19], sizes = [32, 768], strides = [1, 1]} : vector<32x896xf32> to vector<32x768xf32>
    %18 = vector.extract_strided_slice %12 {offsets = [0, 20], sizes = [32, 768], strides = [1, 1]} : vector<32x896xf32> to vector<32x768xf32>
    %19 = vector.extract_strided_slice %12 {offsets = [0, 36], sizes = [32, 768], strides = [1, 1]} : vector<32x896xf32> to vector<32x768xf32>
    %20 = vector.extract_strided_slice %12 {offsets = [0, 37], sizes = [32, 768], strides = [1, 1]} : vector<32x896xf32> to vector<32x768xf32>
    %21 = vector.extract_strided_slice %12 {offsets = [0, 38], sizes = [32, 768], strides = [1, 1]} : vector<32x896xf32> to vector<32x768xf32>
    %22 = tpu.concatenate %13, %14, %15, %16, %17, %18, %19, %20, %21 in 0 : vector<32x768xf32>, vector<32x768xf32>, vector<32x768xf32>, vector<32x768xf32>, vector<32x768xf32>, vector<32x768xf32>, vector<32x768xf32>, vector<32x768xf32>, vector<32x768xf32> -> vector<288x768xf32>
    %c0_11 = arith.constant 0 : index
    %c0_12 = arith.constant 0 : index
    %c0_13 = arith.constant 0 : index
    %23 = vector.load %arg4[%c0_11, %c0_12, %c0_13] : memref<1x128x288xf32, #tpu.memory_space<vmem>>, vector<1x128x288xf32>
    %24 = vector.shape_cast %23 : vector<1x128x288xf32> to vector<128x288xf32>
    %cst_14 = arith.constant dense<0.000000e+00> : vector<128x768xf32>
    %25 = tpu.matmul %24, %22, %cst_14 {dimension_numbers = #tpu.dot_dimension_numbers<[1], [0], [0], [1], [0, 0, 1, 1], [], []>} : vector<128x288xf32>, vector<288x768xf32>, vector<128x768xf32> -> vector<128x768xf32>
    %26 = arith.addf %11, %25 : vector<128x768xf32>
    %27 = vector.extract_strided_slice %26 {offsets = [0, 0], sizes = [96, 768], strides = [1, 1]} : vector<128x768xf32> to vector<96x768xf32>
    %28 = arith.negf %27 : vector<96x768xf32>
    %29 = math.exp %28 : vector<96x768xf32>
    %cst_15 = arith.constant 1.000000e+00 : f32
    %30 = vector.broadcast %cst_15 : f32 to vector<96x768xf32>
    %31 = arith.addf %30, %29 : vector<96x768xf32>
    %32 = arith.divf %30, %31 : vector<96x768xf32>
    %33 = vector.extract_strided_slice %26 {offsets = [96, 0], sizes = [32, 768], strides = [1, 1]} : vector<128x768xf32> to vector<32x768xf32>
    %34 = math.tanh %33 : vector<32x768xf32>
    %35 = vector.extract_strided_slice %32 {offsets = [0, 0], sizes = [32, 768], strides = [1, 1]} : vector<96x768xf32> to vector<32x768xf32>
    %36 = vector.extract_strided_slice %32 {offsets = [32, 0], sizes = [32, 768], strides = [1, 1]} : vector<96x768xf32> to vector<32x768xf32>
    %37 = vector.extract_strided_slice %32 {offsets = [64, 0], sizes = [32, 768], strides = [1, 1]} : vector<96x768xf32> to vector<32x768xf32>
    %c0_16 = arith.constant 0 : index
    %c0_17 = arith.constant 0 : index
    %38 = vector.load %arg10[%c0_16, %c0_17] : memref<32x768xf32, #tpu.memory_space<vmem>>, vector<32x768xf32>
    %39 = arith.mulf %36, %38 : vector<32x768xf32>
    %40 = arith.mulf %35, %34 : vector<32x768xf32>
    %41 = arith.addf %39, %40 : vector<32x768xf32>
    %42 = math.tanh %41 : vector<32x768xf32>
    %43 = arith.mulf %37, %42 : vector<32x768xf32>
    %c0_18 = arith.constant 0 : index
    %c0_19 = arith.constant 0 : index
    %44 = vector.load %arg10[%c0_18, %c0_19] : memref<32x768xf32, #tpu.memory_space<vmem>>, vector<32x768xf32>
    tpu.vector_store %arg10[%c0_18, %c0_19], %41 {strides = array<i32>} : memref<32x768xf32, #tpu.memory_space<vmem>>, vector<32x768xf32>,
    %c0_20 = arith.constant 0 : index
    %c0_21 = arith.constant 0 : index
    %45 = vector.load %arg6[%c0_20, %c0_21] : memref<32x768xf32, #tpu.memory_space<vmem>>, vector<32x768xf32>
    %46 = arith.mulf %43, %45 : vector<32x768xf32>
    %cst_22 = arith.constant 0.000000e+00 : f32
    %47 = vector.broadcast %cst_22 : f32 to vector<32x19xf32>
    %cst_23 = arith.constant 0.000000e+00 : f32
    %48 = vector.broadcast %cst_23 : f32 to vector<32x109xf32>
    %49 = tpu.concatenate %47, %46, %48 in 1 : vector<32x19xf32>, vector<32x768xf32>, vector<32x109xf32> -> vector<32x896xf32>
    %c0_24 = arith.constant 0 : index
    %c0_25 = arith.constant 0 : index
    %50 = vector.load %arg9[%c0_24, %c0_25] : memref<32x896xf32, #tpu.memory_space<vmem>>, vector<32x896xf32>
    tpu.vector_store %arg9[%c0_24, %c0_25], %49 {strides = array<i32>} : memref<32x896xf32, #tpu.memory_space<vmem>>, vector<32x896xf32>,
    %c0_26 = arith.constant 0 : index
    %c0_27 = arith.constant 0 : index
    %c0_28 = arith.constant 0 : index
    %c0_29 = arith.constant 0 : index
    %51 = vector.load %arg7[%c0_26, %c0_27, %c0_28, %c0_29] : memref<1x1x32x768xf32, #tpu.memory_space<vmem>>, vector<1x1x32x768xf32>
    %52 = vector.shape_cast %51 : vector<1x1x32x768xf32> to vector<32x768xf32>
    %53 = vector.shape_cast %43 : vector<32x768xf32> to vector<1x1x32x768xf32>
    tpu.vector_store %arg7[%c0_26, %c0_27, %c0_28, %c0_29], %53 {strides = array<i32>} : memref<1x1x32x768xf32, #tpu.memory_space<vmem>>, vector<1x1x32x768xf32>,
    %c7_i32 = arith.constant 7 : i32
    %54 = arith.cmpi eq, %arg1, %c7_i32 : i32
    %55 = arith.extui %54 : i1 to i32
    %c0_i32_30 = arith.constant 0 : i32
    %56 = arith.cmpi ne, %55, %c0_i32_30 : i32
    scf.if %56 {
      %c0_31 = arith.constant 0 : index
      %c0_32 = arith.constant 0 : index
      %c0_33 = arith.constant 0 : index
      %57 = vector.load %arg8[%c0_31, %c0_32, %c0_33] : memref<1x32x768xf32, #tpu.memory_space<vmem>>, vector<1x32x768xf32>
      %58 = vector.shape_cast %57 : vector<1x32x768xf32> to vector<32x768xf32>
      %59 = vector.shape_cast %41 : vector<32x768xf32> to vector<1x32x768xf32>
      tpu.vector_store %arg8[%c0_31, %c0_32, %c0_33], %59 {strides = array<i32>} : memref<1x32x768xf32, #tpu.memory_space<vmem>>, vector<1x32x768xf32>,
    } else {
    }
    return
  }
  func.func @transform_0(%arg0: i32, %arg1: i32) -> (i32, i32, i32) {
    %c2_i32 = arith.constant 2 : i32
    %0 = arith.muli %c2_i32, %arg1 : i32
    %c7_i32 = arith.constant 7 : i32
    %1 = arith.subi %c7_i32, %0 : i32
    %2 = arith.muli %arg0, %1 : i32
    %3 = arith.addi %arg1, %2 : i32
    %c0_i32 = arith.constant 0 : i32
    %c0_i32_0 = arith.constant 0 : i32
    %c0_i32_1 = arith.constant 0 : i32
    return %3, %c0_i32, %c0_i32_0 : i32, i32, i32
  }
  func.func @transform_1(%arg0: i32, %arg1: i32) -> (i32, i32, i32) {
    %c0_i32 = arith.constant 0 : i32
    %c0_i32_0 = arith.constant 0 : i32
    %c0_i32_1 = arith.constant 0 : i32
    return %arg0, %c0_i32, %c0_i32_0 : i32, i32, i32
  }
  func.func @transform_2(%arg0: i32, %arg1: i32) -> (i32, i32, i32) {
    %c0_i32 = arith.constant 0 : i32
    %c0_i32_0 = arith.constant 0 : i32
    %c0_i32_1 = arith.constant 0 : i32
    return %arg0, %c0_i32, %c0_i32_0 : i32, i32, i32
  }
  func.func @transform_3(%arg0: i32, %arg1: i32) -> (i32, i32, i32) {
    %c0_i32 = arith.constant 0 : i32
    %c0_i32_0 = arith.constant 0 : i32
    %c0_i32_1 = arith.constant 0 : i32
    return %arg0, %c0_i32, %c0_i32_0 : i32, i32, i32
  }
  func.func @transform_4(%arg0: i32, %arg1: i32) -> (i32, i32) {
    %c0_i32 = arith.constant 0 : i32
    %c0_i32_0 = arith.constant 0 : i32
    %c0_i32_1 = arith.constant 0 : i32
    return %c0_i32, %c0_i32_0 : i32, i32
  }
  func.func @transform_5(%arg0: i32, %arg1: i32) -> (i32, i32, i32, i32) {
    %c0_i32 = arith.constant 0 : i32
    %c0_i32_0 = arith.constant 0 : i32
    %c0_i32_1 = arith.constant 0 : i32
    return %arg0, %arg1, %c0_i32, %c0_i32_0 : i32, i32, i32, i32
  }
  func.func @transform_6(%arg0: i32, %arg1: i32) -> (i32, i32, i32) {
    %c0_i32 = arith.constant 0 : i32
    %c0_i32_0 = arith.constant 0 : i32
    %c0_i32_1 = arith.constant 0 : i32
    return %arg0, %c0_i32, %c0_i32_0 : i32, i32, i32
  }
}

</mosaic_0001>

<bundles_post_ra>
// kernel: tpu_custom_call.1
= control target key start
LH: loop header
LB: loop body
LE: loop exit
PB: predicated region body
PF: predicated region fallthrough
CT: control target
= control target key end

     0   :  { %12 = vsyncpa [#allocation5], 0  ;;  %s9239_s0 = inlined_call_operand.vmem [shape: f32[8,36,768], index: 0, kind: input, shape index: {}]   ;;  %s9240_s1 = inlined_call_operand.vmem [shape: f32[2,128,36], index: 1, kind: input, shape index: {}]   ;;  %s9241_s2 = inlined_call_operand.vmem [shape: f32[2,128,288], index: 2, kind: input, shape index: {}]   ;;  %s9242_s3 = inlined_call_operand.vmem [shape: f32[2,128,1], index: 3, kind: input, shape index: {}]   ;;  %s9243_s4 = inlined_call_operand.vmem [shape: f32[32,768], index: 4, kind: input, shape index: {}]   ;;  %s9244_s5 = inlined_call_operand.hbm [shape: f32[2,8,32,768], index: 5, kind: output, shape index: {0}]   ;;  %s9245_s6 = inlined_call_operand.hbm [shape: f32[2,32,768], index: 6, kind: output, shape index: {1}]  }
   0x1   :  { %14 = vsyncpa [#allocation5 + $0x1], 0 }
   0x2   :  { %15 = vsyncpa [#allocation7], 0 }
   0x3   :  { %17 = vsyncpa [#allocation7 + $0x1], 0  ;;  %s6295_s21 = smov 0   ;;  %s6297_s22 = smov 0  }
   0x4   :  { %s6299_s23 = smov 0   ;;  %s6301_s24 = smov 0  }
   0x5   :  { %s6303_s25 = smov 0   ;;  %s6305_s26 = smov 0  }
   0x6   :  { %s6307_s27 = smov 0   ;;  %s6309_s28 = smov 0  }
   0x7   :  { %s6311_s29 = smov 0   ;;  %s6313_s30 = smov 0  }
   0x8   :  { %s6315_s7 = smov 0  }
   0x9 LB: > { %9347 = sst [smem:[#allocation10_spill]] %s6202_s21  ;;  %s4229_s8 = sadd.s32 4294967295, %s6242_s7   ;;  %s6242_s7 = sphi %s6315_s7, %s23_s7   ;;  %s6238_s30 = sphi %s6313_s30, %s9640_s30   ;;  %s6234_s29 = sphi %s6311_s29, %s9633_s29   ;;  %s6230_s28 = sphi %s6309_s28, %s9632_s28   ;;  %s6226_s27 = sphi %s6307_s27, %s9631_s27   ;;  %s6222_s26 = sphi %s6305_s26, %s9639_s26   ;;  %s6218_s25 = sphi %s6303_s25, %s9638_s25   ;;  %s6214_s24 = sphi %s6301_s24, %s9637_s24   ;;  %s6210_s23 = sphi %s6299_s23, %s9628_s23   ;;  %s6206_s22 = sphi %s6297_s22, %s9636_s22   ;;  %s6202_s21 = sphi %s6295_s21, %s9635_s21  }
   0xa   : > { %9348 = sst [smem:[#allocation11_spill]] %s6210_s23  ;;  %s4230_s9 = sadd.s32 4294967294, %s6242_s7  }
   0xb   : > { %9349 = sst [smem:[#allocation12_spill]] %s6214_s24  ;;  %s32_s10 = sadd.s32 1, %s6234_s29 }
   0xc   : > { %9350 = sst [smem:[#allocation13_spill]] %s6222_s26  ;;  %s35_s11 = sadd.s32 1, %s6238_s30 }
   0xd   : > { %9351 = sst [smem:[#allocation14_spill]] %s6234_s29  ;;  %p33_p0 = scmp.ge.s32.totalorder %s32_s10, 8 }
   0xe   : > { %9352 = sst [smem:[#allocation15_spill]] %s6238_s30  ;;  %s177_s12 = sadd.s32 1, %s6222_s26 }
   0xf   : > { %9353 = sst [smem:[#allocation16_spill]] %s6242_s7  ;;  %p187_p1 = scmp.ne.s32.totalorder %s6222_s26, %s6218_s25 }
  0x10   : > { %p6357_p2 = scmp.eq.s32.totalorder %s4229_s8, 15  ;;  %s9642_s10 = smov (%p33_p0, %s32_s10), 0 }
  0x11   : > { %9355 = sst [smem:[#allocation17_spill]] %s9642_s10  ;;  %s9644_s11 = smov (!%p33_p0, %s35_s11), %s6238_s30 }
  0x12   : > { %s173_s14 = ssub.s32 %s6234_s29, %s9642_s10  ;;  %p6368_p3 = por %p6357_p2, %p187_p1 }
  0x13   : > { %p37_p4 = scmp.ge.s32.totalorder %s9644_s11, 2  ;;  %p193_p5 = scmp.ne.s32.totalorder %s6218_s25, %s6214_s24 }
  0x14   : > { %p6374_p6 = scmp.eq.s32.totalorder %s4230_s9, 15  ;;  %s203_s17 = sadd.s32 1, %s6210_s23 }
  0x15   : > { %s9646_s11 = smov (%p37_p4, %s9644_s11), 0  ;;  %p213_p8 = scmp.ne.s32.totalorder %s6210_s23, %s6206_s22 }
  0x16   : > { %9358 = sst [smem:[#allocation18_spill]] %s9646_s11  ;;  %p6383_p7 = por %p6374_p6, %p193_p5 }
  0x17   : > { %s172_s19 = ssub.s32 %s6238_s30, %s9646_s11  ;;  %p219_p9 = scmp.ne.s32.totalorder %s6206_s22, %s6202_s21 }
  0x18   : > { %s9359_s18 = scalar_select %p6383_p7, 1, 0 }
  0x19   : > { %s174_s20 = sor.u32 %s173_s14, %s172_s19  ;;  %p201_p10 = scmp.eq.s32.totalorder %s172_s19, 0 }
  0x1a   : > { %9360 = sst [smem:[#allocation19_spill]] %s9359_s18  ;;  %p175_p11 = scmp.eq.s32.totalorder %s174_s20, 0 }
  0x1b   : > { %p6395_p12 = por %p213_p8, %p6357_p2  ;;  %p6407_p13 = por %p219_p9, %p6374_p6 }
  0x1c   : > { %s6400_s9 = scalar_select %p201_p10, %s6210_s23, %s203_s17  }
  0x1d   : > { %s6403_s10 = scalar_select %p175_p11, %s6222_s26, %s177_s12  }
  0x1e   : > { %9362 = sst [smem:[#allocation20_spill]] %s6400_s9  ;;  %p4235_p0 = scmp.ge.s32.totalorder %s6242_s7, 1 }
  0x1f   : > { %9363 = sst [smem:[#allocation21_spill]] %s6403_s10  ;;  %p281_p1 = scmp.lt.s32.totalorder %s6242_s7, 17 }
  0x20   : > { %s9364_s29 = scalar_select %p6407_p13, 1, 0 }
  0x21   : > { %p282_p4 = pnand %p4235_p0, %p281_p1 }
  0x22   : > { %9365 = sst [smem:[#allocation22_spill]] %s9364_s29 }
  0x23   : > { %285 = sbr.rel (%p282_p4) target bundleno = 962 (0x3c2), region = 40 }
  0x2a   : > { %s9255_s12 = sand.u32 1, %s6218_s25   ;;  %s9257_s13 = sand.u32 1, %s6206_s22  }
  0x2b   : > { %s4985_s14 = smul.u32 192, %s9255_s12  ;;  %s4236_s16 = sshll.u32 %s6226_s27, 1 }
  0x2c   : > { %s4986_s17 = smul.u32 192, %s9257_s13  ;;  %s336_s19 = ssub.s32 7, %s4236_s16 }
  0x2d   : > { %s337_s20 = smul.u32 %s6230_s28, %s336_s19  ;;  %p348_p2 = scmp.lt.s32.totalorder %s6230_s28, 1 }
  0x2e   : > { %s6446_s23 = scalar_lea.vmem [#allocation6], %s4986_s17  ;;  %p4243_p6 = scmp.ne.s32.totalorder %s6226_s27, 0 }
  0x2f   : > { %s338_s11 = sadd.s32 %s6226_s27, %s337_s20  ;;  %v6244_v0 = vmov (!%p4243_p6), 0.0  }
  0x30   : > { %p339_p5 = scmp.lt.s32.totalorder %s338_s11, 7  ;;  %366 = sbr.rel (%p4243_p6) target bundleno = 75 (0x4b), region = 44  ;;  %367 = vst [vmem:[#allocation2] sm:$0xff] (!%p4243_p6), %v6244_v0  ;;  %368 = vst [vmem:[#allocation2 + $0x8] sm:$0xff] (!%p4243_p6), %v6244_v0 }
  0x31   : > { %s349_s30 = scalar_select %p348_p2, %s6230_s28, 1 }
  0x32   : > { %s9648_s11 = smov (!%p339_p5, %s338_s11), 7  ;;  %369 = vst [vmem:[#allocation2 + $0x10] sm:$0xff] (!%p4243_p6), %v6244_v0  ;;  %370 = vst [vmem:[#allocation2 + $0x18] sm:$0xff] (!%p4243_p6), %v6244_v0 }
  0x33   : > { %s4423_s10 = sshll.u32 %s349_s30, 7  ;;  %s4988_s26 = smul.u32 384, %s349_s30  ;;  %371 = vst [vmem:[#allocation2 + $0x20] sm:$0xff] (!%p4243_p6), %v6244_v0  ;;  %372 = vst [vmem:[#allocation2 + $0x28] sm:$0xff] (!%p4243_p6), %v6244_v0 }
  0x34   : > { %s4987_s9 = smul.u32 240, %s9648_s11  ;;  %s6427_s21 = scalar_lea.vmem %s9240_s1, %s4423_s10  ;;  %373 = vst [vmem:[#allocation2 + $0x30] sm:$0xff] (!%p4243_p6), %v6244_v0  ;;  %374 = vst [vmem:[#allocation2 + $0x38] sm:$0xff] (!%p4243_p6), %v6244_v0 }
  0x35   : > { %s6432_s24 = scalar_lea.vmem %s9241_s2, %s4988_s26  ;;  %s6437_s20 = scalar_lea.vmem %s9242_s3, %s4423_s10  ;;  %375 = vst [vmem:[#allocation2 + $0x40] sm:$0xff] (!%p4243_p6), %v6244_v0  ;;  %376 = vst [vmem:[#allocation2 + $0x48] sm:$0xff] (!%p4243_p6), %v6244_v0 }
  0x36   : > { %s6442_s30 = scalar_lea.vmem %s9239_s0, %s4987_s9  ;;  %s6444_s11 = scalar_lea.vmem [#allocation4], %s4985_s14  ;;  %377 = vst [vmem:[#allocation2 + $0x50] sm:$0xff] (!%p4243_p6), %v6244_v0  ;;  %378 = vst [vmem:[#allocation2 + $0x58] sm:$0xff] (!%p4243_p6), %v6244_v0 }
  0x37   : > { %379 = vst [vmem:[#allocation2 + $0x60] sm:$0xff] %v6244_v0  ;;  %380 = vst [vmem:[#allocation2 + $0x68] sm:$0xff] %v6244_v0 }
  0x38   : > { %381 = vst [vmem:[#allocation2 + $0x70] sm:$0xff] %v6244_v0  ;;  %382 = vst [vmem:[#allocation2 + $0x78] sm:$0xff] %v6244_v0 }
  0x39   : > { %383 = vst [vmem:[#allocation2 + $0x80] sm:$0xff] %v6244_v0  ;;  %384 = vst [vmem:[#allocation2 + $0x88] sm:$0xff] %v6244_v0 }
  0x3a   : > { %385 = vst [vmem:[#allocation2 + $0x90] sm:$0xff] %v6244_v0  ;;  %386 = vst [vmem:[#allocation2 + $0x98] sm:$0xff] %v6244_v0 }
  0x3b   : > { %387 = vst [vmem:[#allocation2 + $0xa0] sm:$0xff] %v6244_v0  ;;  %388 = vst [vmem:[#allocation2 + $0xa8] sm:$0xff] %v6244_v0 }
  0x3c   : > { %389 = vst [vmem:[#allocation2 + $0xb0] sm:$0xff] %v6244_v0  ;;  %390 = vst [vmem:[#allocation2 + $0xb8] sm:$0xff] %v6244_v0 }
  0x3d   : > { %391 = vst [vmem:[#allocation2 + $0xc0] sm:$0xff] %v6244_v0  ;;  %392 = vst [vmem:[#allocation2 + $0xc8] sm:$0xff] %v6244_v0 }
  0x3e   : > { %393 = vst [vmem:[#allocation2 + $0xd0] sm:$0xff] %v6244_v0  ;;  %394 = vst [vmem:[#allocation2 + $0xd8] sm:$0xff] %v6244_v0 }
  0x3f   : > { %395 = vst [vmem:[#allocation3] sm:$0xff] %v6244_v0  ;;  %396 = vst [vmem:[#allocation3 + $0x8] sm:$0xff] %v6244_v0 }
  0x40   : > { %397 = vst [vmem:[#allocation3 + $0x10] sm:$0xff] %v6244_v0  ;;  %398 = vst [vmem:[#allocation3 + $0x18] sm:$0xff] %v6244_v0 }
  0x41   : > { %399 = vst [vmem:[#allocation3 + $0x20] sm:$0xff] %v6244_v0  ;;  %400 = vst [vmem:[#allocation3 + $0x28] sm:$0xff] %v6244_v0 }
  0x42   : > { %401 = vst [vmem:[#allocation3 + $0x30] sm:$0xff] %v6244_v0  ;;  %402 = vst [vmem:[#allocation3 + $0x38] sm:$0xff] %v6244_v0 }
  0x43   : > { %403 = vst [vmem:[#allocation3 + $0x40] sm:$0xff] %v6244_v0  ;;  %404 = vst [vmem:[#allocation3 + $0x48] sm:$0xff] %v6244_v0 }
  0x44   : > { %405 = vst [vmem:[#allocation3 + $0x50] sm:$0xff] %v6244_v0  ;;  %406 = vst [vmem:[#allocation3 + $0x58] sm:$0xff] %v6244_v0 }
  0x45   : > { %407 = vst [vmem:[#allocation3 + $0x60] sm:$0xff] %v6244_v0  ;;  %408 = vst [vmem:[#allocation3 + $0x68] sm:$0xff] %v6244_v0 }
  0x46   : > { %409 = vst [vmem:[#allocation3 + $0x70] sm:$0xff] %v6244_v0  ;;  %410 = vst [vmem:[#allocation3 + $0x78] sm:$0xff] %v6244_v0 }
  0x47   : > { %411 = vst [vmem:[#allocation3 + $0x80] sm:$0xff] %v6244_v0  ;;  %412 = vst [vmem:[#allocation3 + $0x88] sm:$0xff] %v6244_v0 }
  0x48   : > { %413 = vst [vmem:[#allocation3 + $0x90] sm:$0xff] %v6244_v0  ;;  %414 = vst [vmem:[#allocation3 + $0x98] sm:$0xff] %v6244_v0 }
  0x49   : > { %415 = vst [vmem:[#allocation3 + $0xa0] sm:$0xff] %v6244_v0  ;;  %416 = vst [vmem:[#allocation3 + $0xa8] sm:$0xff] %v6244_v0 }
  0x4a   : > { %417 = vst [vmem:[#allocation3 + $0xb0] sm:$0xff] %v6244_v0  ;;  %418 = vst [vmem:[#allocation3 + $0xb8] sm:$0xff] %v6244_v0 }
  0x4b PF: > { %v6449_v1 = vld [vmem:[#allocation2 + $0x8] sm:$0xff]  ;;  %v6453_v3 = vld [vmem:[#allocation2] sm:$0xff]  ;;  %v6469_v9 = vld [vmem:[#allocation2 + $0x78] sm:$0xff]  ;;  %s6245_s26 = smov 127   ;;  %s6246_s29 = smov 126   ;;  %v9260_v37 = vmov 0.0  }
  0x4c   : > { %v6471_v10 = vld [vmem:[#allocation2 + $0x80] sm:$0xff]  ;;  %v6485_v13 = vld [vmem:[#allocation2 + $0xb0] sm:$0xff]  ;;  %v6487_v14 = vld [vmem:[#allocation2 + $0xb8] sm:$0xff]  ;;  %1015 = vmatprep.mubr.f32.mxu0 %v9260_v37  ;;  %vm610_vm0 = vcmask 1043456   ;;  %vm561_vm1 = vcmask 293888   ;;  %693 = vmatprep.mubr.f32.mxu1 %v9260_v37  ;;  %s6248_s7 = smov 110  }
  0x4d   : > { %v6451_v2 = vld [vmem:[#allocation2 + $0x10] sm:$0xff]  ;;  %v6483_v12 = vpack.i.bf16 %v6471_v10, %v6469_v9  ;;  %v6491_v16 = vld [vmem:[#allocation2 + $0xa8] sm:$0xff]  ;;  %v6497_v17 = vpack.i.bf16 %v6487_v14, %v6485_v13  ;;  %v446_v20 = vld [vmem:[%s6442_s30 + $0x58] sm:$0xff]  ;;  %v4453_v48 = vpack.c.bf16 %v6485_v13, %v6469_v9  ;;  %s6249_s10 = smov 109   ;;  %s6250_s18 = smov 108   ;;  %vm1224_vm2 = vcmask 1039360  }
  0x4e   : > { %v6457_v4 = vpack.i.bf16 %v6451_v2, %v6449_v1  ;;  %v6489_v15 = vld [vmem:[#allocation2 + $0x70] sm:$0xff]  ;;  %v440_v19 = vld [vmem:[%s6442_s30 + $0x28] sm:$0xff]  ;;  %v439_v21 = vld [vmem:[%s6442_s30 + $0x20] sm:$0xff]  ;;  %s6251_s9 = smov 92   ;;  %s6252_s12 = smov 91   ;;  %vm1329_vm3 = vcmask 1031168  }
  0x4f   : > { %v6459_v5 = vld [vmem:[#allocation2 + $0x38] sm:$0xff]  ;;  %v6503_v18 = vpack.i.bf16 %v6491_v16, %v6489_v15  ;;  %v445_v22 = vld [vmem:[%s6442_s30 + $0x50] sm:$0xff]  ;;  %v452_v23 = vld [vmem:[%s6442_s30 + $0x88] sm:$0xff]  ;;  %v4441_v25 = vpack.c.bf16 %v446_v20, %v440_v19  ;;  %v4455_v50 = vpack.c.bf16 %v6491_v16, %v6489_v15  ;;  %vm1434_vm4 = vcmask 900096   ;;  %s6255_s16 = smov 19   ;;  %p4418_p8 = scmp.ne.s32.totalorder %s6226_s27, 7 }
  0x50   : > { %v6461_v6 = vld [vmem:[#allocation2 + $0x40] sm:$0xff]  ;;  %v6463_v7 = vld [vmem:[#allocation2 + $0x48] sm:$0xff]  ;;  %v6467_v8 = vpack.i.bf16 %v6459_v5, %v6453_v3  ;;  %5107 = vrot.lane.b32.xlu0 %v6457_v4, %s6245_s26  ;;  %v458_v24 = vld [vmem:[%s6442_s30 + $0xb8] sm:$0xff]  ;;  %v4443_v26 = vpack.c.bf16 %v445_v22, %v439_v21  ;;  %v4451_v47 = vpack.c.bf16 %v6459_v5, %v6453_v3  ;;  %vm1539_vm5 = vcmask 891904  }
  0x51   : > { %v6477_v11 = vpack.i.bf16 %v6463_v7, %v6461_v6  ;;  %v451_v27 = vld [vmem:[%s6442_s30 + $0x80] sm:$0xff]  ;;  %v457_v28 = vld [vmem:[%s6442_s30 + $0xb0] sm:$0xff]  ;;  %v4445_v29 = vpack.c.bf16 %v458_v24, %v452_v23  ;;  %4442 = vmatprep.subr.bf16.mxu0 %v4441_v25  ;;  %v436_v30 = vld [vmem:[%s6442_s30 + $0x8] sm:$0xff]  ;;  %v4449_v43 = vpack.c.bf16 %v6461_v6, %v6449_v1  ;;  %vm1644_vm6 = vcmask 883712  }
  0x52   : > { %5117 = vrot.lane.b32.xlu1 %v6467_v8, %s6245_s26  ;;  %v442_v31 = vld [vmem:[%s6442_s30 + $0x38] sm:$0xff]  ;;  %v435_v32 = vld [vmem:[%s6442_s30] sm:$0xff]  ;;  %4444 = vmatpush1.bf16.msra.mxu0 %v4443_v26  ;;  %v4447_v33 = vpack.c.bf16 %v457_v28, %v451_v27  ;;  %v441_v34 = vld [vmem:[%s6442_s30 + $0x30] sm:$0xff]  ;;  %vm1749_vm7 = vcmask 752640   ;;  %vm1854_vm8 = vcmask 744448   ;;  %vm1959_vm9 = vcmask 736256  }
  0x53   : > { %v448_v35 = vld [vmem:[%s6442_s30 + $0x68] sm:$0xff]  ;;  %v454_v36 = vld [vmem:[%s6442_s30 + $0x98] sm:$0xff]  ;;  %4446 = vmatprep.subr.bf16.mxu0 %v4445_v29  ;;  %v4425_v39 = vpack.c.bf16 %v442_v31, %v436_v30  ;;  %v4427_v40 = vpack.c.bf16 %v441_v34, %v435_v32  ;;  %v463_v42 = vld [vmem:[%s6442_s30 + $0xe0] sm:$0xf]  ;;  %vm2056_vm10 = vcmask 261120   ;;  %vm3911_vm11 = vcmask 154624  }
  0x54   : > { %5112 = vrot.lane.b32.xlu0 %v6477_v11, %s6245_s26  ;;  %v464_v38 = vld [vmem:[%s6442_s30 + $0xe8] sm:$0xf]  ;;  %v4429_v41 = vpack.c.bf16 %v454_v36, %v448_v35  ;;  %v447_v44 = vld [vmem:[%s6442_s30 + $0x60] sm:$0xff]  ;;  %v453_v45 = vld [vmem:[%s6442_s30 + $0x90] sm:$0xff] }
  0x55   : > { %4426 = vmatprep.subr.bf16.mxu1 %v4425_v39  ;;  %v6542_v46 = vld [vmem:[%s6427_s21] sm:$0xff]  ;;  %v4431_v49 = vpack.c.bf16 %v453_v45, %v447_v44  ;;  %v460_v51 = vld [vmem:[%s6442_s30 + $0xc8] sm:$0xf]  ;;  %v6576_v54 = vld [vmem:[%s6427_s21 + $0x10] sm:$0xff]  ;;  %v4527_v45 = vpack.c.bf16 %v6487_v14, %v6471_v10 }
  0x56   : > { %5122 = vrot.lane.b32.xlu1 %v6483_v12, %s6245_s26  ;;  %4448 = vmatpush1.bf16.msra.mxu0 %v4447_v33  ;;  %v6562_v52 = vld [vmem:[%s6427_s21 + $0x8] sm:$0xff]  ;;  %v459_v53 = vld [vmem:[%s6442_s30 + $0xc0] sm:$0xf]  ;;  %v6589_v55 = vld [vmem:[%s6427_s21 + $0x18] sm:$0xff] }
  0x57   : > { %4280 = vmatprep.subr.msk.mxu0 %vm610_vm0, %v464_v38  ;;  %4428 = vmatpush1.bf16.msra.mxu1 %v4427_v40  ;;  %v6602_v56 = vld [vmem:[%s6427_s21 + $0x20] sm:$0xff]  ;;  %v6615_v57 = vld [vmem:[%s6427_s21 + $0x28] sm:$0xff]  ;;  %v6628_v58 = vld [vmem:[%s6427_s21 + $0x30] sm:$0xff] }
  0x58   : > { %5127 = vrot.lane.b32.xlu0 %v6497_v17, %s6245_s26  ;;  %4430 = vmatprep.subr.bf16.mxu1 %v4429_v41  ;;  %v6641_v59 = vld [vmem:[%s6427_s21 + $0x38] sm:$0xff]  ;;  %v6654_v60 = vld [vmem:[%s6427_s21 + $0x40] sm:$0xff]  ;;  %v444_v62 = vld [vmem:[%s6442_s30 + $0x48] sm:$0xff] }
  0x59   : > { %v438_v61 = vld [vmem:[%s6442_s30 + $0x18] sm:$0xff]  ;;  %v6669_v63 = vld [vmem:[%s6427_s21 + $0x48] sm:$0xff]  ;;  %v437_v1 = vld [vmem:[%s6442_s30 + $0x10] sm:$0xff] }
  0x5a   : > { %5132 = vrot.lane.b32.xlu1 %v6503_v18, %s6245_s26  ;;  %4281 = vmatpush1.msk.msra.mxu0 %vm610_vm0, %v463_v42  ;;  %v4433_v0 = vpack.c.bf16 %v444_v62, %v438_v61  ;;  %v443_v3 = vld [vmem:[%s6442_s30 + $0x40] sm:$0xff]  ;;  %v450_v5 = vld [vmem:[%s6442_s30 + $0x78] sm:$0xff]  ;;  %v456_v6 = vld [vmem:[%s6442_s30 + $0xa8] sm:$0xff] }
  0x5b   : > { %4450 = vmatprep.subr.bf16.mxu0 %v4449_v43  ;;  %4282 = vmatmul.mubr.msk.f32.vlgmr.msra.gmra.mrb[0].mxu0 %vm561_vm1, %v6542_v46  ;;  %v4435_v9 = vpack.c.bf16 %v443_v3, %v437_v1  ;;  %v6686_v13 = vld [vmem:[%s6427_s21 + $0x50] sm:$0xff]  ;;  %v4437_v15 = vpack.c.bf16 %v456_v6, %v450_v5  ;;  %v455_v19 = vld [vmem:[%s6442_s30 + $0xa0] sm:$0xff]  ;;  %v6700_v21 = vld [vmem:[%s6427_s21 + $0x58] sm:$0xff]  ;;  %v4523_v43 = vpack.c.bf16 %v6463_v7, %v6451_v2  ;;  %v6253_v2 = vmov 0  }
  0x5c   : > { %5137 = vrot.lane.b32.xlu0 %v6457_v4, %s6246_s29  ;;  %4452 = vmatpush1.bf16.msra.mxu0 %v4451_v47  ;;  %v449_v16 = vld [vmem:[%s6442_s30 + $0x70] sm:$0xff]  ;;  %v462_v22 = vld [vmem:[%s6442_s30 + $0xd8] sm:$0xf]  ;;  %v6714_v25 = vld [vmem:[%s6427_s21 + $0x60] sm:$0xff] }
  0x5d   : > { %4454 = vmatprep.subr.bf16.mxu0 %v4453_v48  ;;  %4432 = vmatpush1.bf16.msra.mxu1 %v4431_v49  ;;  %v4439_v20 = vpack.c.bf16 %v455_v19, %v449_v16  ;;  %v1115_v23 = vld [vmem:[#allocation2 + $0x18] sm:$0xff]  ;;  %v1122_v24 = vld [vmem:[#allocation2 + $0x50] sm:$0xff]  ;;  %v6730_v28 = vld [vmem:[%s6427_s21 + $0x68] sm:$0xff] }
  0x5e   : > { %5142 = vrot.lane.b32.xlu1 %v6477_v11, %s6246_s29  ;;  %1021 = vmatprep.mubr.f32.mxu0 %v9260_v37  ;;  %v461_v26 = vld [vmem:[%s6442_s30 + $0xd0] sm:$0xf]  ;;  %v4521_v27 = vpack.c.bf16 %v1122_v24, %v1115_v23  ;;  %v1116_v29 = vld [vmem:[#allocation2 + $0x20] sm:$0xff]  ;;  %v1123_v30 = vld [vmem:[#allocation2 + $0x58] sm:$0xff] }
  0x5f   : > { %4244 = vmatprep.subr.msk.mxu1 %vm610_vm0, %v460_v51  ;;  %4283 = vmatmul.mubr.msk.f32.gmra.mrb[2].mxu0 %vm561_vm1, %v6562_v52  ;;  %v6744_v31 = vld [vmem:[%s6427_s21 + $0x70] sm:$0xff]  ;;  %v6752_v32 = vpack.i.bf16 %v1116_v29, %v1115_v23  ;;  %v6757_v33 = vpack.i.bf16 %v1123_v30, %v1122_v24  ;;  %v1129_v34 = vld [vmem:[#allocation2 + $0x88] sm:$0xff]  ;;  %v1136_v36 = vld [vmem:[#allocation2 + $0xc0] sm:$0xff] }
  0x60   : > { %5147 = vrot.lane.b32.xlu0 %v6467_v8, %s6246_s29  ;;  %4456 = vmatpush1.bf16.msra.mxu0 %v4455_v50  ;;  %v1130_v35 = vld [vmem:[#allocation2 + $0x90] sm:$0xff]  ;;  %v1137_v38 = vld [vmem:[#allocation2 + $0xc8] sm:$0xff]  ;;  %v6761_v39 = vld [vmem:[%s6427_s21 + $0x78] sm:$0xff]  ;;  %v4525_v44 = vpack.c.bf16 %v1136_v36, %v1129_v34  ;;  %s6254_s21 = smov 90  }
  0x61   : > { %1027 = vmatprep.mubr.f32.mxu0 %v9260_v37  ;;  %4245 = vmatpush1.msk.msra.mxu1 %vm610_vm0, %v459_v53  ;;  %v6764_v40 = vld [vmem:[%s6432_s24 + $0x8] sm:$0xff]  ;;  %v6772_v41 = vpack.i.bf16 %v1130_v35, %v1129_v34  ;;  %v6777_v42 = vpack.i.bf16 %v1137_v38, %v1136_v36 }
  0x62   : > { %5152 = vrot.lane.b32.xlu1 %v6483_v12, %s6246_s29  ;;  %4246 = vmatmul.mubr.msk.f32.vlgmr.msra.gmra.mrb[0].mxu1 %vm561_vm1, %v6542_v46 }
  0x63   : > { %4284 = vmatmul.mubr.msk.f32.gmra.mrb[4].mxu0 %vm561_vm1, %v6576_v54  ;;  %699 = vmatprep.mubr.f32.mxu1 %v9260_v37 }
  0x64   : > { %5157 = vrot.lane.b32.xlu0 %v6497_v17, %s6246_s29  ;;  %1033 = vmatprep.mubr.f32.mxu0 %v9260_v37 }
  0x65   : > { %4434 = vmatprep.subr.bf16.mxu1 %v4433_v0  ;;  %5666 = vset.pattern.permute.xlu0 %v6253_v2 }
  0x66   : > { %5162 = vrot.lane.b32.xlu1 %v6503_v18, %s6246_s29  ;;  %4247 = vmatmul.mubr.msk.f32.gmra.mrb[2].mxu1 %vm561_vm1, %v6562_v52 }
  0x67   : > { %4285 = vmatmul.mubr.msk.f32.gmra.mrb[6].mxu0 %vm561_vm1, %v6589_v55  ;;  %705 = vmatprep.mubr.f32.mxu1 %v9260_v37 }
  0x68   : > { %5167 = vrot.lane.b32.xlu0 %v6457_v4, %s6248_s7  ;;  %1039 = vmatprep.mubr.f32.mxu0 %v9260_v37 }
  0x69   : > { %4436 = vmatpush1.bf16.msra.mxu1 %v4435_v9  ;;  %5667 = vset.pattern.permute.xlu1 %v6253_v2 }
  0x6a   : > { %5172 = vrot.lane.b32.xlu1 %v6477_v11, %s6248_s7  ;;  %4248 = vmatmul.mubr.msk.f32.gmra.mrb[4].mxu1 %vm561_vm1, %v6576_v54 }
  0x6b   : > { %4286 = vmatmul.mubr.msk.f32.gmra.mrb[8].mxu0 %vm561_vm1, %v6602_v56  ;;  %711 = vmatprep.mubr.f32.mxu1 %v9260_v37 }
  0x6c   : > { %5177 = vrot.lane.b32.xlu0 %v6467_v8, %s6248_s7  ;;  %1045 = vmatprep.mubr.f32.mxu0 %v9260_v37 }
  0x6d   : > { %4438 = vmatprep.subr.bf16.mxu1 %v4437_v15 }
  0x6e   : > { %5182 = vrot.lane.b32.xlu1 %v6483_v12, %s6248_s7  ;;  %4249 = vmatmul.mubr.msk.f32.gmra.mrb[6].mxu1 %vm561_vm1, %v6589_v55 }
  0x6f   : > { %4287 = vmatmul.mubr.msk.f32.gmra.mrb[10].mxu0 %vm561_vm1, %v6615_v57  ;;  %717 = vmatprep.mubr.f32.mxu1 %v9260_v37 }
  0x70   : > { %5187 = vrot.lane.b32.xlu0 %v6497_v17, %s6248_s7  ;;  %1051 = vmatprep.mubr.f32.mxu0 %v9260_v37 }
  0x71   : > { %4440 = vmatpush1.bf16.msra.mxu1 %v4439_v20 }
  0x72   : > { %5192 = vrot.lane.b32.xlu1 %v6503_v18, %s6248_s7  ;;  %4250 = vmatmul.mubr.msk.f32.gmra.mrb[8].mxu1 %vm561_vm1, %v6602_v56 }
  0x73   : > { %4288 = vmatmul.mubr.msk.f32.gmra.mrb[12].mxu0 %vm561_vm1, %v6628_v58  ;;  %723 = vmatprep.mubr.f32.mxu1 %v9260_v37 }
  0x74   : > { %5197 = vrot.lane.b32.xlu0 %v6457_v4, %s6249_s10  ;;  %1057 = vmatprep.mubr.f32.mxu0 %v9260_v37 }
  0x75   : > { %4262 = vmatprep.subr.msk.mxu1 %vm610_vm0, %v462_v22 }
  0x76   : > { %5202 = vrot.lane.b32.xlu1 %v6477_v11, %s6249_s10  ;;  %4251 = vmatmul.mubr.msk.f32.gmra.mrb[10].mxu1 %vm561_vm1, %v6615_v57 }
  0x77   : > { %4289 = vmatmul.mubr.msk.f32.gmra.mrb[14].mxu0 %vm561_vm1, %v6641_v59  ;;  %729 = vmatprep.mubr.f32.mxu1 %v9260_v37 }
  0x78   : > { %5207 = vrot.lane.b32.xlu0 %v6467_v8, %s6249_s10  ;;  %1063 = vmatprep.mubr.f32.mxu0 %v9260_v37 }
  0x79   : > { %4263 = vmatpush1.msk.msra.mxu1 %vm610_vm0, %v461_v26 }
  0x7a   : > { %5212 = vrot.lane.b32.xlu1 %v6483_v12, %s6249_s10  ;;  %4252 = vmatmul.mubr.msk.f32.gmra.mrb[12].mxu1 %vm561_vm1, %v6628_v58 }
  0x7b   : > { %4290 = vmatmul.mubr.msk.f32.gmra.mrb[16].mxu0 %vm561_vm1, %v6654_v60  ;;  %735 = vmatprep.mubr.f32.mxu1 %v9260_v37 }
  0x7c   : > { %5217 = vrot.lane.b32.xlu0 %v6497_v17, %s6249_s10  ;;  %1069 = vmatprep.mubr.f32.mxu0 %v9260_v37 }
  0x7d   : > { %4522 = vmatprep.subr.bf16.mxu1 %v4521_v27 }
  0x7e   : > { %5222 = vrot.lane.b32.xlu1 %v6503_v18, %s6249_s10  ;;  %4253 = vmatmul.mubr.msk.f32.gmra.mrb[14].mxu1 %vm561_vm1, %v6641_v59 }
  0x7f   : > { %4291 = vmatmul.mubr.msk.f32.gmra.mrb[18].mxu0 %vm561_vm1, %v6669_v63  ;;  %741 = vmatprep.mubr.f32.mxu1 %v9260_v37 }
  0x80   : > { %5227 = vrot.lane.b32.xlu0 %v6457_v4, %s6250_s18  ;;  %1075 = vmatprep.mubr.f32.mxu0 %v9260_v37 }
  0x82   : > { %5232 = vrot.lane.b32.xlu1 %v6477_v11, %s6250_s18  ;;  %4254 = vmatmul.mubr.msk.f32.gmra.mrb[16].mxu1 %vm561_vm1, %v6654_v60 }
  0x83   : > { %4292 = vmatmul.mubr.msk.f32.gmra.mrb[20].mxu0 %vm561_vm1, %v6686_v13  ;;  %747 = vmatprep.mubr.f32.mxu1 %v9260_v37 }
  0x84   : > { %5237 = vrot.lane.b32.xlu0 %v6467_v8, %s6250_s18  ;;  %1081 = vmatprep.mubr.f32.mxu0 %v9260_v37 }
  0x86   : > { %5242 = vrot.lane.b32.xlu1 %v6483_v12, %s6250_s18  ;;  %4255 = vmatmul.mubr.msk.f32.gmra.mrb[18].mxu1 %vm561_vm1, %v6669_v63 }
  0x87   : > { %4293 = vmatmul.mubr.msk.f32.gmra.mrb[22].mxu0 %vm561_vm1, %v6700_v21  ;;  %753 = vmatprep.mubr.f32.mxu1 %v9260_v37 }
  0x88   : > { %5247 = vrot.lane.b32.xlu0 %v6497_v17, %s6250_s18  ;;  %1087 = vmatprep.mubr.f32.mxu0 %v9260_v37 }
  0x8a   : > { %5252 = vrot.lane.b32.xlu1 %v6503_v18, %s6250_s18  ;;  %4256 = vmatmul.mubr.msk.f32.gmra.mrb[20].mxu1 %vm561_vm1, %v6686_v13 }
  0x8b   : > { %4294 = vmatmul.mubr.msk.f32.gmra.mrb[24].mxu0 %vm561_vm1, %v6714_v25  ;;  %759 = vmatprep.mubr.f32.mxu1 %v9260_v37 }
  0x8c   : > { %5257 = vrot.lane.b32.xlu0 %v6457_v4, %s6251_s9  ;;  %1093 = vmatprep.mubr.f32.mxu0 %v9260_v37 }
  0x8e   : > { %5262 = vrot.lane.b32.xlu1 %v6477_v11, %s6251_s9  ;;  %4257 = vmatmul.mubr.msk.f32.gmra.mrb[22].mxu1 %vm561_vm1, %v6700_v21 }
  0x8f   : > { %4295 = vmatmul.mubr.msk.f32.gmra.mrb[26].mxu0 %vm561_vm1, %v6730_v28  ;;  %765 = vmatprep.mubr.f32.mxu1 %v9260_v37 }
  0x90   : > { %5267 = vrot.lane.b32.xlu0 %v6467_v8, %s6251_s9  ;;  %1099 = vmatprep.mubr.f32.mxu0 %v9260_v37 }
  0x92   : > { %5272 = vrot.lane.b32.xlu1 %v6483_v12, %s6251_s9  ;;  %4258 = vmatmul.mubr.msk.f32.gmra.mrb[24].mxu1 %vm561_vm1, %v6714_v25 }
  0x93   : > { %4296 = vmatmul.mubr.msk.f32.gmra.mrb[28].mxu0 %vm561_vm1, %v6744_v31  ;;  %771 = vmatprep.mubr.f32.mxu1 %v9260_v37 }
  0x94   : > { %5277 = vrot.lane.b32.xlu0 %v6497_v17, %s6251_s9  ;;  %1105 = vmatprep.mubr.f32.mxu0 %v9260_v37 }
  0x96   : > { %5282 = vrot.lane.b32.xlu1 %v6503_v18, %s6251_s9  ;;  %4259 = vmatmul.mubr.msk.f32.gmra.mrb[26].mxu1 %vm561_vm1, %v6730_v28 }
  0x97   : > { %4297 = vmatmul.mubr.msk.f32.gmra.mrb[30].mxu0 %vm561_vm1, %v6761_v39  ;;  %777 = vmatprep.mubr.f32.mxu1 %v9260_v37 }
  0x98   : > { %5287 = vrot.lane.b32.xlu0 %v6457_v4, %s6252_s12  ;;  %2169 = vmatprep.mubr.f32.mxu0 %v6764_v40 }
  0x9a   : > { %5292 = vrot.lane.b32.xlu1 %v6477_v11, %s6252_s12  ;;  %4260 = vmatmul.mubr.msk.f32.gmra.mrb[28].mxu1 %vm561_vm1, %v6744_v31 }
  0x9b   : > { %783 = vmatprep.mubr.f32.mxu1 %v9260_v37 }
  0x9c   : > { %5297 = vrot.lane.b32.xlu0 %v6467_v8, %s6252_s12 }
  0x9e   : > { %5302 = vrot.lane.b32.xlu1 %v6483_v12, %s6252_s12  ;;  %4261 = vmatmul.mubr.msk.f32.gmra.mrb[30].mxu1 %vm561_vm1, %v6761_v39 }
  0x9f   : > { %854 = vmatprep.mubr.f32.mxu1 %v9260_v37 }
  0xa0   : > { %5307 = vrot.lane.b32.xlu0 %v6497_v17, %s6252_s12 }
  0xa2   : > { %5312 = vrot.lane.b32.xlu1 %v6503_v18, %s6252_s12  ;;  %4264 = vmatmul.mubr.msk.f32.vlgmr.msra.gmra.mrb[32].mxu1 %vm561_vm1, %v6542_v46 }
  0xa3   : > { %4524 = vmatpush1.bf16.msra.mxu1 %v4523_v43  ;;  %860 = vmatprep.mubr.f32.mxu1 %v9260_v37 }
  0xa4   : > { %5317 = vrot.lane.b32.xlu0 %v6752_v32, %s6245_s26  ;;  %4526 = vmatprep.subr.bf16.mxu1 %v4525_v44 }
  0xa6   : > { %5322 = vrot.lane.b32.xlu1 %v6757_v33, %s6245_s26  ;;  %4265 = vmatmul.mubr.msk.f32.gmra.mrb[34].mxu1 %vm561_vm1, %v6562_v52 }
  0xa7   : > { %4528 = vmatpush1.bf16.msra.mxu1 %v4527_v45  ;;  %866 = vmatprep.mubr.f32.mxu1 %v9260_v37 }
  0xa8   : > { %5327 = vrot.lane.b32.xlu0 %v6772_v41, %s6245_s26 }
  0xaa   : > { %5332 = vrot.lane.b32.xlu1 %v6777_v42, %s6245_s26  ;;  %4266 = vmatmul.mubr.msk.f32.gmra.mrb[36].mxu1 %vm561_vm1, %v6576_v54 }
  0xab   : > { %872 = vmatprep.mubr.f32.mxu1 %v9260_v37 }
  0xac   : > { %5337 = vrot.lane.b32.xlu0 %v6752_v32, %s6246_s29 }
  0xae   : > { %5342 = vrot.lane.b32.xlu1 %v6757_v33, %s6246_s29  ;;  %4267 = vmatmul.mubr.msk.f32.gmra.mrb[38].mxu1 %vm561_vm1, %v6589_v55 }
  0xaf   : > { %878 = vmatprep.mubr.f32.mxu1 %v9260_v37 }
  0xb0   : > { %5347 = vrot.lane.b32.xlu0 %v6772_v41, %s6246_s29 }
  0xb2   : > { %5352 = vrot.lane.b32.xlu1 %v6777_v42, %s6246_s29  ;;  %4268 = vmatmul.mubr.msk.f32.gmra.mrb[40].mxu1 %vm561_vm1, %v6602_v56 }
  0xb3   : > { %884 = vmatprep.mubr.f32.mxu1 %v9260_v37 }
  0xb4   : > { %5357 = vrot.lane.b32.xlu0 %v6752_v32, %s6248_s7 }
  0xb6   : > { %5362 = vrot.lane.b32.xlu1 %v6757_v33, %s6248_s7  ;;  %4269 = vmatmul.mubr.msk.f32.gmra.mrb[42].mxu1 %vm561_vm1, %v6615_v57 }
  0xb7   : > { %890 = vmatprep.mubr.f32.mxu1 %v9260_v37 }
  0xb8   : > { %5367 = vrot.lane.b32.xlu0 %v6772_v41, %s6248_s7 }
  0xba   : > { %5372 = vrot.lane.b32.xlu1 %v6777_v42, %s6248_s7  ;;  %4270 = vmatmul.mubr.msk.f32.gmra.mrb[44].mxu1 %vm561_vm1, %v6628_v58 }
  0xbb   : > { %896 = vmatprep.mubr.f32.mxu1 %v9260_v37 }
  0xbc   : > { %5377 = vrot.lane.b32.xlu0 %v6752_v32, %s6249_s10 }
  0xbe   : > { %5382 = vrot.lane.b32.xlu1 %v6757_v33, %s6249_s10  ;;  %4271 = vmatmul.mubr.msk.f32.gmra.mrb[46].mxu1 %vm561_vm1, %v6641_v59 }
  0xbf   : > { %902 = vmatprep.mubr.f32.mxu1 %v9260_v37 }
  0xc0   : > { %5387 = vrot.lane.b32.xlu0 %v6772_v41, %s6249_s10 }
  0xc2   : > { %5392 = vrot.lane.b32.xlu1 %v6777_v42, %s6249_s10  ;;  %v6833_v7 = vpop.permute.xlu0 %5107  ;;  %4272 = vmatmul.mubr.msk.f32.gmra.mrb[48].mxu1 %vm561_vm1, %v6654_v60 }
  0xc3   : > { %v5110_v14 = vunpack.i.h.bf16 %v6833_v7  ;;  %v5109_v46 = vunpack.i.l.bf16 %v6833_v7  ;;  %908 = vmatprep.mubr.f32.mxu1 %v9260_v37 }
  0xc4   : > { %v5118_v10 = vpop.permute.xlu1 %5117  ;;  %5397 = vrot.lane.b32.xlu0 %v6752_v32, %s6250_s18 }
  0xc5   : > { %v5119_v47 = vunpack.i.l.bf16 %v5118_v10  ;;  %v5120_v49 = vunpack.i.h.bf16 %v5118_v10  ;;  %v1226_v54 = vsel %vm1224_vm2, %v5109_v46, %v5110_v14 }
  0xc6   : > { %5402 = vrot.lane.b32.xlu1 %v6757_v33, %s6250_s18  ;;  %v6844_v48 = vpop.permute.xlu0 %5112  ;;  %4273 = vmatmul.mubr.msk.f32.gmra.mrb[50].mxu1 %vm561_vm1, %v6669_v63 }
  0xc7   : > { %v5115_v50 = vunpack.i.h.bf16 %v6844_v48  ;;  %v5114_v51 = vunpack.i.l.bf16 %v6844_v48  ;;  %v1225_v53 = vsel %vm1224_vm2, %v5119_v47, %v5109_v46  ;;  %914 = vmatprep.mubr.f32.mxu1 %v9260_v37 }
  0xc8   : > { %v6848_v52 = vpop.permute.xlu1 %5122  ;;  %5407 = vrot.lane.b32.xlu0 %v6772_v41, %s6250_s18 }
  0xc9   : > { %v1231_v55 = vsel %vm1224_vm2, %v5120_v49, %v5114_v51  ;;  %v5125_v56 = vunpack.i.h.bf16 %v6848_v52  ;;  %v5124_v57 = vunpack.i.l.bf16 %v6848_v52  ;;  %v1232_v58 = vsel %vm1224_vm2, %v5114_v51, %v5115_v50 }
  0xca   : > { %5412 = vrot.lane.b32.xlu1 %v6777_v42, %s6250_s18  ;;  %v6867_v61 = vpop.permute.xlu0 %5127  ;;  %v4457_v62 = vpack.c.bf16 %v1232_v58, %v1226_v54  ;;  %v4459_v0 = vpack.c.bf16 %v1231_v55, %v1225_v53  ;;  %4274 = vmatmul.mubr.msk.f32.gmra.mrb[52].mxu1 %vm561_vm1, %v6686_v13 }
  0xcb   : > { %v5130_v1 = vunpack.i.h.bf16 %v6867_v61  ;;  %v5129_v3 = vunpack.i.l.bf16 %v6867_v61  ;;  %v1238_v15 = vsel %vm1224_vm2, %v5124_v57, %v5125_v56  ;;  %920 = vmatprep.mubr.f32.mxu1 %v9260_v37 }
  0xcc   : > { %v5133_v5 = vpop.permute.xlu1 %5132  ;;  %5417 = vrot.lane.b32.xlu0 %v6752_v32, %s6251_s9  ;;  %4458 = vmatprep.subr.bf16.mxu0 %v4457_v62 }
  0xcd   : > { %v5135_v6 = vunpack.i.h.bf16 %v5133_v5  ;;  %v5134_v9 = vunpack.i.l.bf16 %v5133_v5  ;;  %4460 = vmatpush1.bf16.msra.mxu0 %v4459_v0  ;;  %v1244_v16 = vsel %vm1224_vm2, %v5129_v3, %v5130_v1 }
  0xce   : > { %5422 = vrot.lane.b32.xlu1 %v6757_v33, %s6251_s9  ;;  %v6885_v20 = vpop.permute.xlu0 %5137  ;;  %v4461_v22 = vpack.c.bf16 %v1244_v16, %v1238_v15  ;;  %4275 = vmatmul.mubr.msk.f32.gmra.mrb[54].mxu1 %vm561_vm1, %v6700_v21 }
  0xcf   : > { %v1243_v59 = vsel %vm1224_vm2, %v5135_v6, %v5129_v3  ;;  %v1237_v19 = vsel %vm1224_vm2, %v5134_v9, %v5124_v57  ;;  %v5140_v23 = vunpack.i.h.bf16 %v6885_v20  ;;  %v5139_v24 = vunpack.i.l.bf16 %v6885_v20  ;;  %926 = vmatprep.mubr.f32.mxu1 %v9260_v37 }
  0xd0   : > { %v6890_v26 = vpop.permute.xlu1 %5142  ;;  %v4463_v27 = vpack.c.bf16 %v1243_v59, %v1237_v19  ;;  %5427 = vrot.lane.b32.xlu0 %v6772_v41, %s6251_s9  ;;  %4462 = vmatprep.subr.bf16.mxu0 %v4461_v22 }
  0xd1   : > { %v5145_v29 = vunpack.i.h.bf16 %v6890_v26  ;;  %v5144_v30 = vunpack.i.l.bf16 %v6890_v26  ;;  %v1331_v34 = vsel %vm1329_vm3, %v5139_v24, %v5140_v23 }
  0xd2   : > { %5432 = vrot.lane.b32.xlu1 %v6777_v42, %s6251_s9  ;;  %4464 = vmatpush1.bf16.msra.mxu0 %v4463_v27  ;;  %v5148_v35 = vpop.permute.xlu0 %5147 }
  0xd3   : > { %v1337_v60 = vsel %vm1329_vm3, %v5144_v30, %v5145_v29  ;;  %v5150_v36 = vunpack.i.h.bf16 %v5148_v35  ;;  %v5149_v38 = vunpack.i.l.bf16 %v5148_v35  ;;  %4276 = vmatmul.mubr.msk.f32.gmra.mrb[56].mxu1 %vm561_vm1, %v6714_v25 }
  0xd4   : > { %v6907_v43 = vpop.permute.xlu1 %5152  ;;  %v4465_v44 = vpack.c.bf16 %v1337_v60, %v1331_v34  ;;  %5437 = vrot.lane.b32.xlu0 %v6752_v32, %s6252_s12  ;;  %932 = vmatprep.mubr.f32.mxu1 %v9260_v37  ;;  %v1117_v60 = vld [vmem:[#allocation2 + $0x28] sm:$0xff] }
  0xd5   : > { %v1330_v45 = vsel %vm1329_vm3, %v5149_v38, %v5139_v24  ;;  %v1336_v2 = vsel %vm1329_vm3, %v5150_v36, %v5144_v30  ;;  %v5155_v10 = vunpack.i.h.bf16 %v6907_v43  ;;  %v5154_v46 = vunpack.i.l.bf16 %v6907_v43  ;;  %v1118_v36 = vld [vmem:[#allocation2 + $0x30] sm:$0xff] }
  0xd6   : > { %5442 = vrot.lane.b32.xlu1 %v6757_v33, %s6252_s12  ;;  %4466 = vmatprep.subr.bf16.mxu0 %v4465_v44  ;;  %v6920_v47 = vpop.permute.xlu0 %5157  ;;  %v4467_v63 = vpack.c.bf16 %v1336_v2, %v1330_v45  ;;  %v1124_v44 = vld [vmem:[#allocation2 + $0x60] sm:$0xff]  ;;  %v1125_v45 = vld [vmem:[#allocation2 + $0x68] sm:$0xff] }
  0xd7   : > { %v5160_v49 = vunpack.i.h.bf16 %v6920_v47  ;;  %v5159_v51 = vunpack.i.l.bf16 %v6920_v47  ;;  %v1343_v57 = vsel %vm1329_vm3, %v5154_v46, %v5155_v10  ;;  %4277 = vmatmul.mubr.msk.f32.gmra.mrb[58].mxu1 %vm561_vm1, %v6730_v28 }
  0xd8   : > { %v5163_v53 = vpop.permute.xlu1 %5162  ;;  %5447 = vrot.lane.b32.xlu0 %v6457_v4, %s6254_s21  ;;  %4468 = vmatpush1.bf16.msra.mxu0 %v4467_v63 }
  0xd9   : > { %v5165_v54 = vunpack.i.h.bf16 %v5163_v53  ;;  %v5164_v55 = vunpack.i.l.bf16 %v5163_v53  ;;  %v1349_v58 = vsel %vm1329_vm3, %v5159_v51, %v5160_v49  ;;  %938 = vmatprep.mubr.f32.mxu1 %v9260_v37 }
  0xda   : > { %5452 = vrot.lane.b32.xlu1 %v6477_v11, %s6254_s21  ;;  %v6939_v0 = vpop.permute.xlu0 %5167  ;;  %v4469_v4 = vpack.c.bf16 %v1349_v58, %v1343_v57  ;;  %v1131_v57 = vld [vmem:[#allocation2 + $0x98] sm:$0xff]  ;;  %v1132_v58 = vld [vmem:[#allocation2 + $0xa0] sm:$0xff] }
  0xdb   : > { %v1348_v13 = vsel %vm1329_vm3, %v5165_v54, %v5159_v51  ;;  %v1342_v62 = vsel %vm1329_vm3, %v5164_v55, %v5154_v46  ;;  %v5170_v11 = vunpack.i.h.bf16 %v6939_v0  ;;  %v5169_v3 = vunpack.i.l.bf16 %v6939_v0  ;;  %4278 = vmatmul.mubr.msk.f32.gmra.mrb[60].mxu1 %vm561_vm1, %v6744_v31 }
  0xdc   : > { %v6943_v5 = vpop.permute.xlu1 %5172  ;;  %v4471_v6 = vpack.c.bf16 %v1348_v13, %v1342_v62  ;;  %5457 = vrot.lane.b32.xlu0 %v6467_v8, %s6254_s21  ;;  %4470 = vmatprep.subr.bf16.mxu0 %v4469_v4  ;;  %v6985_v54 = vpack.i.bf16 %v1125_v45, %v1124_v44  ;;  %v1138_v4 = vld [vmem:[#allocation2 + $0xd0] sm:$0xff] }
  0xdd   : > { %v5175_v9 = vunpack.i.h.bf16 %v6943_v5  ;;  %v5174_v15 = vunpack.i.l.bf16 %v6943_v5  ;;  %v1436_v16 = vsel %vm1434_vm4, %v5169_v3, %v5170_v11  ;;  %944 = vmatprep.mubr.f32.mxu1 %v9260_v37 }
  0xde   : > { %5462 = vrot.lane.b32.xlu1 %v6772_v41, %s6252_s12  ;;  %4472 = vmatpush1.bf16.msra.mxu0 %v4471_v6  ;;  %v5178_v59 = vpop.permute.xlu0 %5177 }
  0xdf   : > { %v1442_v21 = vsel %vm1434_vm4, %v5174_v15, %v5175_v9  ;;  %v5180_v19 = vunpack.i.h.bf16 %v5178_v59  ;;  %v5179_v22 = vunpack.i.l.bf16 %v5178_v59  ;;  %4279 = vmatmul.mubr.msk.f32.gmra.mrb[62].mxu1 %vm561_vm1, %v6761_v39 }
  0xe0   : > { %v6960_v24 = vpop.permute.xlu1 %5182  ;;  %v4473_v8 = vpack.c.bf16 %v1442_v21, %v1436_v16  ;;  %5467 = vrot.lane.b32.xlu0 %v6777_v42, %s6252_s12  ;;  %2491 = vmatprep.mubr.f32.mxu1 %v6764_v40 }
  0xe1   : > { %v1435_v27 = vsel %vm1434_vm4, %v5179_v22, %v5169_v3  ;;  %v1441_v30 = vsel %vm1434_vm4, %v5180_v19, %v5174_v15  ;;  %v5185_v34 = vunpack.i.h.bf16 %v6960_v24  ;;  %v5184_v35 = vunpack.i.l.bf16 %v6960_v24  ;;  %v1139_v3 = vld [vmem:[#allocation2 + $0xd8] sm:$0xff] }
  0xe2   : > { %5472 = vrot.lane.b32.xlu1 %v6483_v12, %s6254_s21  ;;  %4474 = vmatprep.subr.bf16.mxu0 %v4473_v8  ;;  %v6973_v25 = vpop.permute.xlu0 %5187  ;;  %v4475_v38 = vpack.c.bf16 %v1441_v30, %v1435_v27  ;;  %v6981_v12 = vpack.i.bf16 %v1118_v36, %v1117_v60  ;;  %v7008_v22 = vpack.i.bf16 %v1132_v58, %v1131_v57 }
  0xe3   : > { %v9277_v2 = vunpack.i.h.bf16 %v6973_v25  ;;  %v5189_v46 = vunpack.i.l.bf16 %v6973_v25  ;;  %v1448_v55 = vsel %vm1434_vm4, %v5184_v35, %v5185_v34  ;;  %v7012_v8 = vpack.i.bf16 %v1139_v3, %v1138_v4 }
  0xe4   : > { %v5193_v63 = vpop.permute.xlu1 %5192  ;;  %5477 = vrot.lane.b32.xlu0 %v6497_v17, %s6254_s21  ;;  %4476 = vmatpush1.bf16.msra.mxu0 %v4475_v38 }
  0xe5   : > { %v5195_v51 = vunpack.i.h.bf16 %v5193_v63  ;;  %v5194_v53 = vunpack.i.l.bf16 %v5193_v63  ;;  %v1454_v28 = vsel %vm1434_vm4, %v5189_v46, %v9277_v2 }
  0xe6   : > { %5482 = vrot.lane.b32.xlu1 %v6503_v18, %s6254_s21  ;;  %v6996_v62 = vpop.permute.xlu0 %5197  ;;  %v4477_v18 = vpack.c.bf16 %v1454_v28, %v1448_v55 }
  0xe7   : > { %v1453_v17 = vsel %vm1434_vm4, %v5195_v51, %v5189_v46  ;;  %v1447_v13 = vsel %vm1434_vm4, %v5194_v53, %v5184_v35  ;;  %v9275_v6 = vunpack.i.h.bf16 %v6996_v62  ;;  %v5199_v15 = vunpack.i.l.bf16 %v6996_v62 }
  0xe8   : > { %v7000_v16 = vpop.permute.xlu1 %5202  ;;  %v4479_v59 = vpack.c.bf16 %v1453_v17, %v1447_v13  ;;  %5487 = vrot.lane.b32.xlu0 %v6981_v12, %s6245_s26  ;;  %4478 = vmatprep.subr.bf16.mxu0 %v4477_v18 }
  0xe9   : > { %v9274_v21 = vunpack.i.h.bf16 %v7000_v16  ;;  %v5204_v19 = vunpack.i.l.bf16 %v7000_v16  ;;  %v1541_v31 = vsel %vm1539_vm5, %v5199_v15, %v9275_v6 }
  0xea   : > { %5492 = vrot.lane.b32.xlu1 %v6985_v54, %s6245_s26  ;;  %4480 = vmatpush1.bf16.msra.mxu0 %v4479_v59  ;;  %v5208_v27 = vpop.permute.xlu0 %5207 }
  0xeb   : > { %v1547_v30 = vsel %vm1539_vm5, %v5204_v19, %v9274_v21  ;;  %v5210_v35 = vunpack.i.h.bf16 %v5208_v27  ;;  %v5209_v60 = vunpack.i.l.bf16 %v5208_v27 }
  0xec   : > { %v7021_v36 = vpop.permute.xlu1 %5212  ;;  %v4481_v38 = vpack.c.bf16 %v1547_v30, %v1541_v31  ;;  %5497 = vrot.lane.b32.xlu0 %v7008_v22, %s6245_s26 }
  0xed   : > { %v1540_v44 = vsel %vm1539_vm5, %v5209_v60, %v5199_v15  ;;  %v1546_v45 = vsel %vm1539_vm5, %v5210_v35, %v5204_v19  ;;  %v9273_v46 = vunpack.i.h.bf16 %v7021_v36  ;;  %v5214_v63 = vunpack.i.l.bf16 %v7021_v36 }
  0xee   : > { %5502 = vrot.lane.b32.xlu1 %v7012_v8, %s6245_s26  ;;  %4482 = vmatprep.subr.bf16.mxu0 %v4481_v38  ;;  %v7034_v51 = vpop.permute.xlu0 %5217  ;;  %v4483_v39 = vpack.c.bf16 %v1546_v45, %v1540_v44 }
  0xef   : > { %v9269_v53 = vunpack.i.h.bf16 %v7034_v51  ;;  %v5219_v55 = vunpack.i.l.bf16 %v7034_v51  ;;  %v1553_v58 = vsel %vm1539_vm5, %v5214_v63, %v9273_v46 }
  0xf0   : > { %v5223_v40 = vpop.permute.xlu1 %5222  ;;  %5507 = vrot.lane.b32.xlu0 %v6981_v12, %s6246_s29  ;;  %4484 = vmatpush1.bf16.msra.mxu0 %v4483_v39 }
  0xf1   : > { %v5225_v28 = vunpack.i.h.bf16 %v5223_v40  ;;  %v5224_v57 = vunpack.i.l.bf16 %v5223_v40  ;;  %v1559_v17 = vsel %vm1539_vm5, %v5219_v55, %v9269_v53 }
  0xf2   : > { %5512 = vrot.lane.b32.xlu1 %v6985_v54, %s6246_s29  ;;  %v7050_v4 = vpop.permute.xlu0 %5227  ;;  %v4485_v3 = vpack.c.bf16 %v1559_v17, %v1553_v58 }
  0xf3   : > { %v1558_v13 = vsel %vm1539_vm5, %v5225_v28, %v5219_v55  ;;  %v1552_v18 = vsel %vm1539_vm5, %v5224_v57, %v5214_v63  ;;  %v9267_v15 = vunpack.i.h.bf16 %v7050_v4  ;;  %v5229_v59 = vunpack.i.l.bf16 %v7050_v4 }
  0xf4   : > { %v7054_v19 = vpop.permute.xlu1 %5232  ;;  %v4487_v31 = vpack.c.bf16 %v1558_v13, %v1552_v18  ;;  %5517 = vrot.lane.b32.xlu0 %v7008_v22, %s6246_s29  ;;  %4486 = vmatprep.subr.bf16.mxu0 %v4485_v3 }
  0xf5   : > { %v9266_v27 = vunpack.i.h.bf16 %v7054_v19  ;;  %v5234_v30 = vunpack.i.l.bf16 %v7054_v19  ;;  %v1646_v35 = vsel %vm1644_vm6, %v5229_v59, %v9267_v15 }
  0xf6   : > { %5522 = vrot.lane.b32.xlu1 %v7012_v8, %s6246_s29  ;;  %4488 = vmatpush1.bf16.msra.mxu0 %v4487_v31  ;;  %v5238_v60 = vpop.permute.xlu0 %5237 }
  0xf7   : > { %v1652_v38 = vsel %vm1644_vm6, %v5234_v30, %v9266_v27  ;;  %v5240_v44 = vunpack.i.h.bf16 %v5238_v60  ;;  %v5239_v45 = vunpack.i.l.bf16 %v5238_v60 }
  0xf8   : > { %v7068_v63 = vpop.permute.xlu1 %5242  ;;  %v4489_v39 = vpack.c.bf16 %v1652_v38, %v1646_v35  ;;  %5527 = vrot.lane.b32.xlu0 %v6981_v12, %s6248_s7 }
  0xf9   : > { %v1645_v55 = vsel %vm1644_vm6, %v5239_v45, %v5229_v59  ;;  %v1651_v40 = vsel %vm1644_vm6, %v5240_v44, %v5234_v30  ;;  %v9265_v28 = vunpack.i.h.bf16 %v7068_v63  ;;  %v5244_v57 = vunpack.i.l.bf16 %v7068_v63 }
  0xfa   : > { %5532 = vrot.lane.b32.xlu1 %v6985_v54, %s6248_s7  ;;  %4490 = vmatprep.subr.bf16.mxu0 %v4489_v39  ;;  %v7078_v58 = vpop.permute.xlu0 %5247  ;;  %v4491_v17 = vpack.c.bf16 %v1651_v40, %v1645_v55 }
  0xfb   : > { %v9264_v13 = vunpack.i.h.bf16 %v7078_v58  ;;  %v5249_v18 = vunpack.i.l.bf16 %v7078_v58  ;;  %v1658_v30 = vsel %vm1644_vm6, %v5244_v57, %v9265_v28 }
  0xfc   : > { %v5253_v3 = vpop.permute.xlu1 %5252  ;;  %5537 = vrot.lane.b32.xlu0 %v7008_v22, %s6248_s7  ;;  %4492 = vmatpush1.bf16.msra.mxu0 %v4491_v17 }
  0xfd   : > { %v5255_v31 = vunpack.i.h.bf16 %v5253_v3  ;;  %v5254_v59 = vunpack.i.l.bf16 %v5253_v3  ;;  %v1664_v35 = vsel %vm1644_vm6, %v5249_v18, %v9264_v13 }
  0xfe   : > { %5542 = vrot.lane.b32.xlu1 %v7012_v8, %s6248_s7  ;;  %v7094_v44 = vpop.permute.xlu0 %5257  ;;  %v4493_v45 = vpack.c.bf16 %v1664_v35, %v1658_v30 }
  0xff   : > { %v1663_v60 = vsel %vm1644_vm6, %v5255_v31, %v5249_v18  ;;  %v1657_v38 = vsel %vm1644_vm6, %v5254_v59, %v5244_v57  ;;  %v9262_v39 = vunpack.i.h.bf16 %v7094_v44  ;;  %v5259_v55 = vunpack.i.l.bf16 %v7094_v44 }
 0x100   : > { %v7098_v40 = vpop.permute.xlu1 %5262  ;;  %v4495_v17 = vpack.c.bf16 %v1663_v60, %v1657_v38  ;;  %5547 = vrot.lane.b32.xlu0 %v6981_v12, %s6249_s10  ;;  %4494 = vmatprep.subr.bf16.mxu0 %v4493_v45 }
 0x101   : > { %v9263_v3 = vunpack.i.h.bf16 %v7098_v40  ;;  %v5264_v37 = vunpack.i.l.bf16 %v7098_v40  ;;  %v1751_v57 = vsel %vm1749_vm7, %v5259_v55, %v9262_v39 }
 0x102   : > { %5552 = vrot.lane.b32.xlu1 %v6985_v54, %s6249_s10  ;;  %4496 = vmatpush1.bf16.msra.mxu0 %v4495_v17  ;;  %v5268_v18 = vpop.permute.xlu0 %5267 }
 0x103   : > { %v1757_v31 = vsel %vm1749_vm7, %v5264_v37, %v9263_v3  ;;  %v5270_v59 = vunpack.i.h.bf16 %v5268_v18  ;;  %v5269_v30 = vunpack.i.l.bf16 %v5268_v18 }
 0x104   : > { %v7112_v35 = vpop.permute.xlu1 %5272  ;;  %v4497_v60 = vpack.c.bf16 %v1757_v31, %v1751_v57  ;;  %5557 = vrot.lane.b32.xlu0 %v7008_v22, %s6249_s10 }
 0x105   : > { %v1750_v38 = vsel %vm1749_vm7, %v5269_v30, %v5259_v55  ;;  %v1756_v45 = vsel %vm1749_vm7, %v5270_v59, %v5264_v37  ;;  %v9268_v17 = vunpack.i.h.bf16 %v7112_v35  ;;  %v5274_v39 = vunpack.i.l.bf16 %v7112_v35 }
 0x106   : > { %5562 = vrot.lane.b32.xlu1 %v7012_v8, %s6249_s10  ;;  %4498 = vmatprep.subr.bf16.mxu0 %v4497_v60  ;;  %v7122_v3 = vpop.permute.xlu0 %5277  ;;  %v4499_v18 = vpack.c.bf16 %v1756_v45, %v1750_v38 }
 0x107   : > { %v9272_v57 = vunpack.i.h.bf16 %v7122_v3  ;;  %v5279_v31 = vunpack.i.l.bf16 %v7122_v3  ;;  %v1763_v37 = vsel %vm1749_vm7, %v5274_v39, %v9268_v17 }
 0x108   : > { %v5283_v13 = vpop.permute.xlu1 %5282  ;;  %5567 = vrot.lane.b32.xlu0 %v6981_v12, %s6250_s18  ;;  %4500 = vmatpush1.bf16.msra.mxu0 %v4499_v18 }
 0x109   : > { %v5285_v28 = vunpack.i.h.bf16 %v5283_v13  ;;  %v5284_v55 = vunpack.i.l.bf16 %v5283_v13  ;;  %v1769_v59 = vsel %vm1749_vm7, %v5279_v31, %v9272_v57 }
 0x10a   : > { %5572 = vrot.lane.b32.xlu1 %v6985_v54, %s6250_s18  ;;  %v7138_v13 = vpop.permute.xlu0 %5287  ;;  %v4501_v38 = vpack.c.bf16 %v1769_v59, %v1763_v37 }
 0x10b   : > { %v1768_v30 = vsel %vm1749_vm7, %v5285_v28, %v5279_v31  ;;  %v1762_v60 = vsel %vm1749_vm7, %v5284_v55, %v5274_v39  ;;  %v9270_v45 = vunpack.i.h.bf16 %v7138_v13  ;;  %v5289_v18 = vunpack.i.l.bf16 %v7138_v13 }
 0x10c   : > { %v7142_v27 = vpop.permute.xlu1 %5292  ;;  %v4503_v15 = vpack.c.bf16 %v1768_v30, %v1762_v60  ;;  %5577 = vrot.lane.b32.xlu0 %v7008_v22, %s6250_s18  ;;  %4502 = vmatprep.subr.bf16.mxu0 %v4501_v38 }
 0x10d   : > { %v9271_v17 = vunpack.i.h.bf16 %v7142_v27  ;;  %v5294_v53 = vunpack.i.l.bf16 %v7142_v27  ;;  %v1856_v28 = vsel %vm1854_vm8, %v5289_v18, %v9270_v45 }
 0x10e   : > { %5582 = vrot.lane.b32.xlu1 %v7012_v8, %s6250_s18  ;;  %4504 = vmatpush1.bf16.msra.mxu0 %v4503_v15  ;;  %v5298_v39 = vpop.permute.xlu0 %5297 }
 0x10f   : > { %v1862_v31 = vsel %vm1854_vm8, %v5294_v53, %v9271_v17  ;;  %v5300_v55 = vunpack.i.h.bf16 %v5298_v39  ;;  %v5299_v37 = vunpack.i.l.bf16 %v5298_v39 }
 0x110   : > { %v7156_v59 = vpop.permute.xlu1 %5302  ;;  %v4505_v30 = vpack.c.bf16 %v1862_v31, %v1856_v28  ;;  %5587 = vrot.lane.b32.xlu0 %v6981_v12, %s6251_s9 }
 0x111   : > { %v1855_v60 = vsel %vm1854_vm8, %v5299_v37, %v5289_v18  ;;  %v1861_v15 = vsel %vm1854_vm8, %v5300_v55, %v5294_v53  ;;  %v9276_v38 = vunpack.i.h.bf16 %v7156_v59  ;;  %v5304_v45 = vunpack.i.l.bf16 %v7156_v59 }
 0x112   : > { %5592 = vrot.lane.b32.xlu1 %v6985_v54, %s6251_s9  ;;  %4506 = vmatprep.subr.bf16.mxu0 %v4505_v30  ;;  %v7166_v17 = vpop.permute.xlu0 %5307  ;;  %v4507_v39 = vpack.c.bf16 %v1861_v15, %v1855_v60 }
 0x113   : > { %v9297_v28 = vunpack.i.h.bf16 %v7166_v17  ;;  %v5309_v31 = vunpack.i.l.bf16 %v7166_v17  ;;  %v1868_v53 = vsel %vm1854_vm8, %v5304_v45, %v9276_v38 }
 0x114   : > { %v5313_v57 = vpop.permute.xlu1 %5312  ;;  %5597 = vrot.lane.b32.xlu0 %v7008_v22, %s6251_s9  ;;  %4508 = vmatpush1.bf16.msra.mxu0 %v4507_v39 }
 0x115   : > { %v5315_v46 = vunpack.i.h.bf16 %v5313_v57  ;;  %v5314_v18 = vunpack.i.l.bf16 %v5313_v57  ;;  %v1874_v55 = vsel %vm1854_vm8, %v5309_v31, %v9297_v28 }
 0x116   : > { %5602 = vrot.lane.b32.xlu1 %v7012_v8, %s6251_s9  ;;  %v7182_v30 = vpop.permute.xlu0 %5317  ;;  %v4509_v60 = vpack.c.bf16 %v1874_v55, %v1868_v53 }
 0x117   : > { %v1873_v37 = vsel %vm1854_vm8, %v5315_v46, %v5309_v31  ;;  %v1867_v57 = vsel %vm1854_vm8, %v5314_v18, %v5304_v45  ;;  %v9294_v15 = vunpack.i.h.bf16 %v7182_v30  ;;  %v5319_v39 = vunpack.i.l.bf16 %v7182_v30  ;;  %v7201_v31 = vld [vmem:[%s6432_s24] sm:$0xff] }
 0x118   : > { %v7186_v21 = vpop.permute.xlu1 %5322  ;;  %v4511_v6 = vpack.c.bf16 %v1873_v37, %v1867_v57  ;;  %5607 = vrot.lane.b32.xlu0 %v6752_v32, %s6254_s21  ;;  %4510 = vmatprep.subr.bf16.mxu0 %v4509_v60  ;;  %v7216_v37 = vld [vmem:[%s6432_s24 + $0x20] sm:$0xff]  ;;  %v7232_v60 = vld [vmem:[%s6432_s24 + $0x18] sm:$0xff] }
 0x119   : > { %v9293_v38 = vunpack.i.h.bf16 %v7186_v21  ;;  %v5324_v2 = vunpack.i.l.bf16 %v7186_v21  ;;  %v1227_v46 = vsel %vm1224_vm2, %v5110_v14, %v5319_v39  ;;  %v1228_v45 = vsel %vm1224_vm2, %v5319_v39, %v9294_v15 }
 0x11a   : > { %5612 = vrot.lane.b32.xlu1 %v6757_v33, %s6254_s21  ;;  %4512 = vmatpush1.bf16.msra.mxu0 %v4511_v6  ;;  %v7206_v32 = vpop.permute.xlu0 %5327 }
 0x11b   : > { %v1233_v18 = vsel %vm1224_vm2, %v5115_v50, %v5324_v2  ;;  %v1234_v7 = vsel %vm1224_vm2, %v5324_v2, %v9293_v38  ;;  %v9290_v33 = vunpack.i.h.bf16 %v7206_v32  ;;  %v5329_v14 = vunpack.i.l.bf16 %v7206_v32 }
 0x11c   : > { %v7213_v6 = vpop.permute.xlu1 %5332  ;;  %v4529_v53 = vpack.c.bf16 %v1234_v7, %v1228_v45  ;;  %v4531_v55 = vpack.c.bf16 %v1233_v18, %v1227_v46  ;;  %5617 = vrot.lane.b32.xlu0 %v6981_v12, %s6252_s12 }
 0x11d   : > { %v9289_v48 = vunpack.i.h.bf16 %v7213_v6  ;;  %v5334_v50 = vunpack.i.l.bf16 %v7213_v6  ;;  %2170 = vmatmul.mubr.f32.vlgmr.msra.gmra.mrb[32].mxu0 %v7201_v31  ;;  %v1239_v2 = vsel %vm1224_vm2, %v5125_v56, %v5329_v14  ;;  %v1240_v57 = vsel %vm1224_vm2, %v5329_v14, %v9290_v33  ;;  %v7248_v14 = vld [vmem:[%s6432_s24 + $0x38] sm:$0xff] }
 0x11e   : > { %5622 = vrot.lane.b32.xlu1 %v6985_v54, %s6252_s12  ;;  %4530 = vmatprep.subr.bf16.mxu1 %v4529_v53  ;;  %v7237_v46 = vpop.permute.xlu0 %5337 }
 0x11f   : > { %v1245_v39 = vsel %vm1224_vm2, %v5130_v1, %v5334_v50  ;;  %4532 = vmatpush1.bf16.msra.mxu1 %v4531_v55  ;;  %v1246_v52 = vsel %vm1224_vm2, %v5334_v50, %v9289_v48  ;;  %2175 = vmatprep.mubr.f32.mxu0 %v7216_v37  ;;  %v9286_v56 = vunpack.i.h.bf16 %v7237_v46  ;;  %v5339_v45 = vunpack.i.l.bf16 %v7237_v46 }
 0x120   : > { %v7245_v18 = vpop.permute.xlu1 %5342  ;;  %v4533_v7 = vpack.c.bf16 %v1246_v52, %v1240_v57  ;;  %v4535_v61 = vpack.c.bf16 %v1245_v39, %v1239_v2  ;;  %5627 = vrot.lane.b32.xlu0 %v6772_v41, %s6254_s21  ;;  %v7264_v2 = vld [vmem:[%s6432_s24 + $0x30] sm:$0xff] }
 0x121   : > { %v9285_v1 = vunpack.i.h.bf16 %v7245_v18  ;;  %v5344_v53 = vunpack.i.l.bf16 %v7245_v18  ;;  %2176 = vmatmul.mubr.f32.gmra.mrb[34].mxu0 %v7232_v60  ;;  %v1332_v55 = vsel %vm1329_vm3, %v5140_v23, %v5339_v45  ;;  %v1333_v50 = vsel %vm1329_vm3, %v5339_v45, %v9286_v56  ;;  %v7280_v45 = vld [vmem:[%s6432_s24 + $0x50] sm:$0xff] }
 0x122   : > { %5632 = vrot.lane.b32.xlu1 %v6777_v42, %s6254_s21  ;;  %4534 = vmatprep.subr.bf16.mxu1 %v4533_v7  ;;  %v7269_v57 = vpop.permute.xlu0 %5347 }
 0x123   : > { %v1338_v41 = vsel %vm1329_vm3, %v5145_v29, %v5344_v53  ;;  %4536 = vmatpush1.bf16.msra.mxu1 %v4535_v61  ;;  %v1339_v20 = vsel %vm1329_vm3, %v5344_v53, %v9285_v1  ;;  %2181 = vmatprep.mubr.f32.mxu0 %v7248_v14  ;;  %v9278_v42 = vunpack.i.h.bf16 %v7269_v57  ;;  %v5349_v23 = vunpack.i.l.bf16 %v7269_v57 }
 0x124   : > { %v7277_v39 = vpop.permute.xlu1 %5352  ;;  %v4537_v52 = vpack.c.bf16 %v1339_v20, %v1333_v50  ;;  %v4539_v26 = vpack.c.bf16 %v1338_v41, %v1332_v55  ;;  %5637 = vrot.lane.b32.xlu0 %v7008_v22, %s6252_s12  ;;  %v7296_v55 = vld [vmem:[%s6432_s24 + $0x48] sm:$0xff] }
 0x125   : > { %v9283_v29 = vunpack.i.h.bf16 %v7277_v39  ;;  %v5354_v7 = vunpack.i.l.bf16 %v7277_v39  ;;  %2182 = vmatmul.mubr.f32.gmra.mrb[36].mxu0 %v7264_v2  ;;  %v1344_v61 = vsel %vm1329_vm3, %v5155_v10, %v5349_v23  ;;  %v1345_v53 = vsel %vm1329_vm3, %v5349_v23, %v9278_v42 }
 0x126   : > { %5642 = vrot.lane.b32.xlu1 %v7012_v8, %s6252_s12  ;;  %4538 = vmatprep.subr.bf16.mxu1 %v4537_v52  ;;  %v7301_v41 = vpop.permute.xlu0 %5357 }
 0x127   : > { %v1350_v50 = vsel %vm1329_vm3, %v5160_v49, %v5354_v7  ;;  %4540 = vmatpush1.bf16.msra.mxu1 %v4539_v26  ;;  %v1351_v43 = vsel %vm1329_vm3, %v5354_v7, %v9283_v29  ;;  %2187 = vmatprep.mubr.f32.mxu0 %v7280_v45  ;;  %v9281_v10 = vunpack.i.h.bf16 %v7301_v41  ;;  %v5359_v20 = vunpack.i.l.bf16 %v7301_v41  ;;  %v7312_v49 = vld [vmem:[%s6432_s24 + $0x68] sm:$0xff] }
 0x128   : > { %v7309_v23 = vpop.permute.xlu1 %5362  ;;  %v4541_v52 = vpack.c.bf16 %v1351_v43, %v1345_v53  ;;  %v4543_v47 = vpack.c.bf16 %v1350_v50, %v1344_v61  ;;  %5647 = vrot.lane.b32.xlu0 %v6981_v12, %s6254_s21  ;;  %v7328_v53 = vld [vmem:[%s6432_s24 + $0x60] sm:$0xff] }
 0x129   : > { %v9279_v26 = vunpack.i.h.bf16 %v7309_v23  ;;  %v5364_v42 = vunpack.i.l.bf16 %v7309_v23  ;;  %2188 = vmatmul.mubr.f32.gmra.mrb[38].mxu0 %v7296_v55  ;;  %v1437_v7 = vsel %vm1434_vm4, %v5170_v11, %v5359_v20  ;;  %v1438_v61 = vsel %vm1434_vm4, %v5359_v20, %v9281_v10  ;;  %v7340_v11 = vld [vmem:[%s6432_s24 + $0x80] sm:$0xff] }
 0x12a   : > { %5652 = vrot.lane.b32.xlu1 %v6985_v54, %s6254_s21  ;;  %4542 = vmatprep.subr.bf16.mxu1 %v4541_v52  ;;  %v7333_v50 = vpop.permute.xlu0 %5367 }
 0x12b   : > { %v1443_v12 = vsel %vm1434_vm4, %v5175_v9, %v5364_v42  ;;  %4544 = vmatpush1.bf16.msra.mxu1 %v4543_v47  ;;  %v1444_v0 = vsel %vm1434_vm4, %v5364_v42, %v9279_v26  ;;  %2193 = vmatprep.mubr.f32.mxu0 %v7312_v49  ;;  %v9280_v54 = vunpack.i.h.bf16 %v7333_v50  ;;  %v5369_v43 = vunpack.i.l.bf16 %v7333_v50 }
 0x12c   : > { %v7344_v5 = vpop.permute.xlu1 %5372  ;;  %v4545_v9 = vpack.c.bf16 %v1444_v0, %v1438_v61  ;;  %v4547_v20 = vpack.c.bf16 %v1443_v12, %v1437_v7  ;;  %5657 = vrot.lane.b32.xlu0 %v7008_v22, %s6254_s21  ;;  %v7359_v7 = vld [vmem:[%s6432_s24 + $0x78] sm:$0xff]  ;;  %v465_v12 = vld [vmem:[%s6437_s20] sm:$0xff]  ;;  %v9366_v0 = vunpack.i.h.bf16 %v6973_v25 }
 0x12d   : > { %v9282_v52 = vunpack.i.h.bf16 %v7344_v5  ;;  %v5374_v47 = vunpack.i.l.bf16 %v7344_v5  ;;  %2194 = vmatmul.mubr.f32.gmra.mrb[40].mxu0 %v7328_v53  ;;  %v1449_v42 = vsel %vm1434_vm4, %v5185_v34, %v5369_v43  ;;  %v1450_v61 = vsel %vm1434_vm4, %v5369_v43, %v9280_v54  ;;  %v7371_v34 = vld [vmem:[%s6432_s24 + $0x98] sm:$0xff]  ;;  %v466_v54 = vld [vmem:[%s6437_s20 + $0x8] sm:$0xff] }
 0x12e   : > { %4546 = vmatprep.subr.bf16.mxu1 %v4545_v9  ;;  %2199 = vmatprep.mubr.f32.mxu0 %v7340_v11  ;;  %v7365_v22 = vpop.permute.xlu0 %5377 }
 0x12f   : > { %v1455_v26 = vsel %vm1434_vm4, %v9366_v0, %v5374_v47  ;;  %4548 = vmatpush1.bf16.msra.mxu1 %v4547_v20  ;;  %v1456_v24 = vsel %vm1434_vm4, %v5374_v47, %v9282_v52  ;;  %5662 = vrot.lane.b32.xlu1 %v7012_v8, %s6254_s21  ;;  %v9284_v43 = vunpack.i.h.bf16 %v7365_v22  ;;  %v5379_v25 = vunpack.i.l.bf16 %v7365_v22 }
 0x130   : > { %v7377_v9 = vpop.permute.xlu1 %5382  ;;  %v4549_v20 = vpack.c.bf16 %v1456_v24, %v1450_v61  ;;  %v4551_v0 = vpack.c.bf16 %v1455_v26, %v1449_v42  ;;  %483 = vperm.xlu0 %5666, %v465_v12   ;;  %v9367_v8 = vunpack.i.h.bf16 %v6996_v62  ;;  %v7391_v26 = vld [vmem:[%s6432_s24 + $0x90] sm:$0xff]  ;;  %v468_v42 = vld [vmem:[%s6437_s20 + $0x18] sm:$0xff]  ;;  %v9368_v24 = vunpack.i.h.bf16 %v7000_v16 }
 0x131   : > { %v9287_v10 = vunpack.i.h.bf16 %v7377_v9  ;;  %v5384_v47 = vunpack.i.l.bf16 %v7377_v9  ;;  %2200 = vmatmul.mubr.f32.gmra.mrb[42].mxu0 %v7359_v7  ;;  %v1543_v61 = vsel %vm1539_vm5, %v5379_v25, %v9284_v43 }
 0x132   : > { %v1542_v52 = vsel %vm1539_vm5, %v9367_v8, %v5379_v25  ;;  %4550 = vmatprep.subr.bf16.mxu1 %v4549_v20  ;;  %2205 = vmatprep.mubr.f32.mxu0 %v7371_v34  ;;  %v7397_v12 = vpop.permute.xlu0 %5387  ;;  %v7403_v20 = vld [vmem:[%s6432_s24 + $0xb0] sm:$0xff] }
 0x133   : > { %v1548_v29 = vsel %vm1539_vm5, %v9368_v24, %v5384_v47  ;;  %4552 = vmatpush1.bf16.msra.mxu1 %v4551_v0  ;;  %v1549_v62 = vsel %vm1539_vm5, %v5384_v47, %v9287_v10  ;;  %488 = vperm.xlu1 %5667, %v466_v54   ;;  %v9288_v8 = vunpack.i.h.bf16 %v7397_v12  ;;  %v5389_v43 = vunpack.i.l.bf16 %v7397_v12  ;;  %v467_v0 = vld [vmem:[%s6437_s20 + $0x10] sm:$0xff]  ;;  %v7421_v47 = vld [vmem:[%s6432_s24 + $0xa8] sm:$0xff] }
 0x134   : > { %v4555_v25 = vpack.c.bf16 %v1548_v29, %v1542_v52  ;;  %v7407_v16 = vpop.permute.xlu1 %5392  ;;  %v4553_v24 = vpack.c.bf16 %v1549_v62, %v1543_v61  ;;  %498 = vperm.xlu0 %5666, %v468_v42   ;;  %v9369_v54 = vunpack.i.h.bf16 %v7021_v36  ;;  %v470_v61 = vld [vmem:[%s6437_s20 + $0x28] sm:$0xff]  ;;  %v9370_v62 = vunpack.i.h.bf16 %v7034_v51 }
 0x135   : > { %v9291_v1 = vunpack.i.h.bf16 %v7407_v16  ;;  %v5394_v56 = vunpack.i.l.bf16 %v7407_v16  ;;  %2206 = vmatmul.mubr.f32.gmra.mrb[44].mxu0 %v7391_v26  ;;  %v1555_v52 = vsel %vm1539_vm5, %v5389_v43, %v9288_v8 }
 0x136   : > { %v1554_v29 = vsel %vm1539_vm5, %v9369_v54, %v5389_v43  ;;  %4554 = vmatprep.subr.bf16.mxu1 %v4553_v24  ;;  %2211 = vmatprep.mubr.f32.mxu0 %v7403_v20  ;;  %v7427_v42 = vpop.permute.xlu0 %5397  ;;  %v7433_v24 = vld [vmem:[%s6432_s24 + $0xc8] sm:$0xff] }
 0x137   : > { %v1560_v10 = vsel %vm1539_vm5, %v9370_v62, %v5394_v56  ;;  %4556 = vmatpush1.bf16.msra.mxu1 %v4555_v25  ;;  %v1561_v36 = vsel %vm1539_vm5, %v5394_v56, %v9291_v1  ;;  %493 = vperm.xlu1 %5667, %v467_v0   ;;  %v9292_v54 = vunpack.i.h.bf16 %v7427_v42  ;;  %v5399_v8 = vunpack.i.l.bf16 %v7427_v42  ;;  %v469_v25 = vld [vmem:[%s6437_s20 + $0x20] sm:$0xff] }
 0x138   : > { %v4559_v43 = vpack.c.bf16 %v1560_v10, %v1554_v29  ;;  %v7437_v51 = vpop.permute.xlu1 %5402  ;;  %v4557_v62 = vpack.c.bf16 %v1561_v36, %v1555_v52  ;;  %508 = vperm.xlu0 %5666, %v470_v61   ;;  %v9371_v56 = vunpack.i.h.bf16 %v7050_v4  ;;  %v7451_v29 = vld [vmem:[%s6432_s24 + $0xc0] sm:$0xff]  ;;  %v472_v52 = vld [vmem:[%s6437_s20 + $0x38] sm:$0xff]  ;;  %v9372_v36 = vunpack.i.h.bf16 %v7054_v19 }
 0x139   : > { %v9295_v48 = vunpack.i.h.bf16 %v7437_v51  ;;  %v5404_v33 = vunpack.i.l.bf16 %v7437_v51  ;;  %2212 = vmatmul.mubr.f32.gmra.mrb[46].mxu0 %v7421_v47  ;;  %v1648_v0 = vsel %vm1644_vm6, %v5399_v8, %v9292_v54 }
 0x13a   : > { %v1647_v10 = vsel %vm1644_vm6, %v9371_v56, %v5399_v8  ;;  %4558 = vmatprep.subr.bf16.mxu1 %v4557_v62  ;;  %2217 = vmatprep.mubr.f32.mxu0 %v7433_v24  ;;  %v7457_v61 = vpop.permute.xlu0 %5407  ;;  %v7463_v62 = vld [vmem:[%s6432_s24 + $0xe0] sm:$0xff] }
 0x13b   : > { %v1653_v1 = vsel %vm1644_vm6, %v9372_v36, %v5404_v33  ;;  %4560 = vmatpush1.bf16.msra.mxu1 %v4559_v43  ;;  %v1654_v4 = vsel %vm1644_vm6, %v5404_v33, %v9295_v48  ;;  %503 = vperm.xlu1 %5667, %v469_v25   ;;  %v9296_v56 = vunpack.i.h.bf16 %v7457_v61  ;;  %v5409_v54 = vunpack.i.l.bf16 %v7457_v61  ;;  %v471_v43 = vld [vmem:[%s6437_s20 + $0x30] sm:$0xff] }
 0x13c   : > { %v4563_v8 = vpack.c.bf16 %v1653_v1, %v1647_v10  ;;  %v7467_v19 = vpop.permute.xlu1 %5412  ;;  %v4561_v36 = vpack.c.bf16 %v1654_v4, %v1648_v0  ;;  %518 = vperm.xlu0 %5666, %v472_v52   ;;  %v9374_v33 = vunpack.i.h.bf16 %v7068_v63  ;;  %v7481_v10 = vld [vmem:[%s6432_s24 + $0xd8] sm:$0xff]  ;;  %v474_v0 = vld [vmem:[%s6437_s20 + $0x48] sm:$0xff]  ;;  %v9375_v4 = vunpack.i.h.bf16 %v7078_v58 }
 0x13d   : > { %9373 = vst [vmem:[#allocation23_spill] sm:$0xff] %v7467_v19  ;;  %v9299_v38 = vunpack.i.h.bf16 %v7467_v19  ;;  %v5414_v15 = vunpack.i.l.bf16 %v7467_v19  ;;  %2218 = vmatmul.mubr.f32.gmra.mrb[48].mxu0 %v7451_v29  ;;  %v1660_v25 = vsel %vm1644_vm6, %v5409_v54, %v9296_v56 }
 0x13e   : > { %v1659_v1 = vsel %vm1644_vm6, %v9374_v33, %v5409_v54  ;;  %4562 = vmatprep.subr.bf16.mxu1 %v4561_v36  ;;  %2223 = vmatprep.mubr.f32.mxu0 %v7463_v62  ;;  %v7487_v52 = vpop.permute.xlu0 %5417  ;;  %v7493_v36 = vld [vmem:[%s6432_s24 + $0xf8] sm:$0xff] }
 0x13f   : > { %v1665_v48 = vsel %vm1644_vm6, %v9375_v4, %v5414_v15  ;;  %4564 = vmatpush1.bf16.msra.mxu1 %v4563_v8  ;;  %9376 = vst [vmem:[#allocation24_spill] sm:$0xff] %v7487_v52  ;;  %v1666_v63 = vsel %vm1644_vm6, %v5414_v15, %v9299_v38  ;;  %513 = vperm.xlu1 %5667, %v471_v43   ;;  %v9300_v33 = vunpack.i.h.bf16 %v7487_v52  ;;  %v5419_v56 = vunpack.i.l.bf16 %v7487_v52  ;;  %v473_v8 = vld [vmem:[%s6437_s20 + $0x40] sm:$0xff]  ;;  %v475_v52 = vld [vmem:[%s6437_s20 + $0x50] sm:$0xff] }
 0x140   : > { %v4567_v54 = vpack.c.bf16 %v1665_v48, %v1659_v1  ;;  %v7497_v58 = vpop.permute.xlu1 %5422  ;;  %v4565_v4 = vpack.c.bf16 %v1666_v63, %v1660_v25  ;;  %528 = vperm.xlu0 %5666, %v474_v0   ;;  %v9378_v15 = vunpack.i.h.bf16 %v7094_v44  ;;  %v7511_v1 = vld [vmem:[%s6432_s24 + $0xf0] sm:$0xff]  ;;  %v476_v25 = vld [vmem:[%s6437_s20 + $0x58] sm:$0xff]  ;;  %v9379_v63 = vunpack.i.h.bf16 %v7098_v40 }
 0x141   : > { %9377 = vst [vmem:[#allocation25_spill] sm:$0xff] %v7497_v58  ;;  %v9303_v28 = vunpack.i.h.bf16 %v7497_v58  ;;  %v5424_v19 = vunpack.i.l.bf16 %v7497_v58  ;;  %2224 = vmatmul.mubr.f32.gmra.mrb[50].mxu0 %v7481_v10  ;;  %v1753_v43 = vsel %vm1749_vm7, %v5419_v56, %v9300_v33 }
 0x142   : > { %v1752_v48 = vsel %vm1749_vm7, %v9378_v15, %v5419_v56  ;;  %4566 = vmatprep.subr.bf16.mxu1 %v4565_v4  ;;  %2229 = vmatprep.mubr.f32.mxu0 %v7493_v36  ;;  %v7517_v0 = vpop.permute.xlu0 %5427  ;;  %v7523_v4 = vld [vmem:[%s6432_s24 + $0x110] sm:$0xff]  ;;  %v7525_v56 = vpop.f32.mrb[0].mxu1 }
 0x143   : > { %v1758_v38 = vsel %vm1749_vm7, %v9379_v63, %v5424_v19  ;;  %4568 = vmatpush1.bf16.msra.mxu1 %v4567_v54  ;;  %9380 = vst [vmem:[#allocation26_spill] sm:$0xff] %v7517_v0  ;;  %v1759_v44 = vsel %vm1749_vm7, %v5424_v19, %v9303_v28  ;;  %9381 = vst [vmem:[#allocation27_spill] sm:$0xff] %v7523_v4  ;;  %523 = vperm.xlu1 %5667, %v473_v8   ;;  %v9304_v33 = vunpack.i.h.bf16 %v7517_v0  ;;  %v7532_v58 = vpop.f32.mrb[1].mxu1  ;;  %v478_v28 = vld [vmem:[%s6437_s20 + $0x68] sm:$0xff] }
 0x144   : > { %9382 = vst [vmem:[#allocation28_spill] sm:$0xff] %v7525_v56  ;;  %v4571_v15 = vpack.c.bf16 %v1758_v38, %v1752_v48  ;;  %v5429_v40 = vunpack.i.l.bf16 %v7517_v0  ;;  %v7529_v63 = vpop.permute.xlu1 %5432  ;;  %v4569_v54 = vpack.c.bf16 %v1759_v44, %v1753_v43  ;;  %9384 = vst [vmem:[#allocation30_spill] sm:$0xff] %v7532_v58  ;;  %538 = vperm.xlu0 %5666, %v476_v25   ;;  %v9385_v38 = vunpack.i.h.bf16 %v7112_v35  ;;  %v7545_v44 = vld [vmem:[%s6432_s24 + $0x108] sm:$0xff]  ;;  %v477_v0 = vld [vmem:[%s6437_s20 + $0x60] sm:$0xff] }
 0x145   : > { %9383 = vst [vmem:[#allocation29_spill] sm:$0xff] %v7529_v63  ;;  %v5434_v8 = vunpack.i.l.bf16 %v7529_v63  ;;  %2230 = vmatmul.mubr.f32.gmra.mrb[52].mxu0 %v7511_v1  ;;  %v9386_v19 = vunpack.i.h.bf16 %v7122_v3  ;;  %v9388_v35 = vunpack.i.h.bf16 %v7529_v63 }
 0x146   : > { %v1764_v48 = vsel %vm1749_vm7, %v9385_v38, %v5429_v40  ;;  %4570 = vmatprep.subr.bf16.mxu1 %v4569_v54  ;;  %v1765_v43 = vsel %vm1749_vm7, %v5429_v40, %v9304_v33  ;;  %2235 = vmatprep.mubr.f32.mxu0 %v7523_v4  ;;  %v7551_v25 = vpop.permute.xlu0 %5437  ;;  %v7557_v38 = vld [vmem:[%s6432_s24 + $0x128] sm:$0xff]  ;;  %v7559_v40 = vpop.f32.mrb[2].mxu1 }
 0x147   : > { %v1770_v58 = vsel %vm1749_vm7, %v9386_v19, %v5434_v8  ;;  %4572 = vmatpush1.bf16.msra.mxu1 %v4571_v15  ;;  %9387 = vst [vmem:[#allocation31_spill] sm:$0xff] %v7551_v25  ;;  %v1771_v54 = vsel %vm1749_vm7, %v5434_v8, %v9388_v35  ;;  %533 = vperm.xlu1 %5667, %v475_v52   ;;  %9389 = vst [vmem:[#allocation32_spill] sm:$0xff] %v7559_v40  ;;  %v9307_v56 = vunpack.i.h.bf16 %v7551_v25  ;;  %v7566_v4 = vpop.f32.mrb[3].mxu1  ;;  %v7579_v35 = vld [vmem:[%s6432_s24 + $0x120] sm:$0xff] }
 0x148   : > { %v4575_v33 = vpack.c.bf16 %v1770_v58, %v1764_v48  ;;  %v5439_v3 = vunpack.i.l.bf16 %v7551_v25  ;;  %v7563_v19 = vpop.permute.xlu1 %5442  ;;  %v4573_v15 = vpack.c.bf16 %v1771_v54, %v1765_v43  ;;  %9391 = vst [vmem:[#allocation34_spill] sm:$0xff] %v7566_v4  ;;  %548 = vperm.xlu0 %5666, %v478_v28   ;;  %v9392_v58 = vunpack.i.h.bf16 %v7138_v13  ;;  %v480_v54 = vld [vmem:[%s6437_s20 + $0x78] sm:$0xff]  ;;  %v479_v25 = vld [vmem:[%s6437_s20 + $0x70] sm:$0xff] }
 0x149   : > { %9390 = vst [vmem:[#allocation33_spill] sm:$0xff] %v7563_v19  ;;  %v5444_v52 = vunpack.i.l.bf16 %v7563_v19  ;;  %2236 = vmatmul.mubr.f32.gmra.mrb[54].mxu0 %v7545_v44  ;;  %v9393_v8 = vunpack.i.h.bf16 %v7142_v27  ;;  %v9394_v13 = vunpack.i.h.bf16 %v7563_v19 }
 0x14a   : > { %v1857_v48 = vsel %vm1854_vm8, %v9392_v58, %v5439_v3  ;;  %4574 = vmatprep.subr.bf16.mxu1 %v4573_v15  ;;  %v1858_v43 = vsel %vm1854_vm8, %v5439_v3, %v9307_v56  ;;  %2241 = vmatprep.mubr.f32.mxu0 %v7557_v38  ;;  %v7585_v28 = vpop.permute.xlu0 %5447  ;;  %v7591_v58 = vld [vmem:[%s6432_s24 + $0x140] sm:$0xff]  ;;  %v7593_v3 = vpop.f32.mrb[4].mxu1 }
 0x14b   : > { %v1863_v4 = vsel %vm1854_vm8, %v9393_v8, %v5444_v52  ;;  %4576 = vmatpush1.bf16.msra.mxu1 %v4575_v33  ;;  %v1864_v15 = vsel %vm1854_vm8, %v5444_v52, %v9394_v13  ;;  %9395 = vst [vmem:[#allocation35_spill] sm:$0xff] %v7591_v58  ;;  %543 = vperm.xlu1 %5667, %v477_v0   ;;  %9396 = vst [vmem:[#allocation36_spill] sm:$0xff] %v7593_v3  ;;  %v9310_v40 = vunpack.i.h.bf16 %v7585_v28  ;;  %v7600_v19 = vpop.f32.mrb[5].mxu1 }
 0x14c   : > { %v4579_v56 = vpack.c.bf16 %v1863_v4, %v1857_v48  ;;  %v5449_v27 = vunpack.i.l.bf16 %v7585_v28  ;;  %v7597_v33 = vpop.permute.xlu1 %5452  ;;  %v4577_v8 = vpack.c.bf16 %v1864_v15, %v1858_v43  ;;  %9398 = vst [vmem:[#allocation38_spill] sm:$0xff] %v7600_v19  ;;  %558 = vperm.xlu0 %5666, %v480_v54   ;;  %v7610_v4 = vld [vmem:[%s6432_s24 + $0x138] sm:$0xff]  ;;  %v7618_v54 = vpop.f32.mrb[6].mxu1 }
 0x14d   : > { %9397 = vst [vmem:[#allocation37_spill] sm:$0xff] %v7597_v33  ;;  %v9313_v52 = vunpack.i.h.bf16 %v7597_v33  ;;  %v5454_v13 = vunpack.i.l.bf16 %v7597_v33  ;;  %2242 = vmatmul.mubr.f32.gmra.mrb[56].mxu0 %v7579_v35  ;;  %9399 = vst [vmem:[#allocation39_spill] sm:$0xff] %v7610_v4  ;;  %v7616_v15 = vld [vmem:[%s6432_s24 + $0x158] sm:$0xff] }
 0x14e   : > { %4578 = vmatprep.subr.bf16.mxu1 %v4577_v8  ;;  %v1961_v0 = vsel %vm1959_vm9, %v5449_v27, %v9310_v40  ;;  %2247 = vmatprep.mubr.f32.mxu0 %v7591_v58  ;;  %v5458_v48 = vpop.permute.xlu0 %5457  ;;  %9400 = vst [vmem:[#allocation40_spill] sm:$0xff] %v7616_v15  ;;  %9401 = vst [vmem:[#allocation41_spill] sm:$0xff] %v7618_v54  ;;  %v7622_v58 = vpop.f32.mrb[7].mxu1 }
 0x14f   : > { %4580 = vmatpush1.bf16.msra.mxu1 %v4579_v56  ;;  %v1967_v43 = vsel %vm1959_vm9, %v5454_v13, %v9313_v52  ;;  %553 = vperm.xlu1 %5667, %v479_v25   ;;  %v5460_v8 = vunpack.i.h.bf16 %v5458_v48  ;;  %v5459_v19 = vunpack.i.l.bf16 %v5458_v48  ;;  %9403 = vst [vmem:[#allocation43_spill] sm:$0xff] %v7622_v58 }
 0x150   : > { %v7620_v3 = vpop.permute.xlu1 %5462  ;;  %v4513_v40 = vpack.c.bf16 %v1967_v43, %v1961_v0  ;;  %v7633_v0 = vld [vmem:[%s6432_s24 + $0x150] sm:$0xff]  ;;  %v7635_v43 = vpop.f32.mrb[8].mxu1 }
 0x151   : > { %9402 = vst [vmem:[#allocation42_spill] sm:$0xff] %v7620_v3  ;;  %v5464_v33 = vunpack.i.l.bf16 %v7620_v3  ;;  %2248 = vmatmul.mubr.f32.gmra.mrb[58].mxu0 %v7610_v4  ;;  %v1960_v52 = vsel %vm1959_vm9, %v5459_v19, %v5449_v27  ;;  %v1966_v25 = vsel %vm1959_vm9, %v5460_v8, %v5454_v13  ;;  %9405 = vst [vmem:[#allocation45_spill] sm:$0xff] %v7633_v0  ;;  %v7642_v19 = vld [vmem:[%s6432_s24 + $0x170] sm:$0xff]  ;;  %v7644_v27 = vpop.f32.mrb[9].mxu1  ;;  %v9411_v13 = vunpack.i.h.bf16 %v7620_v3 }
 0x152   : > { %4514 = vmatprep.subr.bf16.mxu0 %v4513_v40  ;;  %2253 = vmatprep.mubr.f32.mxu0 %v7616_v15  ;;  %v4515_v48 = vpack.c.bf16 %v1966_v25, %v1960_v52  ;;  %v7630_v54 = vpop.permute.xlu0 %5467  ;;  %9406 = vst [vmem:[#allocation46_spill] sm:$0xff] %v7635_v43  ;;  %9408 = vst [vmem:[#allocation48_spill] sm:$0xff] %v7642_v19  ;;  %v9410_v40 = vunpack.i.h.bf16 %v7156_v59  ;;  %v9412_v25 = vunpack.i.h.bf16 %v7166_v17  ;;  %v7667_v17 = vpop.f32.mrb[10].mxu1 }
 0x153   : > { %9404 = vst [vmem:[#allocation44_spill] sm:$0xff] %v7630_v54  ;;  %v5469_v58 = vunpack.i.l.bf16 %v7630_v54  ;;  %9409 = vst [vmem:[#allocation49_spill] sm:$0xff] %v7644_v27  ;;  %v1870_v8 = vsel %vm1854_vm8, %v5464_v33, %v9411_v13  ;;  %v9413_v27 = vunpack.i.h.bf16 %v7630_v54 }
 0x154   : > { %v7639_v4 = vpop.permute.xlu1 %5472  ;;  %v1869_v52 = vsel %vm1854_vm8, %v9410_v40, %v5464_v33  ;;  %4516 = vmatpush1.bf16.msra.mxu0 %v4515_v48  ;;  %v7665_v33 = vld [vmem:[%s6432_s24 + $0x168] sm:$0xff]  ;;  %9416 = vst [vmem:[#allocation52_spill] sm:$0xff] %v7667_v17  ;;  %v9419_v17 = vmov 0.0  }
 0x155   : > { %9407 = vst [vmem:[#allocation47_spill] sm:$0xff] %v7639_v4  ;;  %v1875_v56 = vsel %vm1854_vm8, %v9412_v25, %v5469_v58  ;;  %v5474_v15 = vunpack.i.l.bf16 %v7639_v4  ;;  %2254 = vmatmul.mubr.f32.gmra.mrb[60].mxu0 %v7633_v0  ;;  %v1876_v59 = vsel %vm1854_vm8, %v5469_v58, %v9413_v27  ;;  %9415 = vst [vmem:[#allocation51_spill] sm:$0xff] %v7665_v33  ;;  %v7671_v0 = vpop.f32.mrb[11].mxu1  ;;  %v9418_v58 = vunpack.i.h.bf16 %v7639_v4 }
 0x156   : > { %v4583_v40 = vpack.c.bf16 %v1875_v56, %v1869_v52  ;;  %v7661_v48 = vpop.permute.xlu0 %5477  ;;  %v4581_v3 = vpack.c.bf16 %v1876_v59, %v1870_v8  ;;  %2259 = vmatprep.mubr.f32.mxu0 %v7642_v19  ;;  %9417 = vst [vmem:[#allocation53_spill] sm:$0xff] %v7671_v0 }
 0x157   : > { %9414 = vst [vmem:[#allocation50_spill] sm:$0xff] %v7661_v48  ;;  %v9324_v13 = vunpack.i.h.bf16 %v7661_v48  ;;  %v5479_v25 = vunpack.i.l.bf16 %v7661_v48  ;;  %v1973_v56 = vsel %vm1959_vm9, %v5474_v15, %v9418_v58 }
 0x158   : > { %v5483_v43 = vpop.permute.xlu1 %5482  ;;  %4582 = vmatprep.subr.bf16.mxu1 %v4581_v3  ;;  %v6052_v3 = vld [vmem:[#allocation2 + $0x28] sm:$0xff] }
 0x159   : > { %v5485_v54 = vunpack.i.h.bf16 %v5483_v43  ;;  %v5484_v63 = vunpack.i.l.bf16 %v5483_v43  ;;  %4584 = vmatpush1.bf16.msra.mxu1 %v4583_v40  ;;  %2260 = vmatmul.mubr.f32.gmra.mrb[62].mxu0 %v7665_v33  ;;  %v1979_v27 = vsel %vm1959_vm9, %v5479_v25, %v9324_v13  ;;  %v6053_v43 = vld [vmem:[#allocation2 + $0x60] sm:$0xff]  ;;  %v7685_v33 = vpop.f32.mrb[12].mxu1 }
 0x15a   : > { %v5488_v59 = vpop.permute.xlu0 %5487  ;;  %v4517_v0 = vpack.c.bf16 %v1979_v27, %v1973_v56  ;;  %2330 = vmatprep.mubr.f32.mxu0 %v9419_v17  ;;  %v7683_v40 = vpack.c.bf16 %v6053_v43, %v6052_v3  ;;  %9420 = vst [vmem:[#allocation54_spill] sm:$0xff] %v7685_v33  ;;  %v7687_v13 = vpop.f32.mrb[13].mxu1  ;;  %v6054_v56 = vld [vmem:[#allocation2 + $0x20] sm:$0xff]  ;;  %v6055_v27 = vld [vmem:[#allocation2 + $0x58] sm:$0xff] }
 0x15b   : > { %v1978_v52 = vsel %vm1959_vm9, %v5485_v54, %v5479_v25  ;;  %v1972_v8 = vsel %vm1959_vm9, %v5484_v63, %v5474_v15  ;;  %v5490_v19 = vunpack.i.h.bf16 %v5488_v59  ;;  %v5489_v48 = vunpack.i.l.bf16 %v5488_v59  ;;  %9421 = vst [vmem:[#allocation55_spill] sm:$0xff] %v7687_v13  ;;  %v7690_v63 = vpop.f32.mrb[16].mxu0  ;;  %v7694_v15 = vld [vmem:[%s6432_s24 + $0x10] sm:$0xff]  ;;  %v7703_v3 = vpop.f32.mrb[14].mxu1 }
 0x15c   : > { %v4519_v58 = vpack.c.bf16 %v1978_v52, %v1972_v8  ;;  %v5493_v4 = vpop.permute.xlu1 %5492  ;;  %4518 = vmatprep.subr.bf16.mxu0 %v4517_v0  ;;  %2492 = vmatmul.mubr.f32.vlgmr.msra.gmra.mrb[32].mxu1 %v7201_v31  ;;  %9422 = vst [vmem:[#allocation56_spill] sm:$0xff] %v7690_v63  ;;  %9423 = vst [vmem:[#allocation57_spill] sm:$0xff] %v7694_v15  ;;  %v7696_v52 = vpack.c.bf16 %v6055_v27, %v6054_v56  ;;  %v7698_v8 = vpop.f32.mrb[17].mxu0  ;;  %v6057_v0 = vld [vmem:[#allocation2 + $0xd0] sm:$0xff] }
 0x15d   : > { %v5495_v54 = vunpack.i.h.bf16 %v5493_v4  ;;  %v5494_v25 = vunpack.i.l.bf16 %v5493_v4  ;;  %2497 = vmatprep.mubr.f32.mxu1 %v7216_v37  ;;  %9425 = vst [vmem:[#allocation59_spill] sm:$0xff] %v7698_v8  ;;  %v6056_v4 = vld [vmem:[#allocation2 + $0x98] sm:$0xff]  ;;  %9426 = vst [vmem:[#allocation60_spill] sm:$0xff] %v7703_v3  ;;  %v1230_v43 = vsel %vm1224_vm2, %v5489_v48, %v5490_v19  ;;  %v7707_v63 = vpop.f32.mrb[15].mxu1  ;;  %v7717_v19 = vld [vmem:[%s6432_s24 + $0x28] sm:$0xff] }
 0x15e   : > { %4520 = vmatpush1.bf16.msra.mxu0 %v4519_v58  ;;  %9424 = vst [vmem:[#allocation58_spill] sm:$0xff] %v7696_v52  ;;  %v5498_v59 = vpop.permute.xlu0 %5497  ;;  %v7701_v31 = vpack.c.bf16 %v6057_v0, %v6056_v4  ;;  %9427 = vst [vmem:[#allocation61_spill] sm:$0xff] %v7707_v63  ;;  %v7712_v4 = vpop.f32.mrb[18].mxu0  ;;  %v6059_v0 = vld [vmem:[#allocation2 + $0xc8] sm:$0xff] }
 0x15f   : > { %4594 = vmatprep.subr.bf16.mxu0 %v7683_v40  ;;  %v1236_v58 = vsel %vm1224_vm2, %v5494_v25, %v5495_v54  ;;  %v5500_v56 = vunpack.i.h.bf16 %v5498_v59  ;;  %v5499_v27 = vunpack.i.l.bf16 %v5498_v59  ;;  %9428 = vst [vmem:[#allocation62_spill] sm:$0xff] %v7712_v4  ;;  %v6058_v54 = vld [vmem:[#allocation2 + $0x90] sm:$0xff]  ;;  %v7721_v59 = vpop.f32.mrb[19].mxu0  ;;  %v9432_v4 = vunpack.i.h.bf16 %v7186_v21 }
 0x160   : > { %v5503_v37 = vpop.permute.xlu1 %5502  ;;  %2498 = vmatmul.mubr.f32.gmra.mrb[34].mxu1 %v7232_v60  ;;  %v7719_v63 = vpack.c.bf16 %v6059_v0, %v6058_v54  ;;  %9429 = vst [vmem:[#allocation63_spill] sm:$0xff] %v7721_v59  ;;  %v7728_v60 = vpop.f32.mrb[16].mxu1  ;;  %v7733_v59 = vpack.c.bf16 %v1236_v58, %v1230_v43  ;;  %v9436_v43 = vunpack.i.h.bf16 %v7206_v32 }
 0x161   : > { %v5505_v8 = vunpack.i.h.bf16 %v5503_v37  ;;  %v5504_v13 = vunpack.i.l.bf16 %v5503_v37  ;;  %4298 = vmatmul.mubr.msk.f32.vlgmr.msra.gmra.mrb[32].mxu0 %vm2056_vm10, %v7694_v15  ;;  %v9430_v37 = vunpack.i.h.bf16 %v7182_v30  ;;  %2503 = vmatprep.mubr.f32.mxu1 %v7248_v14  ;;  %9431 = vst [vmem:[#allocation64_spill] sm:$0xff] %v7728_v60  ;;  %v7735_v30 = vpop.f32.mrb[17].mxu1  ;;  %v1242_v14 = vsel %vm1224_vm2, %v5499_v27, %v5500_v56  ;;  %v7742_v60 = vpop.f32.mrb[20].mxu0 }
 0x162   : > { %4596 = vmatpush1.bf16.msra.mxu0 %v7696_v52  ;;  %2336 = vmatprep.mubr.f32.mxu0 %v9419_v17  ;;  %v5508_v33 = vpop.permute.xlu0 %5507  ;;  %v1235_v52 = vsel %vm1224_vm2, %v9432_v4, %v5494_v25  ;;  %9433 = vst [vmem:[#allocation65_spill] sm:$0xff] %v7735_v30  ;;  %9434 = vst [vmem:[#allocation66_spill] sm:$0xff] %v7742_v60  ;;  %v7749_v25 = vpop.f32.mrb[21].mxu0  ;;  %v9438_v56 = vunpack.i.h.bf16 %v7213_v6 }
 0x163   : > { %v1229_v3 = vsel %vm1224_vm2, %v9430_v37, %v5489_v48  ;;  %4598 = vmatprep.subr.bf16.mxu0 %v7701_v31  ;;  %v5510_v54 = vunpack.i.h.bf16 %v5508_v33  ;;  %v5509_v0 = vunpack.i.l.bf16 %v5508_v33  ;;  %v1248_v21 = vsel %vm1224_vm2, %v5504_v13, %v5505_v8  ;;  %v7747_v33 = vld [vmem:[%s6432_s24 + $0x40] sm:$0xff]  ;;  %9435 = vst [vmem:[#allocation67_spill] sm:$0xff] %v7749_v25  ;;  %v7758_v8 = vpop.f32.mrb[18].mxu1  ;;  %v7772_v6 = vpop.f32.mrb[22].mxu0 }
 0x164   : > { %v5513_v15 = vpop.permute.xlu1 %5512  ;;  %2504 = vmatmul.mubr.f32.gmra.mrb[36].mxu1 %v7264_v2  ;;  %v1241_v2 = vsel %vm1224_vm2, %v9436_v43, %v5499_v27  ;;  %9437 = vst [vmem:[#allocation68_spill] sm:$0xff] %v7758_v8  ;;  %v1247_v4 = vsel %vm1224_vm2, %v9438_v56, %v5504_v13  ;;  %v7763_v25 = vpack.c.bf16 %v1248_v21, %v1242_v14  ;;  %9440 = vst [vmem:[#allocation70_spill] sm:$0xff] %v7772_v6  ;;  %v7777_v13 = vld [vmem:[%s6432_s24 + $0x58] sm:$0xff] }
 0x165   : > { %v5515_v48 = vunpack.i.h.bf16 %v5513_v15  ;;  %v5514_v37 = vunpack.i.l.bf16 %v5513_v15  ;;  %4299 = vmatmul.mubr.msk.f32.gmra.mrb[34].mxu0 %vm2056_vm10, %v7717_v19  ;;  %v7751_v15 = vpack.c.bf16 %v1235_v52, %v1229_v3  ;;  %2509 = vmatprep.mubr.f32.mxu1 %v7280_v45  ;;  %v1335_v52 = vsel %vm1329_vm3, %v5509_v0, %v5510_v54  ;;  %v7767_v3 = vpop.f32.mrb[19].mxu1  ;;  %v7779_v54 = vpop.f32.mrb[23].mxu0 }
 0x166   : > { %4600 = vmatpush1.bf16.msra.mxu0 %v7719_v63  ;;  %2342 = vmatprep.mubr.f32.mxu0 %v9419_v17  ;;  %v5518_v58 = vpop.permute.xlu0 %5517  ;;  %9439 = vst [vmem:[#allocation69_spill] sm:$0xff] %v7767_v3  ;;  %9441 = vst [vmem:[#allocation71_spill] sm:$0xff] %v7779_v54  ;;  %v9442_v14 = vunpack.i.h.bf16 %v7237_v46 }
 0x167   : > { %4602 = vmatprep.subr.bf16.mxu0 %v7733_v59  ;;  %v1341_v32 = vsel %vm1329_vm3, %v5514_v37, %v5515_v48  ;;  %v5520_v27 = vunpack.i.h.bf16 %v5518_v58  ;;  %v5519_v43 = vunpack.i.l.bf16 %v5518_v58  ;;  %v7781_v48 = vpack.c.bf16 %v1247_v4, %v1241_v2 }
 0x168   : > { %v5523_v60 = vpop.permute.xlu1 %5522  ;;  %2510 = vmatmul.mubr.f32.gmra.mrb[38].mxu1 %v7296_v55  ;;  %v7788_v55 = vpop.f32.mrb[20].mxu1  ;;  %v9444_v58 = vunpack.i.h.bf16 %v7245_v18  ;;  %v7793_v4 = vpack.c.bf16 %v1341_v32, %v1335_v52 }
 0x169   : > { %v5525_v30 = vunpack.i.h.bf16 %v5523_v60  ;;  %v5524_v45 = vunpack.i.l.bf16 %v5523_v60  ;;  %4300 = vmatmul.mubr.msk.f32.gmra.mrb[36].mxu0 %vm2056_vm10, %v7747_v33  ;;  %v1334_v60 = vsel %vm1329_vm3, %v9442_v14, %v5509_v0  ;;  %2515 = vmatprep.mubr.f32.mxu1 %v7312_v49  ;;  %9443 = vst [vmem:[#allocation72_spill] sm:$0xff] %v7788_v55  ;;  %v7795_v46 = vpop.f32.mrb[21].mxu1  ;;  %v1347_v49 = vsel %vm1329_vm3, %v5519_v43, %v5520_v27  ;;  %v7802_v55 = vpop.f32.mrb[24].mxu0 }
 0x16a   : > { %4604 = vmatpush1.bf16.msra.mxu0 %v7751_v15  ;;  %2348 = vmatprep.mubr.f32.mxu0 %v9419_v17  ;;  %v5528_v21 = vpop.permute.xlu0 %5527  ;;  %v1340_v56 = vsel %vm1329_vm3, %v9444_v58, %v5514_v37  ;;  %9445 = vst [vmem:[#allocation73_spill] sm:$0xff] %v7795_v46  ;;  %9446 = vst [vmem:[#allocation74_spill] sm:$0xff] %v7802_v55  ;;  %v7807_v37 = vld [vmem:[%s6432_s24 + $0x70] sm:$0xff]  ;;  %v7809_v52 = vpop.f32.mrb[25].mxu0  ;;  %v9450_v27 = vunpack.i.h.bf16 %v7277_v39 }
 0x16b   : > { %4606 = vmatprep.subr.bf16.mxu0 %v7763_v25  ;;  %v5530_v6 = vunpack.i.h.bf16 %v5528_v21  ;;  %v5529_v54 = vunpack.i.l.bf16 %v5528_v21  ;;  %v1353_v18 = vsel %vm1329_vm3, %v5524_v45, %v5525_v30  ;;  %9447 = vst [vmem:[#allocation75_spill] sm:$0xff] %v7809_v52  ;;  %v7811_v32 = vpack.c.bf16 %v1340_v56, %v1334_v60  ;;  %v7818_v30 = vpop.f32.mrb[22].mxu1  ;;  %v7832_v39 = vpop.f32.mrb[26].mxu0 }
 0x16c   : > { %v5533_v2 = vpop.permute.xlu1 %5532  ;;  %2516 = vmatmul.mubr.f32.gmra.mrb[40].mxu1 %v7328_v53  ;;  %v9448_v21 = vunpack.i.h.bf16 %v7269_v57  ;;  %9449 = vst [vmem:[#allocation76_spill] sm:$0xff] %v7818_v30  ;;  %v7823_v52 = vpack.c.bf16 %v1353_v18, %v1347_v49  ;;  %9452 = vst [vmem:[#allocation78_spill] sm:$0xff] %v7832_v39  ;;  %v9454_v49 = vunpack.i.h.bf16 %v7301_v41 }
 0x16d   : > { %v5535_v0 = vunpack.i.h.bf16 %v5533_v2  ;;  %v5534_v14 = vunpack.i.l.bf16 %v5533_v2  ;;  %4301 = vmatmul.mubr.msk.f32.gmra.mrb[38].mxu0 %vm2056_vm10, %v7777_v13  ;;  %2521 = vmatprep.mubr.f32.mxu1 %v7340_v11  ;;  %v1352_v2 = vsel %vm1329_vm3, %v9450_v27, %v5524_v45  ;;  %v1440_v60 = vsel %vm1434_vm4, %v5529_v54, %v5530_v6  ;;  %v7837_v45 = vld [vmem:[%s6432_s24 + $0x88] sm:$0xff]  ;;  %v7839_v6 = vpop.f32.mrb[27].mxu0 }
 0x16e   : > { %4608 = vmatpush1.bf16.msra.mxu0 %v7781_v48  ;;  %2354 = vmatprep.mubr.f32.mxu0 %v9419_v17  ;;  %v1346_v53 = vsel %vm1329_vm3, %v9448_v21, %v5519_v43  ;;  %v5538_v58 = vpop.permute.xlu0 %5537  ;;  %v7827_v43 = vpop.f32.mrb[23].mxu1  ;;  %9453 = vst [vmem:[#allocation79_spill] sm:$0xff] %v7839_v6 }
 0x16f   : > { %4610 = vmatprep.subr.bf16.mxu0 %v7793_v4  ;;  %v1446_v57 = vsel %vm1434_vm4, %v5534_v14, %v5535_v0  ;;  %9451 = vst [vmem:[#allocation77_spill] sm:$0xff] %v7827_v43  ;;  %v5540_v56 = vunpack.i.h.bf16 %v5538_v58  ;;  %v5539_v21 = vunpack.i.l.bf16 %v5538_v58  ;;  %v7841_v0 = vpack.c.bf16 %v1352_v2, %v1346_v53 }
 0x170   : > { %v5543_v55 = vpop.permute.xlu1 %5542  ;;  %2522 = vmatmul.mubr.f32.gmra.mrb[42].mxu1 %v7359_v7  ;;  %v7848_v7 = vpop.f32.mrb[24].mxu1  ;;  %v9456_v58 = vunpack.i.h.bf16 %v7309_v23  ;;  %v7853_v2 = vpack.c.bf16 %v1446_v57, %v1440_v60 }
 0x171   : > { %v5545_v46 = vunpack.i.h.bf16 %v5543_v55  ;;  %v5544_v11 = vunpack.i.l.bf16 %v5543_v55  ;;  %4302 = vmatmul.mubr.msk.f32.gmra.mrb[40].mxu0 %vm2056_vm10, %v7807_v37  ;;  %v1439_v55 = vsel %vm1434_vm4, %v9454_v49, %v5529_v54  ;;  %2527 = vmatprep.mubr.f32.mxu1 %v7371_v34  ;;  %9455 = vst [vmem:[#allocation80_spill] sm:$0xff] %v7848_v7  ;;  %v7855_v41 = vpop.f32.mrb[25].mxu1  ;;  %v1452_v34 = vsel %vm1434_vm4, %v5539_v21, %v5540_v56  ;;  %v7862_v7 = vpop.f32.mrb[28].mxu0 }
 0x172   : > { %4612 = vmatpush1.bf16.msra.mxu0 %v7811_v32  ;;  %2360 = vmatprep.mubr.f32.mxu0 %v9419_v17  ;;  %v5548_v18 = vpop.permute.xlu0 %5547  ;;  %v1445_v27 = vsel %vm1434_vm4, %v9456_v58, %v5534_v14  ;;  %9457 = vst [vmem:[#allocation81_spill] sm:$0xff] %v7855_v41  ;;  %9458 = vst [vmem:[#allocation82_spill] sm:$0xff] %v7862_v7  ;;  %v7867_v14 = vld [vmem:[%s6432_s24 + $0xa0] sm:$0xff]  ;;  %v7869_v60 = vpop.f32.mrb[29].mxu0  ;;  %v9462_v56 = vunpack.i.h.bf16 %v7344_v5 }
 0x173   : > { %4614 = vmatprep.subr.bf16.mxu0 %v7823_v52  ;;  %v5550_v39 = vunpack.i.h.bf16 %v5548_v18  ;;  %v5549_v6 = vunpack.i.l.bf16 %v5548_v18  ;;  %v1458_v23 = vsel %vm1434_vm4, %v5544_v11, %v5545_v46  ;;  %9459 = vst [vmem:[#allocation83_spill] sm:$0xff] %v7869_v60  ;;  %v7871_v57 = vpack.c.bf16 %v1445_v27, %v1439_v55  ;;  %v7878_v46 = vpop.f32.mrb[26].mxu1  ;;  %v7892_v5 = vpop.f32.mrb[30].mxu0 }
 0x174   : > { %v5553_v53 = vpop.permute.xlu1 %5552  ;;  %2528 = vmatmul.mubr.f32.gmra.mrb[44].mxu1 %v7391_v26  ;;  %v9460_v18 = vunpack.i.h.bf16 %v7333_v50  ;;  %9461 = vst [vmem:[#allocation84_spill] sm:$0xff] %v7878_v46  ;;  %v7883_v60 = vpack.c.bf16 %v1458_v23, %v1452_v34  ;;  %9464 = vst [vmem:[#allocation86_spill] sm:$0xff] %v7892_v5  ;;  %v9466_v34 = vunpack.i.h.bf16 %v7365_v22 }
 0x175   : > { %v5555_v54 = vunpack.i.h.bf16 %v5553_v53  ;;  %v5554_v49 = vunpack.i.l.bf16 %v5553_v53  ;;  %4303 = vmatmul.mubr.msk.f32.gmra.mrb[42].mxu0 %vm2056_vm10, %v7837_v45  ;;  %2533 = vmatprep.mubr.f32.mxu1 %v7403_v20  ;;  %v1457_v53 = vsel %vm1434_vm4, %v9462_v56, %v5544_v11  ;;  %v1545_v55 = vsel %vm1539_vm5, %v5549_v6, %v5550_v39  ;;  %v7897_v11 = vld [vmem:[%s6432_s24 + $0xb8] sm:$0xff]  ;;  %v7899_v39 = vpop.f32.mrb[31].mxu0 }
 0x176   : > { %4616 = vmatpush1.bf16.msra.mxu0 %v7841_v0  ;;  %2366 = vmatprep.mubr.f32.mxu0 %v9419_v17  ;;  %v1451_v26 = vsel %vm1434_vm4, %v9460_v18, %v5539_v21  ;;  %v5558_v58 = vpop.permute.xlu0 %5557  ;;  %v7887_v21 = vpop.f32.mrb[27].mxu1  ;;  %9465 = vst [vmem:[#allocation87_spill] sm:$0xff] %v7899_v39 }
 0x177   : > { %4618 = vmatprep.subr.bf16.mxu0 %v7853_v2  ;;  %v1551_v50 = vsel %vm1539_vm5, %v5554_v49, %v5555_v54  ;;  %9463 = vst [vmem:[#allocation85_spill] sm:$0xff] %v7887_v21  ;;  %v5560_v27 = vunpack.i.h.bf16 %v5558_v58  ;;  %v5559_v18 = vunpack.i.l.bf16 %v5558_v58  ;;  %v7901_v54 = vpack.c.bf16 %v1457_v53, %v1451_v26 }
 0x178   : > { %v5563_v7 = vpop.permute.xlu1 %5562  ;;  %2534 = vmatmul.mubr.f32.gmra.mrb[46].mxu1 %v7421_v47  ;;  %v7908_v47 = vpop.f32.mrb[28].mxu1  ;;  %v9468_v58 = vunpack.i.h.bf16 %v7377_v9  ;;  %v7913_v53 = vpack.c.bf16 %v1551_v50, %v1545_v55  ;;  %v9470_v50 = vunpack.i.h.bf16 %v7397_v12 }
 0x179   : > { %v5565_v41 = vunpack.i.h.bf16 %v5563_v7  ;;  %v5564_v20 = vunpack.i.l.bf16 %v5563_v7  ;;  %4304 = vmatmul.mubr.msk.f32.gmra.mrb[44].mxu0 %vm2056_vm10, %v7867_v14  ;;  %v1544_v7 = vsel %vm1539_vm5, %v9466_v34, %v5549_v6  ;;  %2539 = vmatprep.mubr.f32.mxu1 %v7433_v24  ;;  %9467 = vst [vmem:[#allocation88_spill] sm:$0xff] %v7908_v47  ;;  %v7915_v22 = vpop.f32.mrb[29].mxu1  ;;  %v1557_v24 = vsel %vm1539_vm5, %v5559_v18, %v5560_v27 }
 0x17a   : > { %4620 = vmatpush1.bf16.msra.mxu0 %v7871_v57  ;;  %2372 = vmatprep.mubr.f32.mxu0 %v9419_v17  ;;  %v5568_v23 = vpop.permute.xlu0 %5567  ;;  %v1550_v56 = vsel %vm1539_vm5, %v9468_v58, %v5554_v49  ;;  %9469 = vst [vmem:[#allocation89_spill] sm:$0xff] %v7915_v22  ;;  %v7925_v49 = vld [vmem:[%s6432_s24 + $0xd0] sm:$0xff] }
 0x17b   : > { %4622 = vmatprep.subr.bf16.mxu0 %v7883_v60  ;;  %v5570_v5 = vunpack.i.h.bf16 %v5568_v23  ;;  %v5569_v39 = vunpack.i.l.bf16 %v5568_v23  ;;  %v1563_v9 = vsel %vm1539_vm5, %v5564_v20, %v5565_v41  ;;  %v7927_v55 = vpack.c.bf16 %v1550_v56, %v1544_v7 }
 0x17c   : > { %v5573_v26 = vpop.permute.xlu1 %5572  ;;  %2540 = vmatmul.mubr.f32.gmra.mrb[48].mxu1 %v7451_v29  ;;  %v1556_v23 = vsel %vm1539_vm5, %v9470_v50, %v5559_v18  ;;  %v7934_v29 = vpop.f32.mrb[30].mxu1  ;;  %v9472_v41 = vunpack.i.h.bf16 %v7407_v16  ;;  %v7939_v22 = vpack.c.bf16 %v1563_v9, %v1557_v24  ;;  %v7951_v16 = vld [vmem:[%s6432_s24 + $0xe8] sm:$0xff] }
 0x17d   : > { %v5575_v6 = vunpack.i.h.bf16 %v5573_v26  ;;  %v5574_v34 = vunpack.i.l.bf16 %v5573_v26  ;;  %4305 = vmatmul.mubr.msk.f32.gmra.mrb[46].mxu0 %vm2056_vm10, %v7897_v11  ;;  %2545 = vmatprep.mubr.f32.mxu1 %v7463_v62  ;;  %9471 = vst [vmem:[#allocation90_spill] sm:$0xff] %v7934_v29  ;;  %v1650_v7 = vsel %vm1644_vm6, %v5569_v39, %v5570_v5  ;;  %v7943_v18 = vpop.f32.mrb[31].mxu1  ;;  %v9474_v5 = vunpack.i.h.bf16 %v7427_v42 }
 0x17e   : > { %4624 = vmatpush1.bf16.msra.mxu0 %v7901_v54  ;;  %2378 = vmatprep.mubr.f32.mxu0 %v9419_v17  ;;  %v5578_v58 = vpop.permute.xlu0 %5577  ;;  %v1562_v27 = vsel %vm1539_vm5, %v9472_v41, %v5564_v20  ;;  %9473 = vst [vmem:[#allocation91_spill] sm:$0xff] %v7943_v18 }
 0x17f   : > { %4626 = vmatprep.subr.bf16.mxu0 %v7913_v53  ;;  %v1656_v12 = vsel %vm1644_vm6, %v5574_v34, %v5575_v6  ;;  %v5580_v56 = vunpack.i.h.bf16 %v5578_v58  ;;  %v5579_v50 = vunpack.i.l.bf16 %v5578_v58  ;;  %v7953_v20 = vpack.c.bf16 %v1562_v27, %v1556_v23 }
 0x180   : > { %v5583_v26 = vpop.permute.xlu1 %5582  ;;  %2546 = vmatmul.mubr.f32.gmra.mrb[50].mxu1 %v7481_v10  ;;  %v1649_v6 = vsel %vm1644_vm6, %v9474_v5, %v5569_v39  ;;  %v9475_v10 = vunpack.i.h.bf16 %v7437_v51  ;;  %v7963_v18 = vpack.c.bf16 %v1656_v12, %v1650_v7  ;;  %v7973_v51 = vld [vmem:[%s6432_s24 + $0x100] sm:$0xff] }
 0x181   : > { %v5585_v47 = vunpack.i.h.bf16 %v5583_v26  ;;  %v5584_v62 = vunpack.i.l.bf16 %v5583_v26  ;;  %4306 = vmatmul.mubr.msk.f32.gmra.mrb[48].mxu0 %vm2056_vm10, %v7925_v49  ;;  %2551 = vmatprep.mubr.f32.mxu1 %v7493_v36  ;;  %v1662_v42 = vsel %vm1644_vm6, %v5579_v50, %v5580_v56  ;;  %v9478_v56 = vld [vmem:[#allocation23_spill] sm:$0xff] }
 0x182   : > { %4628 = vmatpush1.bf16.msra.mxu0 %v7927_v55  ;;  %2384 = vmatprep.mubr.f32.mxu0 %v9419_v17  ;;  %v5588_v24 = vpop.permute.xlu0 %5587  ;;  %v1655_v9 = vsel %vm1644_vm6, %v9475_v10, %v5574_v34  ;;  %v9476_v34 = vunpack.i.h.bf16 %v7457_v61  ;;  %v9479_v5 = vunpack.i.h.bf16 %v9478_v56 }
 0x183   : > { %4630 = vmatprep.subr.bf16.mxu0 %v7939_v22  ;;  %v5590_v58 = vunpack.i.h.bf16 %v5588_v24  ;;  %v5589_v41 = vunpack.i.l.bf16 %v5588_v24  ;;  %v1668_v36 = vsel %vm1644_vm6, %v5584_v62, %v5585_v47  ;;  %v7975_v39 = vpack.c.bf16 %v1655_v9, %v1649_v6  ;;  %v9480_v24 = vld [vmem:[#allocation24_spill] sm:$0xff] }
 0x184   : > { %v5593_v26 = vpop.permute.xlu1 %5592  ;;  %2552 = vmatmul.mubr.f32.gmra.mrb[52].mxu1 %v7511_v1  ;;  %v1661_v7 = vsel %vm1644_vm6, %v9476_v34, %v5579_v50  ;;  %v9477_v1 = vld [vmem:[#allocation27_spill] sm:$0xff]  ;;  %v1667_v47 = vsel %vm1644_vm6, %v9479_v5, %v5584_v62  ;;  %v9481_v10 = vunpack.i.h.bf16 %v9480_v24  ;;  %v7988_v9 = vpack.c.bf16 %v1668_v36, %v1662_v42  ;;  %v9482_v50 = vld [vmem:[#allocation25_spill] sm:$0xff]  ;;  %v9484_v24 = vld [vmem:[#allocation26_spill] sm:$0xff] }
 0x185   : > { %v5595_v23 = vunpack.i.h.bf16 %v5593_v26  ;;  %v5594_v27 = vunpack.i.l.bf16 %v5593_v26  ;;  %4307 = vmatmul.mubr.msk.f32.gmra.mrb[50].mxu0 %vm2056_vm10, %v7951_v16  ;;  %2557 = vmatprep.mubr.f32.mxu1 %v9477_v1  ;;  %v1755_v61 = vsel %vm1749_vm7, %v5589_v41, %v5590_v58  ;;  %v9483_v34 = vunpack.i.h.bf16 %v9482_v50  ;;  %v8001_v58 = vld [vmem:[%s6432_s24 + $0x118] sm:$0xff] }
 0x186   : > { %4632 = vmatpush1.bf16.msra.mxu0 %v7953_v20  ;;  %2390 = vmatprep.mubr.f32.mxu0 %v9419_v17  ;;  %v5598_v12 = vpop.permute.xlu0 %5597  ;;  %v1754_v26 = vsel %vm1749_vm7, %v9481_v10, %v5589_v41  ;;  %v8003_v41 = vpack.c.bf16 %v1667_v47, %v1661_v7  ;;  %v9485_v7 = vunpack.i.h.bf16 %v9484_v24 }
 0x187   : > { %4634 = vmatprep.subr.bf16.mxu0 %v7963_v18  ;;  %v1760_v29 = vsel %vm1749_vm7, %v9483_v34, %v5594_v27  ;;  %v5600_v21 = vunpack.i.h.bf16 %v5598_v12  ;;  %v5599_v1 = vunpack.i.l.bf16 %v5598_v12  ;;  %v1761_v62 = vsel %vm1749_vm7, %v5594_v27, %v5595_v23 }
 0x188   : > { %v5603_v6 = vpop.permute.xlu1 %5602  ;;  %2558 = vmatmul.mubr.f32.gmra.mrb[54].mxu1 %v7545_v44  ;;  %v8009_v44 = vpack.c.bf16 %v1760_v29, %v1754_v26  ;;  %v8015_v12 = vpack.c.bf16 %v1761_v62, %v1755_v61  ;;  %v9486_v29 = vunpack.i.h.bf16 %v7585_v28  ;;  %v8032_v61 = vld [vmem:[%s6432_s24 + $0x130] sm:$0xff] }
 0x189   : > { %4308 = vmatmul.mubr.msk.f32.gmra.mrb[52].mxu0 %vm2056_vm10, %v7973_v51  ;;  %v5605_v56 = vunpack.i.h.bf16 %v5603_v6  ;;  %v5604_v5 = vunpack.i.l.bf16 %v5603_v6  ;;  %2563 = vmatprep.mubr.f32.mxu1 %v7557_v38  ;;  %v1766_v47 = vsel %vm1749_vm7, %v9485_v7, %v5599_v1  ;;  %v1767_v38 = vsel %vm1749_vm7, %v5599_v1, %v5600_v21  ;;  %v9487_v62 = vld [vmem:[#allocation29_spill] sm:$0xff] }
 0x18a   : > { %4636 = vmatpush1.bf16.msra.mxu0 %v7975_v39  ;;  %2396 = vmatprep.mubr.f32.mxu0 %v9419_v17  ;;  %v8005_v42 = vpop.permute.xlu0 %5607  ;;  %v9489_v1 = vld [vmem:[#allocation37_spill] sm:$0xff] }
 0x18b   : > { %4638 = vmatprep.subr.bf16.mxu0 %v7988_v9  ;;  %v9328_v23 = vunpack.i.h.bf16 %v8005_v42  ;;  %v5609_v27 = vunpack.i.l.bf16 %v8005_v42  ;;  %v1773_v34 = vsel %vm1749_vm7, %v5604_v5, %v5605_v56  ;;  %v9490_v28 = vunpack.i.h.bf16 %v9489_v1  ;;  %v9492_v1 = vld [vmem:[#allocation39_spill] sm:$0xff] }
 0x18c   : > { %v8013_v36 = vpop.permute.xlu1 %5612  ;;  %2564 = vmatmul.mubr.f32.gmra.mrb[56].mxu1 %v7579_v35  ;;  %v9488_v35 = vunpack.i.h.bf16 %v9487_v62 }
 0x18d   : > { %v9329_v10 = vunpack.i.h.bf16 %v8013_v36  ;;  %v5614_v6 = vunpack.i.l.bf16 %v8013_v36  ;;  %4309 = vmatmul.mubr.msk.f32.gmra.mrb[54].mxu0 %vm2056_vm10, %v8001_v58  ;;  %v1962_v26 = vsel %vm1959_vm9, %v9486_v29, %v5609_v27  ;;  %v1963_v50 = vsel %vm1959_vm9, %v5609_v27, %v9328_v23  ;;  %v9491_v29 = vld [vmem:[#allocation35_spill] sm:$0xff] }
 0x18e   : > { %4640 = vmatpush1.bf16.msra.mxu0 %v8003_v41  ;;  %2402 = vmatprep.mubr.f32.mxu0 %v9419_v17  ;;  %v1772_v21 = vsel %vm1749_vm7, %v9488_v35, %v5604_v5  ;;  %v5618_v7 = vpop.permute.xlu0 %5617 }
 0x18f   : > { %v1968_v24 = vsel %vm1959_vm9, %v9490_v28, %v5614_v6  ;;  %4642 = vmatprep.subr.bf16.mxu0 %v8015_v12  ;;  %2569 = vmatprep.mubr.f32.mxu1 %v9491_v29  ;;  %v1969_v27 = vsel %vm1959_vm9, %v5614_v6, %v9329_v10  ;;  %v5620_v56 = vunpack.i.h.bf16 %v5618_v7  ;;  %v5619_v46 = vunpack.i.l.bf16 %v5618_v7  ;;  %v8056_v29 = vld [vmem:[%s6432_s24 + $0x148] sm:$0xff]  ;;  %v9495_v7 = vld [vmem:[#allocation31_spill] sm:$0xff] }
 0x190   : > { %v4587_v23 = vpack.c.bf16 %v1968_v24, %v1962_v26  ;;  %v5623_v62 = vpop.permute.xlu1 %5622  ;;  %v4585_v43 = vpack.c.bf16 %v1969_v27, %v1963_v50  ;;  %2570 = vmatmul.mubr.f32.gmra.mrb[58].mxu1 %v9492_v1  ;;  %v8052_v28 = vpack.c.bf16 %v1773_v34, %v1767_v38  ;;  %9493 = vst [vmem:[#allocation27_spill] sm:$0xff] %v8056_v29  ;;  %v9496_v27 = vunpack.i.h.bf16 %v9495_v7  ;;  %v9497_v38 = vld [vmem:[#allocation33_spill] sm:$0xff]  ;;  %v9501_v7 = vld [vmem:[#allocation47_spill] sm:$0xff] }
 0x191   : > { %v5625_v5 = vunpack.i.h.bf16 %v5623_v62  ;;  %v5624_v35 = vunpack.i.l.bf16 %v5623_v62  ;;  %4310 = vmatmul.mubr.msk.f32.gmra.mrb[56].mxu0 %vm2056_vm10, %v8032_v61  ;;  %v1860_v6 = vsel %vm1854_vm8, %v5619_v46, %v5620_v56  ;;  %v8059_v26 = vpack.c.bf16 %v1772_v21, %v1766_v47  ;;  %v9499_v21 = vld [vmem:[#allocation40_spill] sm:$0xff] }
 0x192   : > { %4586 = vmatprep.subr.bf16.mxu1 %v4585_v43  ;;  %4644 = vmatpush1.bf16.msra.mxu0 %v8009_v44  ;;  %v8061_v50 = vpop.permute.xlu0 %5627  ;;  %v1859_v43 = vsel %vm1854_vm8, %v9496_v27, %v5619_v46  ;;  %v9498_v34 = vunpack.i.h.bf16 %v9497_v38  ;;  %v9500_v46 = vld [vmem:[#allocation45_spill] sm:$0xff]  ;;  %v9502_v27 = vunpack.i.h.bf16 %v9501_v7  ;;  %v9505_v7 = vld [vmem:[#allocation48_spill] sm:$0xff] }
 0x193   : > { %9494 = vst [vmem:[#allocation23_spill] sm:$0xff] %v8059_v26  ;;  %4588 = vmatpush1.bf16.msra.mxu1 %v4587_v23  ;;  %4646 = vmatprep.subr.bf16.mxu0 %v8052_v28  ;;  %v1866_v24 = vsel %vm1854_vm8, %v5624_v35, %v5625_v5  ;;  %v9331_v56 = vunpack.i.h.bf16 %v8061_v50  ;;  %v5629_v47 = vunpack.i.l.bf16 %v8061_v50  ;;  %v9503_v5 = vld [vmem:[#allocation50_spill] sm:$0xff] }
 0x194   : > { %v1865_v62 = vsel %vm1854_vm8, %v9498_v34, %v5624_v35  ;;  %v8073_v23 = vpop.permute.xlu1 %5632  ;;  %2408 = vmatprep.mubr.f32.mxu0 %v9419_v17  ;;  %2575 = vmatprep.mubr.f32.mxu1 %v9499_v21  ;;  %v8082_v35 = vpack.c.bf16 %v1866_v24, %v1860_v6  ;;  %v8090_v34 = vld [vmem:[%s6432_s24 + $0x160] sm:$0xff] }
 0x195   : > { %v5634_v1 = vunpack.i.l.bf16 %v8073_v23  ;;  %4311 = vmatmul.mubr.msk.f32.gmra.mrb[58].mxu0 %vm2056_vm10, %v8056_v29  ;;  %2576 = vmatmul.mubr.f32.gmra.mrb[60].mxu1 %v9500_v46  ;;  %v1974_v38 = vsel %vm1959_vm9, %v9502_v27, %v5629_v47  ;;  %v1975_v21 = vsel %vm1959_vm9, %v5629_v47, %v9331_v56  ;;  %v8095_v10 = vpack.c.bf16 %v1865_v62, %v1859_v43 }
 0x196   : > { %4648 = vmatpush1.bf16.msra.mxu0 %v8059_v26  ;;  %2414 = vmatprep.mubr.f32.mxu0 %v9419_v17  ;;  %v9504_v46 = vunpack.i.h.bf16 %v9503_v5  ;;  %v5638_v24 = vpop.permute.xlu0 %5637  ;;  %v9506_v27 = vunpack.i.h.bf16 %v8073_v23  ;;  %v9507_v5 = vld [vmem:[#allocation51_spill] sm:$0xff] }
 0x197   : > { %2581 = vmatprep.mubr.f32.mxu1 %v9505_v7  ;;  %4650 = vmatprep.subr.bf16.mxu0 %v8082_v35  ;;  %v5640_v8 = vunpack.i.h.bf16 %v5638_v24  ;;  %v5639_v26 = vunpack.i.l.bf16 %v5638_v24 }
 0x198   : > { %v1980_v6 = vsel %vm1959_vm9, %v9504_v46, %v5634_v1  ;;  %v1981_v30 = vsel %vm1959_vm9, %v5634_v1, %v9506_v27  ;;  %v5643_v47 = vpop.permute.xlu1 %5642  ;;  %v9508_v46 = vld [vmem:[#allocation42_spill] sm:$0xff] }
 0x199   : > { %v4591_v3 = vpack.c.bf16 %v1980_v6, %v1974_v38  ;;  %v4589_v43 = vpack.c.bf16 %v1981_v30, %v1975_v21  ;;  %v5645_v62 = vunpack.i.h.bf16 %v5643_v47  ;;  %v5644_v56 = vunpack.i.l.bf16 %v5643_v47  ;;  %4312 = vmatmul.mubr.msk.f32.gmra.mrb[60].mxu0 %vm2056_vm10, %v8090_v34  ;;  %2582 = vmatmul.mubr.f32.gmra.mrb[62].mxu1 %v9507_v5  ;;  %v8113_v1 = vld [vmem:[%s6432_s24 + $0x178] sm:$0xff]  ;;  %v9510_v6 = vld [vmem:[#allocation44_spill] sm:$0xff] }
 0x19a   : > { %v9509_v7 = vunpack.i.h.bf16 %v9508_v46  ;;  %4652 = vmatpush1.bf16.msra.mxu0 %v8095_v10  ;;  %v1872_v38 = vsel %vm1854_vm8, %v5639_v26, %v5640_v8  ;;  %v9511_v30 = vunpack.i.h.bf16 %v9510_v6  ;;  %v5648_v24 = vpop.permute.xlu0 %5647  ;;  %2420 = vmatprep.mubr.f32.mxu0 %v9419_v17  ;;  %v9515_v6 = vld [vmem:[#allocation58_spill] sm:$0xff] }
 0x19b   : > { %4590 = vmatprep.subr.bf16.mxu1 %v4589_v43  ;;  %v1878_v27 = vsel %vm1854_vm8, %v5644_v56, %v5645_v62  ;;  %v5650_v5 = vunpack.i.h.bf16 %v5648_v24  ;;  %v5649_v43 = vunpack.i.l.bf16 %v5648_v24  ;;  %2652 = vmatprep.mubr.f32.mxu1 %v9419_v17  ;;  %v6060_v24 = vld [vmem:[%s6432_s24 + $0x8] sm:$0xff] }
 0x19c   : > { %v1871_v29 = vsel %vm1854_vm8, %v9509_v7, %v5639_v26  ;;  %v1877_v21 = vsel %vm1854_vm8, %v9511_v30, %v5644_v56  ;;  %4592 = vmatpush1.bf16.msra.mxu1 %v4591_v3  ;;  %v5653_v46 = vpop.permute.xlu1 %5652  ;;  %v8125_v8 = vpack.c.bf16 %v1878_v27, %v1872_v38  ;;  %v9512_v3 = vunpack.i.h.bf16 %v8005_v42  ;;  %v9513_v56 = vld [vmem:[#allocation57_spill] sm:$0xff] }
 0x19d   : > { %v8121_v47 = vpack.c.bf16 %v1877_v21, %v1871_v29  ;;  %4665 = vmatprep.subr.bf16.mxu1 %v7683_v40  ;;  %v5655_v26 = vunpack.i.h.bf16 %v5653_v46  ;;  %v5654_v7 = vunpack.i.l.bf16 %v5653_v46  ;;  %4313 = vmatmul.mubr.msk.f32.gmra.mrb[62].mxu0 %vm2056_vm10, %v8113_v1  ;;  %v1965_v62 = vsel %vm1959_vm9, %v5649_v43, %v5650_v5 }
 0x19e   : > { %v1964_v29 = vsel %vm1959_vm9, %v9512_v3, %v5649_v43  ;;  %4654 = vmatprep.subr.bf16.mxu0 %v8125_v8  ;;  %v9514_v40 = vunpack.i.h.bf16 %v8013_v36  ;;  %v5658_v30 = vpop.permute.xlu0 %5657  ;;  %2813 = vmatprep.mubr.f32.mxu0 %v6060_v24  ;;  %v6061_v43 = vld [vmem:[%s6432_s24] sm:$0xff] }
 0x19f   : > { %4314 = vmatmul.mubr.msk.f32.vlgmr.msra.gmra.mrb[32].mxu1 %vm2056_vm10, %v9513_v56  ;;  %4656 = vmatpush1.bf16.msra.mxu0 %v8121_v47  ;;  %v1971_v42 = vsel %vm1959_vm9, %v5654_v7, %v5655_v26  ;;  %v5660_v46 = vunpack.i.h.bf16 %v5658_v30  ;;  %v5659_v5 = vunpack.i.l.bf16 %v5658_v30 }
 0x1a0   : > { %v1970_v38 = vsel %vm1959_vm9, %v9514_v40, %v5654_v7  ;;  %4681 = vmatpush1.bf16.msra.mxu1 %v9515_v6  ;;  %2658 = vmatprep.mubr.f32.mxu1 %v9419_v17  ;;  %v4657_v27 = vpack.c.bf16 %v1971_v42, %v1965_v62  ;;  %v6063_v40 = vld [vmem:[%s6432_s24 + $0x18] sm:$0xff] }
 0x1a1   : > { %v4659_v21 = vpack.c.bf16 %v1970_v38, %v1964_v29  ;;  %4666 = vmatprep.subr.bf16.mxu1 %v7701_v31  ;;  %v5663_v36 = vpop.permute.xlu1 %5662  ;;  %v1977_v3 = vsel %vm1959_vm9, %v5659_v5, %v5660_v46  ;;  %v6062_v29 = vld [vmem:[%s6432_s24 + $0x20] sm:$0xff]  ;;  %v9516_v38 = vunpack.i.h.bf16 %v8061_v50  ;;  %v6064_v42 = vld [vmem:[%s6432_s24 + $0x38] sm:$0xff]  ;;  %v6065_v50 = vld [vmem:[%s6432_s24 + $0x30] sm:$0xff] }
 0x1a2   : > { %2814 = vmatmul.mubr.f32.vlgmr.msra.gmra.mrb[0].mxu0 %v6061_v43  ;;  %v5665_v26 = vunpack.i.h.bf16 %v5663_v36  ;;  %v5664_v7 = vunpack.i.l.bf16 %v5663_v36  ;;  %4658 = vmatprep.subr.bf16.mxu0 %v4657_v27  ;;  %v9524_v43 = vld [vmem:[#allocation36_spill] sm:$0xff] }
 0x1a3   : > { %4315 = vmatmul.mubr.msk.f32.gmra.mrb[34].mxu1 %vm2056_vm10, %v7717_v19  ;;  %4660 = vmatpush1.bf16.msra.mxu0 %v4659_v21 }
 0x1a4   : > { %4682 = vmatpush1.bf16.msra.mxu1 %v7719_v63  ;;  %v1983_v31 = vsel %vm1959_vm9, %v5664_v7, %v5665_v26  ;;  %2664 = vmatprep.mubr.f32.mxu1 %v9419_v17  ;;  %v1976_v63 = vsel %vm1959_vm9, %v9516_v38, %v5659_v5 }
 0x1a5   : > { %4667 = vmatprep.subr.bf16.mxu1 %v7733_v59  ;;  %2819 = vmatprep.mubr.f32.mxu0 %v6062_v29  ;;  %v4661_v62 = vpack.c.bf16 %v1983_v31, %v1977_v3  ;;  %v9517_v59 = vunpack.i.h.bf16 %v8073_v23  ;;  %v6074_v23 = vld [vmem:[%s6432_s24 + $0xb0] sm:$0xff] }
 0x1a6   : > { %2820 = vmatmul.mubr.f32.gmra.mrb[2].mxu0 %v6063_v40 }
 0x1a7   : > { %4316 = vmatmul.mubr.msk.f32.gmra.mrb[36].mxu1 %vm2056_vm10, %v7747_v33  ;;  %v1982_v6 = vsel %vm1959_vm9, %v9517_v59, %v5664_v7  ;;  %2825 = vmatprep.mubr.f32.mxu0 %v6064_v42  ;;  %v9525_v7 = vld [vmem:[#allocation38_spill] sm:$0xff] }
 0x1a8   : > { %4683 = vmatpush1.bf16.msra.mxu1 %v7751_v15  ;;  %2670 = vmatprep.mubr.f32.mxu1 %v9419_v17  ;;  %v4663_v30 = vpack.c.bf16 %v1982_v6, %v1976_v63  ;;  %v6066_v15 = vld [vmem:[%s6432_s24 + $0x50] sm:$0xff] }
 0x1a9   : > { %4668 = vmatprep.subr.bf16.mxu1 %v7763_v25  ;;  %4662 = vmatprep.subr.bf16.mxu0 %v4661_v62  ;;  %v6067_v25 = vld [vmem:[%s6432_s24 + $0x48] sm:$0xff]  ;;  %v9526_v6 = vld [vmem:[#allocation41_spill] sm:$0xff] }
 0x1aa   : > { %2826 = vmatmul.mubr.f32.gmra.mrb[4].mxu0 %v6065_v50 }
 0x1ab   : > { %4317 = vmatmul.mubr.msk.f32.gmra.mrb[38].mxu1 %vm2056_vm10, %v7777_v13  ;;  %2831 = vmatprep.mubr.f32.mxu0 %v6066_v15 }
 0x1ac   : > { %4684 = vmatpush1.bf16.msra.mxu1 %v7781_v48  ;;  %2676 = vmatprep.mubr.f32.mxu1 %v9419_v17  ;;  %v6068_v48 = vld [vmem:[%s6432_s24 + $0x68] sm:$0xff] }
 0x1ad   : > { %4669 = vmatprep.subr.bf16.mxu1 %v7793_v4  ;;  %4664 = vmatpush1.bf16.msra.mxu0 %v4663_v30  ;;  %v6069_v4 = vld [vmem:[%s6432_s24 + $0x60] sm:$0xff] }
 0x1ae   : > { %2832 = vmatmul.mubr.f32.gmra.mrb[6].mxu0 %v6067_v25  ;;  %v9527_v30 = vld [vmem:[#allocation43_spill] sm:$0xff] }
 0x1af   : > { %4318 = vmatmul.mubr.msk.f32.gmra.mrb[40].mxu1 %vm2056_vm10, %v7807_v37  ;;  %2837 = vmatprep.mubr.f32.mxu0 %v6068_v48 }
 0x1b0   : > { %4685 = vmatpush1.bf16.msra.mxu1 %v7811_v32  ;;  %2682 = vmatprep.mubr.f32.mxu1 %v9419_v17  ;;  %v6070_v32 = vld [vmem:[%s6432_s24 + $0x80] sm:$0xff] }
 0x1b1   : > { %4670 = vmatprep.subr.bf16.mxu1 %v7823_v52  ;;  %v6071_v52 = vld [vmem:[%s6432_s24 + $0x78] sm:$0xff] }
 0x1b2   : > { %2838 = vmatmul.mubr.f32.gmra.mrb[8].mxu0 %v6069_v4 }
 0x1b3   : > { %4319 = vmatmul.mubr.msk.f32.gmra.mrb[42].mxu1 %vm2056_vm10, %v7837_v45  ;;  %2843 = vmatprep.mubr.f32.mxu0 %v6070_v32 }
 0x1b4   : > { %4686 = vmatpush1.bf16.msra.mxu1 %v7841_v0  ;;  %2688 = vmatprep.mubr.f32.mxu1 %v9419_v17  ;;  %v6072_v0 = vld [vmem:[%s6432_s24 + $0x98] sm:$0xff] }
 0x1b5   : > { %4671 = vmatprep.subr.bf16.mxu1 %v7853_v2  ;;  %v6073_v2 = vld [vmem:[%s6432_s24 + $0x90] sm:$0xff] }
 0x1b6   : > { %2844 = vmatmul.mubr.f32.gmra.mrb[10].mxu0 %v6071_v52 }
 0x1b7   : > { %4320 = vmatmul.mubr.msk.f32.gmra.mrb[44].mxu1 %vm2056_vm10, %v7867_v14  ;;  %2849 = vmatprep.mubr.f32.mxu0 %v6072_v0 }
 0x1b8   : > { %4687 = vmatpush1.bf16.msra.mxu1 %v7871_v57  ;;  %2694 = vmatprep.mubr.f32.mxu1 %v9419_v17  ;;  %v6075_v57 = vld [vmem:[%s6432_s24 + $0xa8] sm:$0xff] }
 0x1b9   : > { %4672 = vmatprep.subr.bf16.mxu1 %v7883_v60  ;;  %v6080_v60 = vld [vmem:[%s6432_s24 + $0xf8] sm:$0xff] }
 0x1ba   : > { %2850 = vmatmul.mubr.f32.gmra.mrb[12].mxu0 %v6073_v2  ;;  %v9528_v2 = vld [vmem:[#allocation46_spill] sm:$0xff] }
 0x1bb   : > { %4321 = vmatmul.mubr.msk.f32.gmra.mrb[46].mxu1 %vm2056_vm10, %v7897_v11  ;;  %2855 = vmatprep.mubr.f32.mxu0 %v6074_v23 }
 0x1bc   : > { %4688 = vmatpush1.bf16.msra.mxu1 %v7901_v54  ;;  %2700 = vmatprep.mubr.f32.mxu1 %v9419_v17  ;;  %v6081_v54 = vld [vmem:[%s6432_s24 + $0xf0] sm:$0xff] }
 0x1bd   : > { %4673 = vmatprep.subr.bf16.mxu1 %v7913_v53  ;;  %v6083_v53 = vld [vmem:[%s6432_s24 + $0x108] sm:$0xff] }
 0x1be   : > { %2856 = vmatmul.mubr.f32.gmra.mrb[14].mxu0 %v6075_v57  ;;  %v9529_v57 = vld [vmem:[#allocation49_spill] sm:$0xff] }
 0x1bf   : > { %4322 = vmatmul.mubr.msk.f32.gmra.mrb[48].mxu1 %vm2056_vm10, %v7925_v49  ;;  %2974 = vmatprep.mubr.f32.mxu0 %v9419_v17 }
 0x1c0   : > { %4689 = vmatpush1.bf16.msra.mxu1 %v7927_v55  ;;  %2706 = vmatprep.mubr.f32.mxu1 %v9419_v17  ;;  %v6086_v55 = vld [vmem:[%s6432_s24 + $0x140] sm:$0xff] }
 0x1c1   : > { %4674 = vmatprep.subr.bf16.mxu1 %v7939_v22  ;;  %v6084_v22 = vld [vmem:[%s6432_s24 + $0x128] sm:$0xff] }
 0x1c2   : > { %4330 = vmatmul.mubr.msk.f32.vlgmr.msra.gmra.mrb[0].mxu0 %vm2056_vm10, %v9513_v56 }
 0x1c3   : > { %4323 = vmatmul.mubr.msk.f32.gmra.mrb[50].mxu1 %vm2056_vm10, %v7951_v16  ;;  %2980 = vmatprep.mubr.f32.mxu0 %v9419_v17 }
 0x1c4   : > { %4690 = vmatpush1.bf16.msra.mxu1 %v7953_v20  ;;  %2712 = vmatprep.mubr.f32.mxu1 %v9419_v17  ;;  %v6089_v20 = vld [vmem:[%s6432_s24 + $0x150] sm:$0xff] }
 0x1c5   : > { %4675 = vmatprep.subr.bf16.mxu1 %v7963_v18  ;;  %v6087_v18 = vld [vmem:[%s6432_s24 + $0x138] sm:$0xff] }
 0x1c6   : > { %4331 = vmatmul.mubr.msk.f32.gmra.mrb[2].mxu0 %vm2056_vm10, %v7717_v19  ;;  %v9518_v19 = vld [vmem:[#allocation27_spill] sm:$0xff] }
 0x1c7   : > { %4324 = vmatmul.mubr.msk.f32.gmra.mrb[52].mxu1 %vm2056_vm10, %v7973_v51  ;;  %2986 = vmatprep.mubr.f32.mxu0 %v9419_v17 }
 0x1c8   : > { %4691 = vmatpush1.bf16.msra.mxu1 %v7975_v39  ;;  %2718 = vmatprep.mubr.f32.mxu1 %v9419_v17  ;;  %v6091_v39 = vld [vmem:[%s6432_s24 + $0x168] sm:$0xff] }
 0x1c9   : > { %4676 = vmatprep.subr.bf16.mxu1 %v7988_v9  ;;  %v8305_v9 = vpop.permute.xlu0 %483 }
 0x1ca   : > { %4332 = vmatmul.mubr.msk.f32.gmra.mrb[4].mxu0 %vm2056_vm10, %v7747_v33  ;;  %v9519_v33 = vld [vmem:[#allocation23_spill] sm:$0xff] }
 0x1cb   : > { %4325 = vmatmul.mubr.msk.f32.gmra.mrb[54].mxu1 %vm2056_vm10, %v8001_v58  ;;  %2992 = vmatprep.mubr.f32.mxu0 %v9419_v17 }
 0x1cc   : > { %4692 = vmatpush1.bf16.msra.mxu1 %v8003_v41  ;;  %2724 = vmatprep.mubr.f32.mxu1 %v9419_v17  ;;  %v9520_v41 = vld [vmem:[#allocation28_spill] sm:$0xff] }
 0x1cd   : > { %4677 = vmatprep.subr.bf16.mxu1 %v8015_v12  ;;  %v9521_v12 = vld [vmem:[#allocation30_spill] sm:$0xff]  ;;  %v8323_v31 = vpop.permute.xlu0 %498 }
 0x1ce   : > { %4333 = vmatmul.mubr.msk.f32.gmra.mrb[6].mxu0 %vm2056_vm10, %v7777_v13  ;;  %v6076_v13 = vld [vmem:[%s6432_s24 + $0xc8] sm:$0xff]  ;;  %v714_v42 = vadd.f32 %v9526_v6, %v8323_v31  ;;  %v716_v50 = vadd.f32 %v9527_v30, %v8323_v31 }
 0x1cf   : > { %4326 = vmatmul.mubr.msk.f32.gmra.mrb[56].mxu1 %vm2056_vm10, %v8032_v61  ;;  %2998 = vmatprep.mubr.f32.mxu0 %v9419_v17 }
 0x1d0   : > { %4693 = vmatpush1.bf16.msra.mxu1 %v8009_v44  ;;  %2730 = vmatprep.mubr.f32.mxu1 %v9419_v17  ;;  %v696_v44 = vadd.f32 %v9520_v41, %v8305_v9 }
 0x1d1   : > { %4678 = vmatprep.subr.bf16.mxu1 %v8052_v28 }
 0x1d2   : > { %4334 = vmatmul.mubr.msk.f32.gmra.mrb[8].mxu0 %vm2056_vm10, %v7807_v37  ;;  %v6077_v37 = vld [vmem:[%s6432_s24 + $0xc0] sm:$0xff] }
 0x1d3   : > { %4327 = vmatmul.mubr.msk.f32.gmra.mrb[58].mxu1 %vm2056_vm10, %v9518_v19  ;;  %3004 = vmatprep.mubr.f32.mxu0 %v9419_v17 }
 0x1d4   : > { %4694 = vmatpush1.bf16.msra.mxu1 %v9519_v33  ;;  %2736 = vmatprep.mubr.f32.mxu1 %v9419_v17  ;;  %v8335_v33 = vpop.permute.xlu0 %508 }
 0x1d5   : > { %4679 = vmatprep.subr.bf16.mxu1 %v8082_v35 }
 0x1d6   : > { %4335 = vmatmul.mubr.msk.f32.gmra.mrb[10].mxu0 %vm2056_vm10, %v7837_v45  ;;  %v6078_v45 = vld [vmem:[%s6432_s24 + $0xe0] sm:$0xff] }
 0x1d7   : > { %4328 = vmatmul.mubr.msk.f32.gmra.mrb[60].mxu1 %vm2056_vm10, %v8090_v34  ;;  %3010 = vmatprep.mubr.f32.mxu0 %v9419_v17 }
 0x1d8   : > { %4695 = vmatpush1.bf16.msra.mxu1 %v8095_v10  ;;  %2742 = vmatprep.mubr.f32.mxu1 %v9419_v17  ;;  %v698_v10 = vadd.f32 %v9521_v12, %v8305_v9 }
 0x1d9   : > { %4680 = vmatprep.subr.bf16.mxu1 %v8125_v8  ;;  %v9523_v8 = vld [vmem:[#allocation34_spill] sm:$0xff] }
 0x1da   : > { %4336 = vmatmul.mubr.msk.f32.gmra.mrb[12].mxu0 %vm2056_vm10, %v7867_v14  ;;  %v6079_v14 = vld [vmem:[%s6432_s24 + $0xd8] sm:$0xff] }
 0x1db   : > { %4329 = vmatmul.mubr.msk.f32.gmra.mrb[62].mxu1 %vm2056_vm10, %v8113_v1  ;;  %3016 = vmatprep.mubr.f32.mxu0 %v9419_v17 }
 0x1dc   : > { %4696 = vmatpush1.bf16.msra.mxu1 %v8121_v47  ;;  %2861 = vmatprep.mubr.f32.mxu1 %v6076_v13 }
 0x1de   : > { %4337 = vmatmul.mubr.msk.f32.gmra.mrb[14].mxu0 %vm2056_vm10, %v7897_v11  ;;  %v6082_v11 = vld [vmem:[%s6432_s24 + $0x110] sm:$0xff] }
 0x1df   : > { %2862 = vmatmul.mubr.f32.vlgmr.msra.gmra.mrb[64].mxu1 %v6077_v37  ;;  %3022 = vmatprep.mubr.f32.mxu0 %v9419_v17 }
 0x1e0   : > { %2867 = vmatprep.mubr.f32.mxu1 %v6078_v45 }
 0x1e2   : > { %4338 = vmatmul.mubr.msk.f32.gmra.mrb[64].mxu0 %vm2056_vm10, %v7925_v49  ;;  %v6085_v49 = vld [vmem:[%s6432_s24 + $0x120] sm:$0xff] }
 0x1e3   : > { %2868 = vmatmul.mubr.f32.gmra.mrb[66].mxu1 %v6079_v14  ;;  %3028 = vmatprep.mubr.f32.mxu0 %v9419_v17 }
 0x1e4   : > { %2873 = vmatprep.mubr.f32.mxu1 %v6080_v60 }
 0x1e6   : > { %4339 = vmatmul.mubr.msk.f32.gmra.mrb[66].mxu0 %vm2056_vm10, %v7951_v16  ;;  %v6088_v16 = vld [vmem:[%s6432_s24 + $0x158] sm:$0xff] }
 0x1e7   : > { %2874 = vmatmul.mubr.f32.gmra.mrb[68].mxu1 %v6081_v54  ;;  %3034 = vmatprep.mubr.f32.mxu0 %v9419_v17 }
 0x1e8   : > { %2879 = vmatprep.mubr.f32.mxu1 %v6082_v11 }
 0x1ea   : > { %4340 = vmatmul.mubr.msk.f32.gmra.mrb[68].mxu0 %vm2056_vm10, %v7973_v51  ;;  %v6090_v51 = vld [vmem:[%s6432_s24 + $0x170] sm:$0xff] }
 0x1eb   : > { %2880 = vmatmul.mubr.f32.gmra.mrb[70].mxu1 %v6083_v53  ;;  %3040 = vmatprep.mubr.f32.mxu0 %v9419_v17 }
 0x1ec   : > { %2885 = vmatprep.mubr.f32.mxu1 %v6084_v22 }
 0x1ee   : > { %4341 = vmatmul.mubr.msk.f32.gmra.mrb[70].mxu0 %vm2056_vm10, %v8001_v58  ;;  %v8307_v58 = vpop.permute.xlu1 %488 }
 0x1ef   : > { %2886 = vmatmul.mubr.f32.gmra.mrb[72].mxu1 %v6085_v49  ;;  %3046 = vmatprep.mubr.f32.mxu0 %v9419_v17  ;;  %v9530_v49 = vld [vmem:[#allocation52_spill] sm:$0xff] }
 0x1f0   : > { %2891 = vmatprep.mubr.f32.mxu1 %v6086_v55  ;;  %v726_v55 = vadd.f32 %v9530_v49, %v8335_v33 }
 0x1f2   : > { %4342 = vmatmul.mubr.msk.f32.gmra.mrb[72].mxu0 %vm2056_vm10, %v8032_v61  ;;  %v8317_v56 = vpop.permute.xlu1 %493 }
 0x1f3   : > { %2892 = vmatmul.mubr.f32.gmra.mrb[74].mxu1 %v6087_v18  ;;  %3052 = vmatprep.mubr.f32.mxu0 %v9419_v17  ;;  %v708_v26 = vadd.f32 %v9524_v43, %v8317_v56  ;;  %v710_v3 = vadd.f32 %v9525_v7, %v8317_v56  ;;  %v9531_v18 = vld [vmem:[#allocation53_spill] sm:$0xff] }
 0x1f4   : > { %2897 = vmatprep.mubr.f32.mxu1 %v6088_v16  ;;  %v728_v16 = vadd.f32 %v9531_v18, %v8335_v33 }
 0x1f6   : > { %4343 = vmatmul.mubr.msk.f32.gmra.mrb[74].mxu0 %vm2056_vm10, %v9518_v19  ;;  %v8329_v15 = vpop.permute.xlu1 %503 }
 0x1f7   : > { %2898 = vmatmul.mubr.f32.gmra.mrb[76].mxu1 %v6089_v20  ;;  %3058 = vmatprep.mubr.f32.mxu0 %v9419_v17  ;;  %v720_v23 = vadd.f32 %v9528_v2, %v8329_v15  ;;  %v722_v19 = vadd.f32 %v9529_v57, %v8329_v15  ;;  %v9536_v2 = vld [vmem:[#allocation64_spill] sm:$0xff] }
 0x1f8   : > { %2903 = vmatprep.mubr.f32.mxu1 %v6090_v51 }
 0x1fa   : > { %4344 = vmatmul.mubr.msk.f32.gmra.mrb[76].mxu0 %vm2056_vm10, %v8090_v34  ;;  %v9522_v34 = vld [vmem:[#allocation32_spill] sm:$0xff]  ;;  %v8341_v20 = vpop.permute.xlu1 %513 }
 0x1fb   : > { %2904 = vmatmul.mubr.f32.gmra.mrb[78].mxu1 %v6091_v39  ;;  %3064 = vmatprep.mubr.f32.mxu0 %v9419_v17  ;;  %v702_v17 = vadd.f32 %v9522_v34, %v8307_v58  ;;  %v9532_v34 = vld [vmem:[#allocation54_spill] sm:$0xff] }
 0x1fe   : > { %4345 = vmatmul.mubr.msk.f32.gmra.mrb[78].mxu0 %vm2056_vm10, %v8113_v1  ;;  %v704_v1 = vadd.f32 %v9523_v8, %v8307_v58  ;;  %v9533_v8 = vld [vmem:[#allocation55_spill] sm:$0xff] }
 0x234   : > { %v2332_v61 = vpop.f32.mrb[32].mxu0 }
 0x235   : > { %v4698_v28 = vadd.f32 %v2332_v61, %v696_v44  ;;  %v2334_v35 = vpop.f32.mrb[33].mxu0 }
 0x236   : > { %v4700_v47 = vadd.f32 %v2334_v35, %v698_v10 }
 0x237   : > { %v4346_v21 = vmul.f32 -1.442695, %v4698_v28 }
 0x238   : > { %v2338_v24 = vpop.f32.mrb[34].mxu0  ;;  %v4347_v27 = vmul.f32 -1.442695, %v4700_v47 }
 0x239   : > { %v4702_v46 = vadd.f32 %v2338_v24, %v702_v17  ;;  %v2340_v5 = vpop.f32.mrb[35].mxu0  ;;  %5668 = vpow2.f32 %v4346_v21  ;;  %v732_v17 = vadd.f32 %v9532_v34, %v8341_v20  ;;  %v8347_v21 = vpop.permute.xlu0 %518 }
 0x23a   : > { %v4704_v36 = vadd.f32 %v2340_v5, %v704_v1  ;;  %5670 = vpow2.f32 %v4347_v27  ;;  %v734_v1 = vadd.f32 %v9533_v8, %v8341_v20 }
 0x23b   : > { %v4352_v29 = vmul.f32 -1.442695, %v4702_v46 }
 0x23c   : > { %v2344_v62 = vpop.f32.mrb[36].mxu0  ;;  %v4353_v40 = vmul.f32 -1.442695, %v4704_v36 }
 0x23d   : > { %v4706_v38 = vadd.f32 %v2344_v62, %v708_v26  ;;  %v2346_v63 = vpop.f32.mrb[37].mxu0  ;;  %5672 = vpow2.f32 %v4352_v29  ;;  %v9534_v62 = vld [vmem:[#allocation60_spill] sm:$0xff] }
 0x23e   : > { %v4708_v59 = vadd.f32 %v2346_v63, %v710_v3  ;;  %5674 = vpow2.f32 %v4353_v40  ;;  %v738_v40 = vadd.f32 %v9534_v62, %v8347_v21 }
 0x23f   : > { %v4358_v25 = vmul.f32 -1.442695, %v4706_v38  ;;  %v9535_v38 = vld [vmem:[#allocation61_spill] sm:$0xff] }
 0x240   : > { %v2350_v48 = vpop.f32.mrb[38].mxu0  ;;  %v4359_v4 = vmul.f32 -1.442695, %v4708_v59  ;;  %v740_v63 = vadd.f32 %v9535_v38, %v8347_v21  ;;  %v8353_v59 = vpop.permute.xlu1 %523 }
 0x241   : > { %v4710_v32 = vadd.f32 %v2350_v48, %v714_v42  ;;  %v2352_v52 = vpop.f32.mrb[39].mxu0  ;;  %5676 = vpow2.f32 %v4358_v25 }
 0x242   : > { %v4712_v0 = vadd.f32 %v2352_v52, %v716_v50  ;;  %5678 = vpow2.f32 %v4359_v4 }
 0x243   : > { %v4364_v13 = vmul.f32 -1.442695, %v4710_v32  ;;  %v5669_v54 = vpop.eup %5668 }
 0x244   : > { %v2356_v37 = vpop.f32.mrb[40].mxu0  ;;  %v4365_v45 = vmul.f32 -1.442695, %v4712_v0  ;;  %v5671_v53 = vpop.eup %5670  ;;  %v3383_v41 = vadd.f32 1.0, %v5669_v54 }
 0x245   : > { %v4714_v14 = vadd.f32 %v2356_v37, %v720_v23  ;;  %v2358_v60 = vpop.f32.mrb[41].mxu0  ;;  %5680 = vpow2.f32 %v4364_v13  ;;  %v3384_v61 = vadd.f32 1.0, %v5671_v53  ;;  %v744_v23 = vadd.f32 %v9536_v2, %v8353_v59  ;;  %v8359_v37 = vpop.permute.xlu0 %528 }
 0x246   : > { %v4716_v11 = vadd.f32 %v2358_v60, %v722_v19  ;;  %5682 = vpow2.f32 %v4365_v45  ;;  %v9537_v19 = vld [vmem:[#allocation65_spill] sm:$0xff] }
 0x247   : > { %v4370_v22 = vmul.f32 -1.442695, %v4714_v14  ;;  %v5673_v10 = vpop.eup %5672  ;;  %v746_v13 = vadd.f32 %v9537_v19, %v8353_v59 }
 0x248   : > { %v4371_v51 = vmul.f32 -1.442695, %v4716_v11  ;;  %v2362_v39 = vpop.f32.mrb[42].mxu0  ;;  %v5675_v35 = vpop.eup %5674  ;;  %v3389_v46 = vadd.f32 1.0, %v5673_v10 }
 0x249   : > { %v4718_v44 = vadd.f32 %v2362_v39, %v726_v55  ;;  %v2364_v12 = vpop.f32.mrb[43].mxu0  ;;  %5684 = vpow2.f32 %v4370_v22  ;;  %v3390_v26 = vadd.f32 1.0, %v5675_v35 }
 0x24a   : > { %v4720_v28 = vadd.f32 %v2364_v12, %v728_v16  ;;  %5686 = vpow2.f32 %v4371_v51  ;;  %v9538_v16 = vld [vmem:[#allocation68_spill] sm:$0xff]  ;;  %v8369_v12 = vpop.permute.xlu1 %533 }
 0x24b   : > { %v4376_v47 = vmul.f32 -1.442695, %v4718_v44  ;;  %5688 = vrcp.f32 %v3383_v41  ;;  %v5677_v43 = vpop.eup %5676  ;;  %v750_v51 = vadd.f32 %v9538_v16, %v8359_v37  ;;  %v9539_v41 = vld [vmem:[#allocation69_spill] sm:$0xff] }
 0x24c   : > { %v4377_v24 = vmul.f32 -1.442695, %v4720_v28  ;;  %v2368_v27 = vpop.f32.mrb[44].mxu0  ;;  %5690 = vrcp.f32 %v3384_v61  ;;  %v5679_v3 = vpop.eup %5678  ;;  %v3395_v30 = vadd.f32 1.0, %v5677_v43  ;;  %v752_v44 = vadd.f32 %v9539_v41, %v8359_v37  ;;  %v9541_v43 = vld [vmem:[#allocation73_spill] sm:$0xff] }
 0x24d   : > { %v4722_v5 = vadd.f32 %v2368_v27, %v732_v17  ;;  %v2370_v36 = vpop.f32.mrb[45].mxu0  ;;  %5692 = vpow2.f32 %v4376_v47  ;;  %v3396_v4 = vadd.f32 1.0, %v5679_v3 }
 0x24e   : > { %v4724_v7 = vadd.f32 %v2370_v36, %v734_v1  ;;  %5694 = vpow2.f32 %v4377_v24  ;;  %v8389_v2 = vpop.permute.xlu1 %543 }
 0x24f   : > { %v4382_v29 = vmul.f32 -1.442695, %v4722_v5  ;;  %5696 = vrcp.f32 %v3389_v46  ;;  %v5681_v48 = vpop.eup %5680  ;;  %v9540_v46 = vld [vmem:[#allocation72_spill] sm:$0xff] }
 0x250   : > { %v4383_v6 = vmul.f32 -1.442695, %v4724_v7  ;;  %v2374_v42 = vpop.f32.mrb[46].mxu0  ;;  %5698 = vrcp.f32 %v3390_v26  ;;  %v5683_v52 = vpop.eup %5682  ;;  %v3401_v60 = vadd.f32 1.0, %v5681_v48  ;;  %v756_v5 = vadd.f32 %v9540_v46, %v8369_v12  ;;  %v9542_v48 = vld [vmem:[#allocation76_spill] sm:$0xff] }
 0x251   : > { %v4726_v50 = vadd.f32 %v2374_v42, %v738_v40  ;;  %v2376_v25 = vpop.f32.mrb[47].mxu0  ;;  %5700 = vpow2.f32 %v4382_v29  ;;  %v3402_v22 = vadd.f32 1.0, %v5683_v52  ;;  %v758_v26 = vadd.f32 %v9541_v43, %v8369_v12  ;;  %v8379_v7 = vpop.permute.xlu0 %538  ;;  %v9543_v52 = vld [vmem:[#allocation77_spill] sm:$0xff] }
 0x252   : > { %v4728_v32 = vadd.f32 %v2376_v25, %v740_v63  ;;  %5702 = vpow2.f32 %v4383_v6  ;;  %v9547_v43 = vld [vmem:[#allocation85_spill] sm:$0xff] }
 0x253   : > { %v4388_v0 = vmul.f32 -1.442695, %v4726_v50  ;;  %v5685_v57 = vpop.eup %5684  ;;  %5704 = vrcp.f32 %v3395_v30 }
 0x254   : > { %v4389_v45 = vmul.f32 -1.442695, %v4728_v32  ;;  %v2380_v14 = vpop.f32.mrb[48].mxu0  ;;  %v5687_v53 = vpop.eup %5686  ;;  %5706 = vrcp.f32 %v3396_v4  ;;  %v3407_v18 = vadd.f32 1.0, %v5685_v57  ;;  %v762_v4 = vadd.f32 %v9542_v48, %v8379_v7 }
 0x255   : > { %v4730_v54 = vadd.f32 %v2380_v14, %v744_v23  ;;  %v2382_v11 = vpop.f32.mrb[49].mxu0  ;;  %v8361_v55 = vpop.eup %5688  ;;  %5708 = vpow2.f32 %v4388_v0  ;;  %v3408_v10 = vadd.f32 1.0, %v5687_v53  ;;  %v764_v0 = vadd.f32 %v9543_v52, %v8379_v7 }
 0x256   : > { %v4732_v49 = vadd.f32 %v2382_v11, %v746_v13  ;;  %v8365_v39 = vpop.eup %5690  ;;  %5710 = vpow2.f32 %v4389_v45 }
 0x257   : > { %v5693_v28 = vpop.eup %5692  ;;  %5712 = vrcp.f32 %v3401_v60  ;;  %v4394_v35 = vmul.f32 -1.442695, %v4730_v54 }
 0x258   : > { %v2386_v61 = vpop.f32.mrb[50].mxu0  ;;  %v5695_v17 = vpop.eup %5694  ;;  %5714 = vrcp.f32 %v3402_v22  ;;  %v4395_v8 = vmul.f32 -1.442695, %v4732_v49  ;;  %v3413_v3 = vadd.f32 1.0, %v5693_v28  ;;  %v9544_v49 = vld [vmem:[#allocation80_spill] sm:$0xff] }
 0x259   : > { %v4734_v47 = vadd.f32 %v2386_v61, %v750_v51  ;;  %v2388_v34 = vpop.f32.mrb[51].mxu0  ;;  %v8371_v24 = vpop.eup %5696  ;;  %5716 = vrcp.f32 %v3407_v18  ;;  %v3414_v40 = vadd.f32 1.0, %v5695_v17  ;;  %v768_v18 = vadd.f32 %v9544_v49, %v8389_v2  ;;  %v9545_v51 = vld [vmem:[#allocation81_spill] sm:$0xff] }
 0x25a   : > { %v4736_v1 = vadd.f32 %v2388_v34, %v752_v44  ;;  %v8375_v36 = vpop.eup %5698  ;;  %5718 = vrcp.f32 %v3408_v10  ;;  %v770_v41 = vadd.f32 %v9545_v51, %v8389_v2  ;;  %v8399_v44 = vpop.permute.xlu0 %548  ;;  %v9550_v51 = vld [vmem:[#allocation90_spill] sm:$0xff] }
 0x25b   : > { %v4400_v27 = vmul.f32 -1.442695, %v4734_v47  ;;  %v5701_v62 = vpop.eup %5700  ;;  %5720 = vpow2.f32 %v4394_v35 }
 0x25c   : > { %v2392_v29 = vpop.f32.mrb[52].mxu0  ;;  %v5703_v6 = vpop.eup %5702  ;;  %5722 = vpow2.f32 %v4395_v8  ;;  %v4401_v42 = vmul.f32 -1.442695, %v4736_v1  ;;  %v3419_v23 = vadd.f32 1.0, %v5701_v62 }
 0x25d   : > { %v4738_v38 = vadd.f32 %v2392_v29, %v756_v5  ;;  %v2394_v63 = vpop.f32.mrb[53].mxu0  ;;  %v8381_v50 = vpop.eup %5704  ;;  %5724 = vpow2.f32 %v4400_v27  ;;  %v3420_v13 = vadd.f32 1.0, %v5703_v6  ;;  %v9546_v27 = vld [vmem:[#allocation84_spill] sm:$0xff] }
 0x25e   : > { %v4740_v30 = vadd.f32 %v2394_v63, %v758_v26  ;;  %v8385_v32 = vpop.eup %5706  ;;  %5726 = vrcp.f32 %v3413_v3  ;;  %v774_v46 = vadd.f32 %v9546_v27, %v8399_v44  ;;  %v776_v26 = vadd.f32 %v9547_v43, %v8399_v44  ;;  %v8409_v3 = vpop.permute.xlu1 %553  ;;  %v3623_v43 = vld [vmem:[#allocation3] sm:$0xff] }
 0x25f   : > { %v4406_v25 = vmul.f32 -1.442695, %v4738_v38  ;;  %v5709_v19 = vpop.eup %5708  ;;  %5728 = vrcp.f32 %v3414_v40 }
 0x260   : > { %v2398_v57 = vpop.f32.mrb[54].mxu0  ;;  %v5711_v60 = vpop.eup %5710  ;;  %5730 = vpow2.f32 %v4401_v42  ;;  %v4407_v54 = vmul.f32 -1.442695, %v4740_v30  ;;  %v3425_v22 = vadd.f32 1.0, %v5709_v19 }
 0x261   : > { %v4742_v45 = vadd.f32 %v2398_v57, %v762_v4  ;;  %v2400_v14 = vpop.f32.mrb[55].mxu0  ;;  %v8391_v53 = vpop.eup %5712  ;;  %5732 = vpow2.f32 %v4406_v25  ;;  %v3426_v10 = vadd.f32 1.0, %v5711_v60  ;;  %v9548_v4 = vld [vmem:[#allocation88_spill] sm:$0xff] }
 0x262   : > { %v4744_v11 = vadd.f32 %v2400_v14, %v764_v0  ;;  %v8395_v16 = vpop.eup %5714  ;;  %5734 = vrcp.f32 %v3419_v23  ;;  %v780_v52 = vadd.f32 %v9548_v4, %v8409_v3  ;;  %v9549_v23 = vld [vmem:[#allocation89_spill] sm:$0xff]  ;;  %v8419_v19 = vpop.permute.xlu0 %558 }
 0x263   : > { %v8401_v28 = vpop.eup %5716  ;;  %5736 = vrcp.f32 %v3420_v13  ;;  %v4412_v35 = vmul.f32 -1.442695, %v4742_v45  ;;  %v782_v57 = vadd.f32 %v9549_v23, %v8409_v3  ;;  %v3629_v4 = vld [vmem:[#allocation3 + $0x30] sm:$0xff] }
 0x264   : > { %v2404_v61 = vpop.f32.mrb[56].mxu0  ;;  %v8403_v17 = vpop.eup %5718  ;;  %5738 = vpow2.f32 %v4407_v54  ;;  %v4413_v29 = vmul.f32 -1.442695, %v4744_v11 }
 0x265   : > { %v4746_v47 = vadd.f32 %v2404_v61, %v768_v18  ;;  %v2406_v34 = vpop.f32.mrb[57].mxu0  ;;  %v5721_v1 = vpop.eup %5720  ;;  %5740 = vrcp.f32 %v3425_v22  ;;  %v9551_v61 = vld [vmem:[#allocation91_spill] sm:$0xff] }
 0x266   : > { %v4748_v8 = vadd.f32 %v2406_v34, %v770_v41  ;;  %v5723_v5 = vpop.eup %5722  ;;  %5742 = vrcp.f32 %v3426_v10  ;;  %v3431_v42 = vadd.f32 1.0, %v5721_v1  ;;  %v786_v41 = vadd.f32 %v9550_v51, %v8419_v19 }
 0x267   : > { %v5725_v40 = vpop.eup %5724  ;;  %5744 = vpow2.f32 %v4412_v35  ;;  %v3432_v48 = vadd.f32 1.0, %v5723_v5  ;;  %v788_v35 = vadd.f32 %v9551_v61, %v8419_v19 }
 0x268   : > { %v2410_v62 = vpop.f32.mrb[58].mxu0  ;;  %v8411_v6 = vpop.eup %5726  ;;  %5746 = vtanh.f32 %v4746_v47  ;;  %v3437_v13 = vadd.f32 1.0, %v5725_v40  ;;  %v3624_v40 = vld [vmem:[#allocation3 + $0x8] sm:$0xff] }
 0x269   : > { %v4750_v38 = vadd.f32 %v2410_v62, %v774_v46  ;;  %v2412_v63 = vpop.f32.mrb[59].mxu0  ;;  %v8413_v25 = vpop.eup %5728  ;;  %5748 = vtanh.f32 %v4748_v8 }
 0x26a   : > { %v4752_v30 = vadd.f32 %v2412_v63, %v776_v26  ;;  %v5731_v0 = vpop.eup %5730  ;;  %5750 = vpow2.f32 %v4413_v29 }
 0x26b   : > { %v5733_v14 = vpop.eup %5732  ;;  %5752 = vtanh.f32 %v4750_v38  ;;  %v3438_v18 = vadd.f32 1.0, %v5731_v0 }
 0x26c   : > { %v2416_v45 = vpop.f32.mrb[60].mxu0  ;;  %v8421_v11 = vpop.eup %5734  ;;  %5754 = vrcp.f32 %v3431_v42  ;;  %v3443_v47 = vadd.f32 1.0, %v5733_v14 }
 0x26d   : > { %v4754_v60 = vadd.f32 %v2416_v45, %v780_v52  ;;  %v2418_v54 = vpop.f32.mrb[61].mxu0  ;;  %v8423_v49 = vpop.eup %5736  ;;  %5756 = vrcp.f32 %v3432_v48 }
 0x26e   : > { %v4756_v22 = vadd.f32 %v2418_v54, %v782_v57  ;;  %v5739_v10 = vpop.eup %5738  ;;  %5758 = vrcp.f32 %v3437_v13  ;;  %v3648_v57 = vmul.f32 %v8403_v17, %v3624_v40 }
 0x26f   : > { %v8429_v8 = vpop.eup %5740  ;;  %5760 = vtanh.f32 %v4752_v30  ;;  %v3444_v38 = vadd.f32 1.0, %v5739_v10  ;;  %v3647_v30 = vmul.f32 %v8401_v28, %v3623_v43 }
 0x270   : > { %v2422_v34 = vpop.f32.mrb[62].mxu0  ;;  %v8431_v5 = vpop.eup %5742  ;;  %5762 = vtanh.f32 %v4754_v60 }
 0x271   : > { %v4758_v1 = vadd.f32 %v2422_v34, %v786_v41  ;;  %v2424_v46 = vpop.f32.mrb[63].mxu0  ;;  %v5745_v62 = vpop.eup %5744  ;;  %5764 = vrcp.f32 %v3438_v18  ;;  %v3630_v41 = vld [vmem:[#allocation3 + $0x38] sm:$0xff] }
 0x272   : > { %v2654_v27 = vpop.f32.mrb[32].mxu1  ;;  %v4760_v26 = vadd.f32 %v2424_v46, %v788_v35  ;;  %v5747_v42 = vpop.eup %5746  ;;  %5766 = vrcp.f32 %v3443_v47  ;;  %v3449_v10 = vadd.f32 1.0, %v5745_v62  ;;  %v3635_v47 = vld [vmem:[#allocation3 + $0x60] sm:$0xff] }
 0x273   : > { %v2656_v29 = vpop.f32.mrb[33].mxu1  ;;  %v4761_v63 = vadd.f32 %v2654_v27, %v8305_v9  ;;  %v5749_v48 = vpop.eup %5748  ;;  %v3671_v52 = vmul.f32 %v5747_v42, %v8361_v55  ;;  %5768 = vtanh.f32 %v4756_v22  ;;  %v3653_v55 = vmul.f32 %v8411_v6, %v3629_v4 }
 0x274   : > { %v5751_v23 = vpop.eup %5750  ;;  %v3672_v13 = vmul.f32 %v5749_v48, %v8365_v39  ;;  %5770 = vtanh.f32 %v4758_v1  ;;  %v4762_v45 = vadd.f32 %v2656_v29, %v8305_v9  ;;  %v3659_v40 = vmul.f32 %v8421_v11, %v3635_v47 }
 0x275   : > { %v5753_v60 = vpop.eup %5752  ;;  %5772 = vrcp.f32 %v3444_v38  ;;  %v8439_v54 = vadd.f32 %v3671_v52, %v3647_v30  ;;  %v4348_v18 = vmul.f32 -1.442695, %v4761_v63  ;;  %v3636_v38 = vld [vmem:[#allocation3 + $0x68] sm:$0xff]  ;;  %v3641_v30 = vld [vmem:[#allocation3 + $0x90] sm:$0xff]  ;;  %v3450_v4 = vadd.f32 1.0, %v5751_v23 }
 0x276   : > { %v2660_v0 = vpop.f32.mrb[34].mxu1  ;;  %v8442_v51 = vpop.eup %5754  ;;  %v8445_v22 = vadd.f32 %v3672_v13, %v3648_v57  ;;  %v3677_v17 = vmul.f32 %v5753_v60, %v8371_v24  ;;  %5774 = vtanh.f32 %v4760_v26  ;;  %v4349_v24 = vmul.f32 -1.442695, %v4762_v45  ;;  %v3642_v57 = vld [vmem:[#allocation3 + $0x98] sm:$0xff] }
 0x277   : > { %v2662_v14 = vpop.f32.mrb[35].mxu1  ;;  %9552 = vst [vmem:[#allocation24_spill] sm:$0xff] %v8439_v54  ;;  %v4763_v28 = vadd.f32 %v2660_v0, %v8307_v58  ;;  %v8448_v39 = vpop.eup %5756  ;;  %5776 = vtanh.f32 %v8439_v54  ;;  %3767 = vst [vmem:[#allocation3] sm:$0xff] %v8439_v54  ;;  %v3654_v26 = vmul.f32 %v8413_v25, %v3630_v41  ;;  %v3665_v60 = vmul.f32 %v8429_v8, %v3641_v30 }
 0x278   : > { %9553 = vst [vmem:[#allocation25_spill] sm:$0xff] %v8445_v22  ;;  %v8452_v35 = vpop.eup %5758  ;;  %5778 = vtanh.f32 %v8445_v22  ;;  %3768 = vst [vmem:[#allocation3 + $0x8] sm:$0xff] %v8445_v22  ;;  %v8456_v6 = vadd.f32 %v3677_v17, %v3653_v55  ;;  %v4764_v46 = vadd.f32 %v2662_v14, %v8307_v58  ;;  %v3666_v17 = vmul.f32 %v8431_v5, %v3642_v57 }
 0x279   : > { %v5761_v1 = vpop.eup %5760  ;;  %5780 = vpow2.f32 %v4348_v18  ;;  %v4354_v27 = vmul.f32 -1.442695, %v4763_v28 }
 0x27a   : > { %v2666_v61 = vpop.f32.mrb[36].mxu1  ;;  %9554 = vst [vmem:[#allocation26_spill] sm:$0xff] %v8456_v6  ;;  %v5763_v43 = vpop.eup %5762  ;;  %5782 = vtanh.f32 %v8456_v6  ;;  %3773 = vst [vmem:[#allocation3 + $0x30] sm:$0xff] %v8456_v6  ;;  %v3678_v29 = vmul.f32 %v5761_v1, %v8375_v36  ;;  %v4355_v11 = vmul.f32 -1.442695, %v4764_v46 }
 0x27b   : > { %v2668_v34 = vpop.f32.mrb[37].mxu1  ;;  %v8463_v62 = vpop.eup %5764  ;;  %5784 = vrcp.f32 %v3449_v10  ;;  %v3683_v63 = vmul.f32 %v5763_v43, %v8381_v50  ;;  %v4765_v52 = vadd.f32 %v2666_v61, %v8317_v56  ;;  %v3660_v50 = vmul.f32 %v8423_v49, %v3636_v38 }
 0x27c   : > { %v8467_v48 = vpop.eup %5766  ;;  %v8469_v25 = vadd.f32 %v3678_v29, %v3654_v26  ;;  %5786 = vpow2.f32 %v4349_v24  ;;  %v4766_v28 = vadd.f32 %v2668_v34, %v8317_v56 }
 0x27d   : > { %v5769_v36 = vpop.eup %5768  ;;  %v8472_v13 = vadd.f32 %v3683_v63, %v3659_v40  ;;  %5788 = vpow2.f32 %v4354_v27 }
 0x27e   : > { %v2672_v42 = vpop.f32.mrb[38].mxu1  ;;  %9555 = vst [vmem:[#allocation29_spill] sm:$0xff] %v8469_v25  ;;  %v5771_v45 = vpop.eup %5770  ;;  %5790 = vtanh.f32 %v8469_v25  ;;  %3774 = vst [vmem:[#allocation3 + $0x38] sm:$0xff] %v8469_v25  ;;  %v3684_v23 = vmul.f32 %v5769_v36, %v8385_v32  ;;  %v4360_v32 = vmul.f32 -1.442695, %v4765_v52 }
 0x27f   : > { %v2674_v0 = vpop.f32.mrb[39].mxu1  ;;  %9556 = vst [vmem:[#allocation37_spill] sm:$0xff] %v8472_v13  ;;  %v8478_v14 = vpop.eup %5772  ;;  %5792 = vtanh.f32 %v8472_v13  ;;  %3779 = vst [vmem:[#allocation3 + $0x60] sm:$0xff] %v8472_v13  ;;  %v3689_v18 = vmul.f32 %v5771_v45, %v8391_v53  ;;  %v4767_v24 = vadd.f32 %v2672_v42, %v8323_v31  ;;  %v3791_v53 = vld [vmem:[%s9243_s4] sm:$0xff]  ;;  %v4361_v43 = vmul.f32 -1.442695, %v4766_v28 }
 0x280   : > { %v5775_v49 = vpop.eup %5774  ;;  %5794 = vrcp.f32 %v3450_v4  ;;  %v8486_v41 = vadd.f32 %v3684_v23, %v3660_v50  ;;  %v4768_v5 = vadd.f32 %v2674_v0, %v8323_v31 }
 0x281   : > { %v5777_v61 = vpop.eup %5776  ;;  %v8488_v47 = vadd.f32 %v3689_v18, %v3665_v60  ;;  %v3690_v8 = vmul.f32 %v5775_v49, %v8395_v16  ;;  %5796 = vpow2.f32 %v4355_v11  ;;  %v3792_v16 = vld [vmem:[%s9243_s4 + $0x8] sm:$0xff]  ;;  %v4366_v30 = vmul.f32 -1.442695, %v4767_v24 }
 0x282   : > { %v2678_v55 = vpop.f32.mrb[40].mxu1  ;;  %9557 = vst [vmem:[#allocation35_spill] sm:$0xff] %v8486_v41  ;;  %v5779_v34 = vpop.eup %5778  ;;  %5798 = vtanh.f32 %v8486_v41  ;;  %3780 = vst [vmem:[#allocation3 + $0x68] sm:$0xff] %v8486_v41  ;;  %v3743_v1 = vmul.f32 %v5777_v61, %v8442_v51  ;;  %v4367_v0 = vmul.f32 -1.442695, %v4768_v5 }
 0x283   : > { %v2680_v10 = vpop.f32.mrb[41].mxu1  ;;  %9558 = vst [vmem:[#allocation39_spill] sm:$0xff] %v8488_v47  ;;  %v5781_v27 = vpop.eup %5780  ;;  %5800 = vtanh.f32 %v8488_v47  ;;  %3785 = vst [vmem:[#allocation3 + $0x90] sm:$0xff] %v8488_v47  ;;  %v8504_v46 = vadd.f32 %v3690_v8, %v3666_v17  ;;  %v3744_v29 = vmul.f32 %v5779_v34, %v8448_v39  ;;  %v4769_v51 = vadd.f32 %v2678_v55, %v8329_v15 }
 0x284   : > { %v5783_v40 = vpop.eup %5782  ;;  %5802 = vpow2.f32 %v4360_v32  ;;  %v3815_v63 = vmul.f32 %v3791_v53, %v3743_v1  ;;  %3996 = vst [vmem:[%s6444_s11] sm:$0xff] %v3743_v1  ;;  %v4770_v36 = vadd.f32 %v2680_v10, %v8329_v15  ;;  %v3385_v11 = vadd.f32 1.0, %v5781_v27 }
 0x285   : > { %9559 = vst [vmem:[#allocation31_spill] sm:$0xff] %v8504_v46  ;;  %v5785_v42 = vpop.eup %5784  ;;  %5804 = vtanh.f32 %v8504_v46  ;;  %3786 = vst [vmem:[#allocation3 + $0x98] sm:$0xff] %v8504_v46  ;;  %v3816_v4 = vmul.f32 %v3792_v16, %v3744_v29  ;;  %v8513_v52 = vmul.f32 %v5783_v40, %v8452_v35  ;;  %v4372_v23 = vmul.f32 -1.442695, %v4769_v51 }
 0x286   : > { %v2684_v26 = vpop.f32.mrb[42].mxu1  ;;  %3997 = vst [vmem:[%s6444_s11 + $0x8] sm:$0xff] %v3744_v29  ;;  %v5787_v39 = vpop.eup %5786  ;;  %3863 = vrot.lane.b32.xlu1 %v3815_v63, %s6255_s16  ;;  %5806 = vpow2.f32 %v4361_v43  ;;  %v4373_v32 = vmul.f32 -1.442695, %v4770_v36 }
 0x287   : > { %v2686_v38 = vpop.f32.mrb[43].mxu1  ;;  %v5789_v57 = vpop.eup %5788  ;;  %3865 = vrot.lane.b32.xlu0 %v3816_v4, %s6255_s16  ;;  %4002 = vst [vmem:[%s6444_s11 + $0x30] sm:$0xff] %v8513_v52  ;;  %v4771_v35 = vadd.f32 %v2684_v26, %v8335_v33  ;;  %v3386_v28 = vadd.f32 1.0, %v5787_v39  ;;  %5808 = vpow2.f32 %v4366_v30 }
 0x288   : > { %v5791_v50 = vpop.eup %5790  ;;  %v4772_v55 = vadd.f32 %v2686_v38, %v8335_v33  ;;  %5810 = vpow2.f32 %v4367_v0  ;;  %v3391_v8 = vadd.f32 1.0, %v5789_v57 }
 0x289   : > { %v5793_v18 = vpop.eup %5792  ;;  %v8523_v49 = vmul.f32 %v5791_v50, %v8463_v62  ;;  %5812 = vrcp.f32 %v3385_v11  ;;  %v4378_v5 = vmul.f32 -1.442695, %v4771_v35 }
 0x28a   : > { %v2690_v45 = vpop.f32.mrb[44].mxu1  ;;  %v5795_v17 = vpop.eup %5794  ;;  %v8526_v10 = vmul.f32 %v5793_v18, %v8467_v48  ;;  %5814 = vpow2.f32 %v4372_v23  ;;  %v4379_v48 = vmul.f32 -1.442695, %v4772_v55 }
 0x28b   : > { %v2692_v60 = vpop.f32.mrb[45].mxu1  ;;  %9560 = vst [vmem:[#allocation33_spill] sm:$0xff] %v8523_v49  ;;  %v5797_v61 = vpop.eup %5796  ;;  %v4773_v24 = vadd.f32 %v2690_v45, %v8341_v20  ;;  %4003 = vst [vmem:[%s6444_s11 + $0x38] sm:$0xff] %v8523_v49  ;;  %5816 = vrcp.f32 %v3386_v28 }
 0x28c   : > { %9561 = vst [vmem:[#allocation40_spill] sm:$0xff] %v8526_v10  ;;  %v5799_v34 = vpop.eup %5798  ;;  %v4774_v62 = vadd.f32 %v2692_v60, %v8341_v20  ;;  %4008 = vst [vmem:[%s6444_s11 + $0x60] sm:$0xff] %v8526_v10  ;;  %v3392_v29 = vadd.f32 1.0, %v5797_v61  ;;  %5818 = vpow2.f32 %v4373_v32 }
 0x28d   : > { %v5801_v16 = vpop.eup %5800  ;;  %v8536_v43 = vmul.f32 %v5799_v34, %v8478_v14  ;;  %5820 = vrcp.f32 %v3391_v8  ;;  %v4384_v38 = vmul.f32 -1.442695, %v4773_v24 }
 0x28e   : > { %v2696_v53 = vpop.f32.mrb[46].mxu1  ;;  %v5803_v26 = vpop.eup %5802  ;;  %v8538_v40 = vmul.f32 %v5801_v16, %v5785_v42  ;;  %5822 = vpow2.f32 %v4378_v5  ;;  %v4385_v4 = vmul.f32 -1.442695, %v4774_v62 }
 0x28f   : > { %v2698_v1 = vpop.f32.mrb[47].mxu1  ;;  %v4775_v27 = vadd.f32 %v2696_v53, %v8347_v21  ;;  %9562 = vst [vmem:[#allocation45_spill] sm:$0xff] %v8536_v43  ;;  %v5805_v51 = vpop.eup %5804  ;;  %4009 = vst [vmem:[%s6444_s11 + $0x68] sm:$0xff] %v8536_v43  ;;  %5824 = vpow2.f32 %v4379_v48  ;;  %v3397_v57 = vadd.f32 1.0, %v5803_v26 }
 0x290   : > { %9563 = vst [vmem:[#allocation47_spill] sm:$0xff] %v8538_v40  ;;  %v4776_v63 = vadd.f32 %v2698_v1, %v8347_v21  ;;  %4014 = vst [vmem:[%s6444_s11 + $0x90] sm:$0xff] %v8538_v40  ;;  %v8545_v14 = vmul.f32 %v5805_v51, %v5795_v17  ;;  %v5807_v0 = vpop.eup %5806  ;;  %5826 = vrcp.f32 %v3392_v29 }
 0x291   : > { %v4390_v42 = vmul.f32 -1.442695, %v4775_v27  ;;  %v5809_v11 = vpop.eup %5808  ;;  %5828 = vpow2.f32 %v4384_v38  ;;  %v3398_v60 = vadd.f32 1.0, %v5807_v0 }
 0x292   : > { %v2702_v30 = vpop.f32.mrb[48].mxu1  ;;  %9564 = vst [vmem:[#allocation50_spill] sm:$0xff] %v8545_v14  ;;  %4015 = vst [vmem:[%s6444_s11 + $0x98] sm:$0xff] %v8545_v14  ;;  %v4391_v45 = vmul.f32 -1.442695, %v4776_v63  ;;  %v5811_v35 = vpop.eup %5810  ;;  %5830 = vpow2.f32 %v4385_v4  ;;  %v3403_v8 = vadd.f32 1.0, %v5809_v11 }
 0x293   : > { %v2704_v39 = vpop.f32.mrb[49].mxu1  ;;  %v4777_v36 = vadd.f32 %v2702_v30, %v8353_v59  ;;  %v8551_v17 = vpop.eup %5812  ;;  %5832 = vpow2.f32 %v4390_v42  ;;  %v3404_v34 = vadd.f32 1.0, %v5811_v35  ;;  %v9573_v14 = vld [vmem:[#allocation59_spill] sm:$0xff] }
 0x294   : > { %v4778_v18 = vadd.f32 %v2704_v39, %v8353_v59  ;;  %v5815_v61 = vpop.eup %5814  ;;  %5834 = vrcp.f32 %v3397_v57  ;;  %v1068_v40 = vadd.f32 %v9573_v14, %v8353_v59  ;;  %v9577_v14 = vld [vmem:[#allocation63_spill] sm:$0xff] }
 0x295   : > { %v2976_v23 = vpop.f32.mrb[0].mxu0  ;;  %v4396_v32 = vmul.f32 -1.442695, %v4777_v36  ;;  %v8554_v53 = vpop.eup %5816  ;;  %5836 = vpow2.f32 %v4391_v45  ;;  %v3409_v29 = vadd.f32 1.0, %v5815_v61 }
 0x296   : > { %v2708_v50 = vpop.f32.mrb[50].mxu1  ;;  %v2978_v55 = vpop.f32.mrb[1].mxu0  ;;  %5838 = vrcp.f32 %v3398_v60  ;;  %v4397_v1 = vmul.f32 -1.442695, %v4778_v18  ;;  %v4793_v16 = vadd.f32 %v2976_v23, %v8305_v9 }
 0x297   : > { %v2710_v28 = vpop.f32.mrb[51].mxu1  ;;  %v4779_v24 = vadd.f32 %v2708_v50, %v8359_v37  ;;  %v5819_v62 = vpop.eup %5818  ;;  %5840 = vpow2.f32 %v4396_v32  ;;  %v4794_v32 = vadd.f32 %v2978_v55, %v8305_v9 }
 0x298   : > { %v8557_v26 = vpop.eup %5820  ;;  %5842 = vrcp.f32 %v3403_v8  ;;  %v3410_v4 = vadd.f32 1.0, %v5819_v62  ;;  %v4780_v39 = vadd.f32 %v2710_v28, %v8359_v37  ;;  %v4350_v36 = vmul.f32 -1.442695, %v4793_v16 }
 0x299   : > { %v2982_v48 = vpop.f32.mrb[2].mxu0  ;;  %v5823_v38 = vpop.eup %5822  ;;  %v4402_v63 = vmul.f32 -1.442695, %v4779_v24  ;;  %5844 = vrcp.f32 %v3404_v34 }
 0x29a   : > { %v2714_v5 = vpop.f32.mrb[52].mxu1  ;;  %v2984_v51 = vpop.f32.mrb[3].mxu0  ;;  %5846 = vpow2.f32 %v4397_v1  ;;  %v3415_v50 = vadd.f32 1.0, %v5823_v38  ;;  %v4403_v28 = vmul.f32 -1.442695, %v4780_v39 }
 0x29b   : > { %v2716_v27 = vpop.f32.mrb[53].mxu1  ;;  %v5825_v30 = vpop.eup %5824  ;;  %5848 = vrcp.f32 %v3409_v29  ;;  %v4781_v38 = vadd.f32 %v2714_v5, %v8369_v12 }
 0x29c   : > { %v8560_v42 = vpop.eup %5826  ;;  %v3416_v60 = vadd.f32 1.0, %v5825_v30  ;;  %5850 = vpow2.f32 %v4402_v63  ;;  %v4351_v30 = vmul.f32 -1.442695, %v4794_v32  ;;  %v4796_v32 = vadd.f32 %v2984_v51, %v8307_v58 }
 0x29d   : > { %9565 = vst [vmem:[#allocation48_spill] sm:$0xff] %v8560_v42  ;;  %v8562_v57 = vpop.f32.mrb[4].mxu0  ;;  %v5829_v45 = vpop.eup %5828  ;;  %5852 = vrcp.f32 %v3410_v4  ;;  %v4795_v4 = vadd.f32 %v2982_v48, %v8307_v58  ;;  %v9591_v42 = vld [vmem:[#allocation82_spill] sm:$0xff] }
 0x29e   : > { %v2720_v0 = vpop.f32.mrb[54].mxu1  ;;  %v8566_v23 = vpop.f32.mrb[5].mxu0  ;;  %v3421_v34 = vadd.f32 1.0, %v5829_v45  ;;  %5854 = vpow2.f32 %v4350_v36 }
 0x29f   : > { %v8564_v11 = vpop.f32.mrb[55].mxu1  ;;  %v5831_v35 = vpop.eup %5830  ;;  %5856 = vrcp.f32 %v3415_v50  ;;  %v4783_v25 = vadd.f32 %v2720_v0, %v8379_v7 }
 0x2a0   : > { %v5833_v18 = vpop.eup %5832  ;;  %v3422_v29 = vadd.f32 1.0, %v5831_v35  ;;  %5858 = vrcp.f32 %v3416_v60  ;;  %v4782_v35 = vadd.f32 %v2716_v27, %v8369_v12 }
 0x2a1   : > { %v8571_v8 = vpop.f32.mrb[6].mxu0  ;;  %v8573_v24 = vpop.eup %5834  ;;  %v3427_v9 = vadd.f32 1.0, %v5833_v18  ;;  %5860 = vpow2.f32 %v4403_v28  ;;  %v4408_v18 = vmul.f32 -1.442695, %v4781_v38  ;;  %v4414_v22 = vmul.f32 -1.442695, %v4783_v25 }
 0x2a2   : > { %v8569_v61 = vpop.f32.mrb[56].mxu1  ;;  %9566 = vst [vmem:[#allocation51_spill] sm:$0xff] %v8573_v24  ;;  %v8577_v1 = vpop.f32.mrb[7].mxu0  ;;  %5862 = vrcp.f32 %v3421_v34  ;;  %v4356_v34 = vmul.f32 -1.442695, %v4795_v4 }
 0x2a3   : > { %v8575_v62 = vpop.f32.mrb[57].mxu1  ;;  %v5837_v16 = vpop.eup %5836  ;;  %5864 = vrcp.f32 %v3422_v29  ;;  %v4409_v13 = vmul.f32 -1.442695, %v4782_v35 }
 0x2a4   : > { %v8580_v63 = vpop.eup %5838  ;;  %v3428_v50 = vadd.f32 1.0, %v5837_v16  ;;  %5866 = vrcp.f32 %v3427_v9 }
 0x2a5   : > { %9567 = vst [vmem:[#allocation42_spill] sm:$0xff] %v8580_v63  ;;  %v5841_v55 = vpop.eup %5840  ;;  %v8585_v36 = vpop.f32.mrb[8].mxu0  ;;  %5868 = vpow2.f32 %v4351_v30  ;;  %v4797_v30 = vadd.f32 %v8562_v57, %v8317_v56  ;;  %v4785_v57 = vadd.f32 %v8569_v61, %v8389_v2  ;;  %v4798_v61 = vadd.f32 %v8566_v23, %v8317_v56 }
 0x2a6   : > { %v8583_v39 = vpop.f32.mrb[58].mxu1  ;;  %v8587_v45 = vpop.eup %5842  ;;  %v3433_v48 = vadd.f32 1.0, %v5841_v55  ;;  %5870 = vrcp.f32 %v3428_v50  ;;  %v4357_v55 = vmul.f32 -1.442695, %v4796_v32  ;;  %v4786_v56 = vadd.f32 %v8575_v62, %v8389_v2 }
 0x2a7   : > { %9568 = vst [vmem:[#allocation44_spill] sm:$0xff] %v8587_v45  ;;  %v8590_v5 = vpop.f32.mrb[59].mxu1  ;;  %v8592_v46 = vpop.f32.mrb[9].mxu0  ;;  %5872 = vpow2.f32 %v4408_v18  ;;  %v4362_v54 = vmul.f32 -1.442695, %v4797_v30 }
 0x2a8   : > { %v8594_v60 = vpop.eup %5844  ;;  %5874 = vrcp.f32 %v3433_v48 }
 0x2a9   : > { %9569 = vst [vmem:[#allocation57_spill] sm:$0xff] %v8594_v60  ;;  %v5847_v28 = vpop.eup %5846  ;;  %v8601_v27 = vpop.f32.mrb[10].mxu0  ;;  %5876 = vpow2.f32 %v4356_v34 }
 0x2aa   : > { %v8597_v47 = vpop.eup %5848  ;;  %v8599_v16 = vpop.f32.mrb[60].mxu1  ;;  %v3434_v58 = vadd.f32 1.0, %v5847_v28  ;;  %5878 = vpow2.f32 %v4409_v13  ;;  %v4784_v13 = vadd.f32 %v8564_v11, %v8379_v7 }
 0x2ab   : > { %v5851_v41 = vpop.eup %5850  ;;  %v8604_v29 = vpop.f32.mrb[61].mxu1 }
 0x2ac   : > { %v8606_v38 = vpop.f32.mrb[11].mxu0  ;;  %v8608_v9 = vpop.eup %5852  ;;  %v3439_v50 = vadd.f32 1.0, %v5851_v41  ;;  %5880 = vrcp.f32 %v3434_v58  ;;  %v9571_v41 = vld [vmem:[#allocation56_spill] sm:$0xff] }
 0x2ad   : > { %v5855_v51 = vpop.eup %5854  ;;  %v8616_v0 = vpop.f32.mrb[12].mxu0  ;;  %v1066_v34 = vadd.f32 %v9571_v41, %v8353_v59  ;;  %5882 = vpow2.f32 %v4357_v55  ;;  %v9575_v55 = vld [vmem:[#allocation62_spill] sm:$0xff] }
 0x2ae   : > { %v8612_v4 = vpop.eup %5856  ;;  %v8614_v35 = vpop.f32.mrb[62].mxu1  ;;  %5884 = vrcp.f32 %v3439_v50  ;;  %v3387_v58 = vadd.f32 1.0, %v5855_v51  ;;  %v1072_v30 = vadd.f32 %v9575_v55, %v8359_v37  ;;  %v1074_v51 = vadd.f32 %v9577_v14, %v8359_v37  ;;  %v9581_v37 = vld [vmem:[#allocation66_spill] sm:$0xff] }
 0x2af   : > { %v8618_v6 = vpop.eup %5858  ;;  %v8620_v28 = vpop.f32.mrb[63].mxu1  ;;  %5886 = vpow2.f32 %v4414_v22  ;;  %v9580_v22 = vld [vmem:[#allocation71_spill] sm:$0xff]  ;;  %v4363_v14 = vmul.f32 -1.442695, %v4798_v61 }
 0x2b0   : > { %v8622_v18 = vpop.f32.mrb[13].mxu0  ;;  %v5861_v48 = vpop.eup %5860  ;;  %5888 = vtanh.f32 %v4785_v57  ;;  %v1078_v57 = vadd.f32 %v9581_v37, %v8369_v12  ;;  %v9583_v37 = vld [vmem:[#allocation78_spill] sm:$0xff] }
 0x2b1   : > { %v8626_v32 = vpop.eup %5862  ;;  %v8638_v10 = vpop.f32.mrb[14].mxu0  ;;  %v3440_v41 = vadd.f32 1.0, %v5861_v48  ;;  %5890 = vpow2.f32 %v4362_v54  ;;  %v4415_v48 = vmul.f32 -1.442695, %v4784_v13 }
 0x2b2   : > { %9570 = vst [vmem:[#allocation58_spill] sm:$0xff] %v8626_v32  ;;  %v8632_v25 = vpop.eup %5864  ;;  %v2863_v43 = vpop.f32.mrb[64].mxu1  ;;  %5892 = vrcp.f32 %v3387_v58  ;;  %v8670_v58 = vadd.f32 %v9583_v37, %v8399_v44 }
 0x2b3   : > { %9572 = vst [vmem:[#allocation27_spill] sm:$0xff] %v8632_v25  ;;  %v8640_v60 = vpop.eup %5866  ;;  %v4810_v11 = vadd.f32 %v2863_v43, %v1066_v34  ;;  %v2865_v49 = vpop.f32.mrb[65].mxu1  ;;  %v8658_v43 = vadd.f32 %v9580_v22, %v8379_v7  ;;  %5894 = vrcp.f32 %v3440_v41  ;;  %v9585_v25 = vld [vmem:[#allocation79_spill] sm:$0xff] }
 0x2b4   : > { %9574 = vst [vmem:[#allocation23_spill] sm:$0xff] %v8640_v60  ;;  %v8644_v45 = vpop.f32.mrb[15].mxu0  ;;  %v5869_v59 = vpop.eup %5868  ;;  %v4813_v23 = vadd.f32 %v2865_v49, %v1068_v40  ;;  %v9579_v60 = vld [vmem:[#allocation70_spill] sm:$0xff]  ;;  %v4799_v49 = vadd.f32 %v8571_v8, %v8323_v31  ;;  %5896 = vtanh.f32 %v4786_v56  ;;  %v8676_v32 = vadd.f32 %v9585_v25, %v8399_v44 }
 0x2b5   : > { %9576 = vst [vmem:[#allocation28_spill] sm:$0xff] %v8644_v45  ;;  %v8650_v50 = vpop.eup %5870  ;;  %v8654_v55 = vadd.f32 %v9579_v60, %v8379_v7  ;;  %v3024_v62 = vpop.f32.mrb[64].mxu0  ;;  %v9582_v60 = vld [vmem:[#allocation67_spill] sm:$0xff]  ;;  %v3388_v7 = vadd.f32 1.0, %v5869_v59  ;;  %5898 = vpow2.f32 %v4415_v48  ;;  %v9588_v59 = vld [vmem:[#allocation74_spill] sm:$0xff] }
 0x2b6   : > { %9578 = vst [vmem:[#allocation30_spill] sm:$0xff] %v8650_v50  ;;  %v5873_v34 = vpop.eup %5872  ;;  %v2869_v40 = vpop.f32.mrb[66].mxu1  ;;  %v1080_v45 = vadd.f32 %v9582_v60, %v8369_v12  ;;  %v8672_v61 = vadd.f32 %v4810_v11, %v3024_v62  ;;  %v9589_v60 = vld [vmem:[#allocation75_spill] sm:$0xff]  ;;  %5900 = vpow2.f32 %v4363_v14  ;;  %v4368_v11 = vmul.f32 -1.442695, %v4799_v49  ;;  %v9590_v25 = vld [vmem:[#allocation86_spill] sm:$0xff] }
 0x2b7   : > { %v8664_v50 = vpop.eup %5874  ;;  %v4816_v54 = vadd.f32 %v2869_v40, %v1072_v30  ;;  %v2871_v13 = vpop.f32.mrb[67].mxu1  ;;  %v3445_v12 = vadd.f32 1.0, %v5873_v34  ;;  %v1090_v40 = vadd.f32 %v9588_v59, %v8389_v2  ;;  %v8686_v56 = vadd.f32 %v9589_v60, %v8389_v2 }
 0x2b8   : > { %v3026_v22 = vpop.f32.mrb[65].mxu0  ;;  %v5877_v63 = vpop.eup %5876  ;;  %9584 = vst [vmem:[#allocation32_spill] sm:$0xff] %v8672_v61  ;;  %v4819_v8 = vadd.f32 %v2871_v13, %v1074_v51  ;;  %v8690_v34 = vadd.f32 %v9590_v25, %v8419_v19  ;;  %5902 = vrcp.f32 %v3388_v7  ;;  %v3626_v61 = vld [vmem:[#allocation3 + $0x18] sm:$0xff]  ;;  %v8700_v25 = vadd.f32 %v9591_v42, %v8409_v3  ;;  %v9592_v7 = vld [vmem:[#allocation87_spill] sm:$0xff] }
 0x2b9   : > { %v5879_v24 = vpop.eup %5878  ;;  %v8678_v41 = vadd.f32 %v4813_v23, %v3026_v22  ;;  %v3030_v62 = vpop.f32.mrb[66].mxu0  ;;  %v3625_v23 = vld [vmem:[#allocation3 + $0x10] sm:$0xff]  ;;  %v3393_v48 = vadd.f32 1.0, %v5877_v63  ;;  %v8704_v63 = vadd.f32 %v9592_v7, %v8419_v19  ;;  %5904 = vrcp.f32 %v3445_v12 }
 0x2ba   : > { %v8680_v30 = vpop.eup %5880  ;;  %v2875_v51 = vpop.f32.mrb[68].mxu1  ;;  %v3446_v2 = vadd.f32 1.0, %v5879_v24  ;;  %v8694_v60 = vadd.f32 %v4816_v54, %v3030_v62  ;;  %v3649_v24 = vmul.f32 %v8597_v47, %v3625_v23  ;;  %5906 = vpow2.f32 %v4368_v11 }
 0x2bb   : > { %9586 = vst [vmem:[#allocation34_spill] sm:$0xff] %v8678_v41  ;;  %9587 = vst [vmem:[#allocation36_spill] sm:$0xff] %v8680_v30  ;;  %v5883_v13 = vpop.eup %5882  ;;  %v4822_v22 = vadd.f32 %v2875_v51, %v1078_v57  ;;  %v2877_v37 = vpop.f32.mrb[69].mxu1  ;;  %v4787_v57 = vadd.f32 %v8583_v39, %v8399_v44  ;;  %v3650_v42 = vmul.f32 %v8608_v9, %v3626_v61  ;;  %5908 = vrcp.f32 %v3393_v48 }
 0x2bc   : > { %v3032_v41 = vpop.f32.mrb[67].mxu0  ;;  %v8692_v59 = vpop.eup %5884  ;;  %v4825_v14 = vadd.f32 %v2877_v37, %v1080_v45  ;;  %v3394_v54 = vadd.f32 1.0, %v5883_v13  ;;  %v4800_v45 = vadd.f32 %v8577_v1, %v8323_v31  ;;  %5910 = vrcp.f32 %v3446_v2 }
 0x2bd   : > { %v8696_v49 = vadd.f32 %v4819_v8, %v3032_v41  ;;  %v5887_v30 = vpop.eup %5886  ;;  %v3036_v37 = vpop.f32.mrb[68].mxu0  ;;  %5912 = vtanh.f32 %v4787_v57 }
 0x2be   : > { %v5889_v51 = vpop.eup %5888  ;;  %v2881_v8 = vpop.f32.mrb[70].mxu1  ;;  %v3451_v47 = vadd.f32 1.0, %v5887_v30  ;;  %v8716_v13 = vadd.f32 %v4822_v22, %v3036_v37  ;;  %5914 = vrcp.f32 %v3394_v54  ;;  %v4801_v30 = vadd.f32 %v8585_v36, %v8329_v15 }
 0x2bf   : > { %v5891_v41 = vpop.eup %5890  ;;  %v3673_v62 = vmul.f32 %v5889_v51, %v8551_v17  ;;  %v4828_v12 = vadd.f32 %v2881_v8, %v8654_v55  ;;  %v2883_v7 = vpop.f32.mrb[71].mxu1  ;;  %v4788_v17 = vadd.f32 %v8590_v5, %v8399_v44  ;;  %v4789_v5 = vadd.f32 %v8599_v16, %v8409_v3  ;;  %v9593_v8 = vld [vmem:[#allocation83_spill] sm:$0xff] }
 0x2c0   : > { %v8714_v39 = vpop.eup %5892  ;;  %v4831_v11 = vadd.f32 %v2883_v7, %v8658_v43  ;;  %v3038_v31 = vpop.f32.mrb[69].mxu0  ;;  %v3399_v61 = vadd.f32 1.0, %v5891_v41  ;;  %v4802_v43 = vadd.f32 %v8592_v46, %v8329_v15  ;;  %v4369_v16 = vmul.f32 -1.442695, %v4800_v45  ;;  %v3632_v45 = vld [vmem:[#allocation3 + $0x48] sm:$0xff] }
 0x2c1   : > { %v8719_v1 = vpop.eup %5894  ;;  %v8721_v23 = vadd.f32 %v3673_v62, %v3649_v24  ;;  %v8725_v9 = vadd.f32 %v4825_v14, %v3038_v31  ;;  %v3042_v22 = vpop.f32.mrb[70].mxu0  ;;  %v4803_v62 = vadd.f32 %v8601_v27, %v8335_v33  ;;  %v4374_v27 = vmul.f32 -1.442695, %v4801_v30 }
 0x2c2   : > { %v5897_v55 = vpop.eup %5896  ;;  %v2887_v48 = vpop.f32.mrb[72].mxu1  ;;  %v8740_v15 = vadd.f32 %v4828_v12, %v3042_v22  ;;  %v4790_v12 = vadd.f32 %v8604_v29, %v8409_v3  ;;  %v4375_v31 = vmul.f32 -1.442695, %v4802_v43  ;;  %v3656_v43 = vmul.f32 %v8618_v6, %v3632_v45 }
 0x2c3   : > { %v8731_v2 = vpop.eup %5898  ;;  %5916 = vtanh.f32 %v8721_v23  ;;  %3769 = vst [vmem:[#allocation3 + $0x10] sm:$0xff] %v8721_v23  ;;  %v3674_v44 = vmul.f32 %v5897_v55, %v8554_v53  ;;  %v4834_v14 = vadd.f32 %v2887_v48, %v1090_v40  ;;  %v2889_v57 = vpop.f32.mrb[73].mxu1  ;;  %v1104_v53 = vadd.f32 %v9593_v8, %v8409_v3  ;;  %v3631_v40 = vld [vmem:[#allocation3 + $0x40] sm:$0xff]  ;;  %4026 = vst [vmem:[%s6446_s23 + $0x10] sm:$0xff] (!%p4418_p8), %v8721_v23  ;;  %v9616_v23 = vld [vmem:[#allocation37_spill] sm:$0xff] (!%p4418_p8) }
 0x2c4   : > { %v3044_v51 = vpop.f32.mrb[71].mxu0  ;;  %v8738_v36 = vpop.eup %5900  ;;  %5918 = vrcp.f32 %v3451_v47  ;;  %v4837_v46 = vadd.f32 %v2889_v57, %v8686_v56  ;;  %v4804_v56 = vadd.f32 %v8606_v38, %v8335_v33  ;;  %v3655_v48 = vmul.f32 %v8612_v4, %v3631_v40  ;;  %4036 = vst [vmem:[%s6446_s23 + $0x60] sm:$0xff] (!%p4418_p8), %v9616_v23 }
 0x2c5   : > { %v8743_v24 = vadd.f32 %v4831_v11, %v3044_v51  ;;  %v8745_v54 = vpop.eup %5902  ;;  %v8749_v41 = vadd.f32 %v3674_v44, %v3650_v42  ;;  %5920 = vtanh.f32 %v4788_v17  ;;  %v3048_v7 = vpop.f32.mrb[72].mxu0  ;;  %v3797_v42 = vld [vmem:[%s9243_s4 + $0x30] sm:$0xff]  ;;  %v4380_v44 = vmul.f32 -1.442695, %v4803_v62 }
 0x2c6   : > { %5922 = vrcp.f32 %v3399_v61  ;;  %v2893_v37 = vpop.f32.mrb[74].mxu1  ;;  %v8760_v47 = vpop.eup %5904  ;;  %v8765_v3 = vadd.f32 %v4834_v14, %v3048_v7  ;;  %v8778_v30 = vmul.f32 %v3797_v42, %v8513_v52  ;;  %v4805_v4 = vadd.f32 %v8616_v0, %v8341_v20 }
 0x2c7   : > { %5924 = vtanh.f32 %v8749_v41  ;;  %3770 = vst [vmem:[#allocation3 + $0x18] sm:$0xff] %v8749_v41  ;;  %v4840_v11 = vadd.f32 %v2893_v37, %v8670_v58  ;;  %v2895_v29 = vpop.f32.mrb[75].mxu1  ;;  %v3050_v33 = vpop.f32.mrb[73].mxu0  ;;  %v4791_v58 = vadd.f32 %v8614_v35, %v8419_v19  ;;  %v4806_v0 = vadd.f32 %v8622_v18, %v8341_v20  ;;  %4027 = vst [vmem:[%s6446_s23 + $0x18] sm:$0xff] (!%p4418_p8), %v8749_v41  ;;  %v9617_v41 = vld [vmem:[#allocation35_spill] sm:$0xff] (!%p4418_p8) }
 0x2c8   : > { %v8767_v38 = vpop.eup %5906  ;;  %5926 = vtanh.f32 %v4789_v5  ;;  %v4843_v17 = vadd.f32 %v2895_v29, %v8676_v32  ;;  %v8770_v55 = vadd.f32 %v4837_v46, %v3050_v33  ;;  %v4381_v32 = vmul.f32 -1.442695, %v4804_v56  ;;  %v3793_v56 = vld [vmem:[%s9243_s4 + $0x10] sm:$0xff]  ;;  %4037 = vst [vmem:[%s6446_s23 + $0x68] sm:$0xff] (!%p4418_p8), %v9617_v41 }
 0x2c9   : > { %v8772_v61 = vpop.eup %5908  ;;  %5928 = vpow2.f32 %v4369_v16  ;;  %v3054_v14 = vpop.f32.mrb[74].mxu0  ;;  %v3452_v37 = vadd.f32 1.0, %v8731_v2  ;;  %v3638_v2 = vld [vmem:[#allocation3 + $0x78] sm:$0xff] }
 0x2ca   : > { %v8780_v22 = vpop.eup %5910  ;;  %5930 = vtanh.f32 %v4790_v12  ;;  %v2899_v5 = vpop.f32.mrb[76].mxu1  ;;  %v8786_v35 = vadd.f32 %v4840_v11, %v3054_v14  ;;  %v4792_v12 = vadd.f32 %v8620_v28, %v8419_v19 }
 0x2cb   : > { %v5913_v57 = vpop.eup %5912  ;;  %5932 = vpow2.f32 %v4374_v27  ;;  %v4846_v51 = vadd.f32 %v2899_v5, %v8700_v25  ;;  %v2901_v52 = vpop.f32.mrb[77].mxu1  ;;  %v4807_v25 = vadd.f32 %v8638_v10, %v8347_v21  ;;  %v4386_v10 = vmul.f32 -1.442695, %v4805_v4 }
 0x2cc   : > { %v3056_v46 = vpop.f32.mrb[75].mxu0  ;;  %v8788_v8 = vpop.eup %5914  ;;  %v3679_v6 = vmul.f32 %v5913_v57, %v8557_v26  ;;  %5934 = vpow2.f32 %v4375_v31  ;;  %v4849_v16 = vadd.f32 %v2901_v52, %v1104_v53  ;;  %v3637_v53 = vld [vmem:[#allocation3 + $0x70] sm:$0xff] }
 0x2cd   : > { %v8791_v40 = vadd.f32 %v4843_v17, %v3056_v46  ;;  %v5917_v62 = vpop.eup %5916  ;;  %5936 = vtanh.f32 %v4791_v58  ;;  %v3060_v20 = vpop.f32.mrb[76].mxu0  ;;  %v9595_v58 = vld [vmem:[#allocation58_spill] sm:$0xff]  ;;  %v4392_v4 = vmul.f32 -1.442695, %v4807_v25 }
 0x2ce   : > { %v8802_v26 = vpop.eup %5918  ;;  %v8805_v7 = vadd.f32 %v3679_v6, %v3655_v48  ;;  %5938 = vpow2.f32 %v4380_v44  ;;  %v3745_v19 = vmul.f32 %v5917_v62, %v8664_v50  ;;  %v2905_v28 = vpop.f32.mrb[78].mxu1  ;;  %v8809_v45 = vadd.f32 %v4846_v51, %v3060_v20  ;;  %v9594_v50 = vld [vmem:[#allocation48_spill] sm:$0xff]  ;;  %v9597_v6 = vld [vmem:[#allocation27_spill] sm:$0xff] }
 0x2cf   : > { %v5921_v18 = vpop.eup %5920  ;;  %5940 = vpow2.f32 %v4381_v32  ;;  %v4852_v42 = vadd.f32 %v2905_v28, %v8690_v34  ;;  %v2907_v27 = vpop.f32.mrb[79].mxu1  ;;  %v3661_v34 = vmul.f32 %v9595_v58, %v3637_v53  ;;  %v4387_v44 = vmul.f32 -1.442695, %v4806_v0  ;;  %v3794_v32 = vld [vmem:[%s9243_s4 + $0x18] sm:$0xff]  ;;  %v3643_v28 = vld [vmem:[#allocation3 + $0xa0] sm:$0xff]  ;;  %v9602_v58 = vld [vmem:[#allocation44_spill] sm:$0xff] }
 0x2d0   : > { %v3062_v11 = vpop.f32.mrb[77].mxu0  ;;  %v8811_v29 = vpop.eup %5922  ;;  %5942 = vtanh.f32 %v8805_v7  ;;  %3775 = vst [vmem:[#allocation3 + $0x40] sm:$0xff] %v8805_v7  ;;  %v3680_v33 = vmul.f32 %v5921_v18, %v9594_v50  ;;  %v3817_v31 = vmul.f32 %v3793_v56, %v3745_v19  ;;  %3998 = vst [vmem:[%s6444_s11 + $0x10] sm:$0xff] %v3745_v19  ;;  %v4855_v17 = vadd.f32 %v2907_v27, %v8704_v63  ;;  %v9596_v63 = vld [vmem:[#allocation36_spill] sm:$0xff]  ;;  %v9599_v18 = vld [vmem:[#allocation42_spill] sm:$0xff] }
 0x2d1   : > { %v5925_v48 = vpop.eup %5924  ;;  %5944 = vtanh.f32 %v4792_v12  ;;  %v8822_v5 = vadd.f32 %v4849_v16, %v3062_v11  ;;  %v3066_v52 = vpop.f32.mrb[78].mxu0  ;;  %v3662_v62 = vmul.f32 %v9597_v6, %v3638_v2  ;;  %v9598_v12 = vld [vmem:[#allocation51_spill] sm:$0xff]  ;;  %v3405_v2 = vadd.f32 1.0, %v8767_v38  ;;  %4032 = vst [vmem:[%s6446_s23 + $0x40] sm:$0xff] (!%p4418_p8), %v8805_v7 }
 0x2d2   : > { %v5927_v14 = vpop.eup %5926  ;;  %5946 = vrcp.f32 %v3452_v37  ;;  %v8824_v57 = vadd.f32 %v3680_v33, %v3656_v43  ;;  %3867 = vrot.lane.b32.xlu1 %v3817_v31, %s6255_s16  ;;  %v3746_v51 = vmul.f32 %v5925_v48, %v9596_v63  ;;  %v8830_v56 = vadd.f32 %v4852_v42, %v3066_v52  ;;  %v3068_v16 = vpop.f32.mrb[79].mxu0  ;;  %v9600_v42 = vld [vmem:[#allocation28_spill] sm:$0xff]  ;;  %v3799_v52 = vld [vmem:[%s9243_s4 + $0x40] sm:$0xff] }
 0x2d3   : > { %v5929_v46 = vpop.eup %5928  ;;  %v3685_v0 = vmul.f32 %v5927_v14, %v9598_v12  ;;  %5948 = vpow2.f32 %v4386_v10  ;;  %v3400_v43 = vadd.f32 1.0, %v8738_v36  ;;  %v8836_v37 = vadd.f32 %v4855_v17, %v3068_v16  ;;  %v3798_v36 = vld [vmem:[%s9243_s4 + $0x38] sm:$0xff]  ;;  %v9601_v17 = vld [vmem:[#allocation23_spill] sm:$0xff]  ;;  %v3644_v14 = vld [vmem:[#allocation3 + $0xa8] sm:$0xff] }
 0x2d4   : > { %v5931_v53 = vpop.eup %5930  ;;  %5950 = vtanh.f32 %v8824_v57  ;;  %3776 = vst [vmem:[#allocation3 + $0x48] sm:$0xff] %v8824_v57  ;;  %v3818_v25 = vmul.f32 %v3794_v32, %v3746_v51  ;;  %3999 = vst [vmem:[%s6444_s11 + $0x18] sm:$0xff] %v3746_v51  ;;  %v4808_v27 = vadd.f32 %v9600_v42, %v8347_v21  ;;  %v3406_v33 = vadd.f32 1.0, %v5929_v46  ;;  %v9619_v7 = vld [vmem:[#allocation31_spill] sm:$0xff] (!%p4418_p8) }
 0x2d5   : > { %v5933_v19 = vpop.eup %5932  ;;  %v8838_v20 = vadd.f32 %v3685_v0, %v3661_v34  ;;  %v3686_v10 = vmul.f32 %v5931_v53, %v9599_v18  ;;  %5952 = vpow2.f32 %v4387_v44  ;;  %v3667_v48 = vmul.f32 %v9601_v17, %v3643_v28  ;;  %v9603_v34 = vld [vmem:[#allocation33_spill] sm:$0xff]  ;;  %v9604_v0 = vld [vmem:[#allocation30_spill] sm:$0xff]  ;;  %4033 = vst [vmem:[%s6446_s23 + $0x48] sm:$0xff] (!%p4418_p8), %v8824_v57  ;;  %4043 = vst [vmem:[%s6446_s23 + $0x98] sm:$0xff] (!%p4418_p8), %v9619_v7 }
 0x2d6   : > { %v5935_v11 = vpop.eup %5934  ;;  %5954 = vpow2.f32 %v4392_v4  ;;  %3869 = vrot.lane.b32.xlu0 %v3818_v25, %s6255_s16  ;;  %3875 = vrot.lane.b32.xlu1 %v8778_v30, %s6255_s16  ;;  %v3822_v44 = vmul.f32 %v3798_v36, %v9603_v34  ;;  %v4393_v30 = vmul.f32 -1.442695, %v4808_v27  ;;  %v3411_v63 = vadd.f32 1.0, %v5933_v19  ;;  %v9605_v53 = vld [vmem:[#allocation57_spill] sm:$0xff]  ;;  %v3803_v27 = vld [vmem:[%s9243_s4 + $0x60] sm:$0xff]  ;;  %v9608_v34 = vld [vmem:[#allocation40_spill] sm:$0xff] }
 0x2d7   : > { %v5937_v50 = vpop.eup %5936  ;;  %5956 = vtanh.f32 %v8838_v20  ;;  %3781 = vst [vmem:[#allocation3 + $0x70] sm:$0xff] %v8838_v20  ;;  %v8852_v21 = vadd.f32 %v3686_v10, %v3662_v62  ;;  %v3412_v6 = vadd.f32 1.0, %v5935_v11  ;;  %v3668_v16 = vmul.f32 %v9604_v0, %v3644_v14  ;;  %v9606_v11 = vld [vmem:[#allocation32_spill] sm:$0xff]  ;;  %v9609_v0 = vld [vmem:[#allocation45_spill] sm:$0xff]  ;;  %4038 = vst [vmem:[%s6446_s23 + $0x70] sm:$0xff] (!%p4418_p8), %v8838_v20 }
 0x2d8   : > { %v5939_v31 = vpop.eup %5938  ;;  %5958 = vrcp.f32 %v3400_v43  ;;  %v3691_v38 = vmul.f32 %v5937_v50, %v9602_v58 }
 0x2d9   : > { %v5941_v32 = vpop.eup %5940  ;;  %5960 = vtanh.f32 %v8852_v21  ;;  %3782 = vst [vmem:[#allocation3 + $0x78] sm:$0xff] %v8852_v21  ;;  %v3417_v19 = vadd.f32 1.0, %v5939_v31  ;;  %v9607_v31 = vld [vmem:[#allocation34_spill] sm:$0xff]  ;;  %4039 = vst [vmem:[%s6446_s23 + $0x78] sm:$0xff] (!%p4418_p8), %v8852_v21 }
 0x2da   : > { %v5943_v4 = vpop.eup %5942  ;;  %5962 = vrcp.f32 %v3405_v2  ;;  %v8859_v51 = vadd.f32 %v3691_v38, %v3667_v48  ;;  %3877 = vrot.lane.b32.xlu0 %v3822_v44, %s6255_s16  ;;  %v3418_v10 = vadd.f32 1.0, %v5941_v32  ;;  %v4398_v2 = vmul.f32 -1.442695, %v9606_v11 }
 0x2db   : > { %v5945_v46 = vpop.eup %5944  ;;  %5964 = vrcp.f32 %v3406_v33  ;;  %v3751_v62 = vmul.f32 %v5943_v4, %v8692_v59  ;;  %v3800_v59 = vld [vmem:[%s9243_s4 + $0x48] sm:$0xff]  ;;  %v4399_v17 = vmul.f32 -1.442695, %v9607_v31  ;;  %v3827_v44 = vmul.f32 %v3803_v27, %v9608_v34  ;;  %v3805_v4 = vld [vmem:[%s9243_s4 + $0x70] sm:$0xff]  ;;  %v9610_v27 = vld [vmem:[#allocation47_spill] sm:$0xff] }
 0x2dc   : > { %v8866_v12 = vpop.eup %5946  ;;  %5966 = vtanh.f32 %v8859_v51  ;;  %3787 = vst [vmem:[#allocation3 + $0xa0] sm:$0xff] %v8859_v51  ;;  %v3692_v43 = vmul.f32 %v5945_v46, %v9605_v53  ;;  %v4411_v31 = vmul.f32 -1.442695, %v8725_v9  ;;  %v4417_v9 = vmul.f32 -1.442695, %v8743_v24  ;;  %4044 = vst [vmem:[%s6446_s23 + $0xa0] sm:$0xff] (!%p4418_p8), %v8859_v51 }
 0x2dd   : > { %v5949_v25 = vpop.eup %5948  ;;  %5968 = vpow2.f32 %v4393_v30  ;;  %v3823_v28 = vmul.f32 %v3799_v52, %v3751_v62  ;;  %4004 = vst [vmem:[%s6444_s11 + $0x40] sm:$0xff] %v3751_v62  ;;  %v4404_v52 = vmul.f32 -1.442695, %v8694_v60  ;;  %v4405_v60 = vmul.f32 -1.442695, %v8696_v49 }
 0x2de   : > { %v5951_v18 = vpop.eup %5950  ;;  %5970 = vrcp.f32 %v3411_v63  ;;  %v8873_v42 = vadd.f32 %v3692_v43, %v3668_v16  ;;  %v3423_v58 = vadd.f32 1.0, %v5949_v25  ;;  %v3806_v25 = vld [vmem:[%s9243_s4 + $0x78] sm:$0xff] }
 0x2df   : > { %v5953_v36 = vpop.eup %5952  ;;  %5972 = vrcp.f32 %v3412_v6  ;;  %3879 = vrot.lane.b32.xlu1 %v3823_v28, %s6255_s16  ;;  %v3752_v50 = vmul.f32 %v5951_v18, %v8719_v1  ;;  %v3804_v1 = vld [vmem:[%s9243_s4 + $0x68] sm:$0xff]  ;;  %v4410_v28 = vmul.f32 -1.442695, %v8716_v13  ;;  %v3810_v13 = vld [vmem:[%s9243_s4 + $0x98] sm:$0xff] }
 0x2e0   : > { %v5955_v33 = vpop.eup %5954  ;;  %5974 = vtanh.f32 %v8873_v42  ;;  %3788 = vst [vmem:[#allocation3 + $0xa8] sm:$0xff] %v8873_v42  ;;  %v3424_v14 = vadd.f32 1.0, %v5953_v36  ;;  %v3828_v16 = vmul.f32 %v3804_v1, %v9609_v0  ;;  %v3627_v1 = vld [vmem:[#allocation3 + $0x20] sm:$0xff]  ;;  %4045 = vst [vmem:[%s6446_s23 + $0xa8] sm:$0xff] (!%p4418_p8), %v8873_v42 }
 0x2e1   : > { %v5957_v48 = vpop.eup %5956  ;;  %5976 = vrcp.f32 %v3417_v19  ;;  %v3824_v38 = vmul.f32 %v3800_v59, %v3752_v50  ;;  %4005 = vst [vmem:[%s6444_s11 + $0x48] sm:$0xff] %v3752_v50  ;;  %v3429_v6 = vadd.f32 1.0, %v5955_v33 }
 0x2e2   : > { %v8889_v32 = vpop.eup %5958  ;;  %5978 = vrcp.f32 %v3418_v10  ;;  %v3757_v30 = vmul.f32 %v5957_v48, %v8760_v47  ;;  %v4416_v48 = vmul.f32 -1.442695, %v8740_v15 }
 0x2e3   : > { %v5961_v63 = vpop.eup %5960  ;;  %5980 = vpow2.f32 %v4398_v2  ;;  %3881 = vrot.lane.b32.xlu0 %v3824_v38, %s6255_s16  ;;  %3887 = vrot.lane.b32.xlu1 %v3827_v44, %s6255_s16 }
 0x2e4   : > { %v8901_v46 = vpop.eup %5962  ;;  %5982 = vpow2.f32 %v4399_v17  ;;  %4010 = vst [vmem:[%s6444_s11 + $0x70] sm:$0xff] %v3757_v30  ;;  %v3758_v47 = vmul.f32 %v5961_v63, %v8780_v22  ;;  %v3829_v53 = vmul.f32 %v3805_v4, %v3757_v30  ;;  %v3809_v22 = vld [vmem:[%s9243_s4 + $0x90] sm:$0xff] }
 0x2e5   : > { %v8905_v62 = vpop.eup %5964  ;;  %5984 = vrcp.f32 %v3423_v58  ;;  %v3833_v36 = vmul.f32 %v3809_v22, %v9610_v27  ;;  %v9611_v58 = vld [vmem:[#allocation50_spill] sm:$0xff] }
 0x2e6   : > { %v5967_v43 = vpop.eup %5966  ;;  %5986 = vrcp.f32 %v3424_v14  ;;  %4011 = vst [vmem:[%s6444_s11 + $0x78] sm:$0xff] %v3758_v47  ;;  %v3830_v59 = vmul.f32 %v3806_v25, %v3758_v47  ;;  %v3834_v38 = vmul.f32 %v3810_v13, %v9611_v58  ;;  %v3634_v22 = vld [vmem:[#allocation3 + $0x58] sm:$0xff] }
 0x2e7   : > { %v5969_v19 = vpop.eup %5968  ;;  %5988 = vpow2.f32 %v4404_v52  ;;  %3889 = vrot.lane.b32.xlu0 %v3828_v16, %s6255_s16  ;;  %3891 = vrot.lane.b32.xlu1 %v3829_v53, %s6255_s16  ;;  %v3763_v49 = vmul.f32 %v5967_v43, %v8802_v26  ;;  %v3811_v26 = vld [vmem:[%s9243_s4 + $0xa0] sm:$0xff]  ;;  %v3633_v16 = vld [vmem:[#allocation3 + $0x50] sm:$0xff] }
 0x2e8   : > { %v5971_v18 = vpop.eup %5970  ;;  %5990 = vrcp.f32 %v3429_v6  ;;  %v3430_v2 = vadd.f32 1.0, %v5969_v19  ;;  %v3628_v6 = vld [vmem:[#allocation3 + $0x28] sm:$0xff] }
 0x2e9   : > { %v5973_v10 = vpop.eup %5972  ;;  %5992 = vtanh.f32 %v8765_v3  ;;  %4016 = vst [vmem:[%s6444_s11 + $0xa0] sm:$0xff] %v3763_v49  ;;  %v3835_v34 = vmul.f32 %v3811_v26, %v3763_v49  ;;  %v3651_v52 = vmul.f32 %v5971_v18, %v3627_v1 }
 0x2ea   : > { %v5975_v11 = vpop.eup %5974  ;;  %5994 = vpow2.f32 %v4405_v60  ;;  %v3652_v25 = vmul.f32 %v5973_v10, %v3628_v6 }
 0x2eb   : > { %v5977_v50 = vpop.eup %5976  ;;  %5996 = vpow2.f32 %v4410_v28  ;;  %3893 = vrot.lane.b32.xlu0 %v3830_v59, %s6255_s16  ;;  %3899 = vrot.lane.b32.xlu1 %v3833_v36, %s6255_s16  ;;  %v3764_v3 = vmul.f32 %v5975_v11, %v8866_v12  ;;  %v3812_v12 = vld [vmem:[%s9243_s4 + $0xa8] sm:$0xff] }
 0x2ec   : > { %v5979_v33 = vpop.eup %5978  ;;  %5998 = vtanh.f32 %v8770_v55  ;;  %v3657_v49 = vmul.f32 %v5977_v50, %v3633_v16 }
 0x2ed   : > { %v5981_v17 = vpop.eup %5980  ;;  %6000 = vtanh.f32 %v8786_v35  ;;  %4017 = vst [vmem:[%s6444_s11 + $0xa8] sm:$0xff] %v3764_v3  ;;  %v3836_v4 = vmul.f32 %v3812_v12, %v3764_v3  ;;  %v3658_v10 = vmul.f32 %v5979_v33, %v3634_v22 }
 0x2ee   : > { %v5983_v44 = vpop.eup %5982  ;;  %6002 = vrcp.f32 %v3430_v2  ;;  %v3435_v55 = vadd.f32 1.0, %v5981_v17 }
 0x2ef   : > { %v8941_v14 = vpop.eup %5984  ;;  %6004 = vtanh.f32 %v8791_v40  ;;  %3901 = vrot.lane.b32.xlu0 %v3834_v38, %s6255_s16  ;;  %3903 = vrot.lane.b32.xlu1 %v3835_v34, %s6255_s16  ;;  %v3436_v30 = vadd.f32 1.0, %v5983_v44  ;;  %v3645_v38 = vld [vmem:[#allocation3 + $0xb0] sm:$0xff] }
 0x2f0   : > { %v8947_v15 = vpop.eup %5986  ;;  %6006 = vpow2.f32 %v4411_v31 }
 0x2f1   : > { %v5989_v35 = vpop.eup %5988  ;;  %6008 = vpow2.f32 %v4416_v48  ;;  %v3640_v48 = vld [vmem:[#allocation3 + $0x88] sm:$0xff] }
 0x2f2   : > { %v8949_v63 = vpop.eup %5990  ;;  %6010 = vtanh.f32 %v8809_v45  ;;  %v3441_v43 = vadd.f32 1.0, %v5989_v35 }
 0x2f3   : > { %v5993_v24 = vpop.eup %5992  ;;  %6012 = vpow2.f32 %v4417_v9  ;;  %3905 = vrot.lane.b32.xlu0 %v3836_v4, %s6255_s16  ;;  %v3664_v9 = vmul.f32 %v8947_v15, %v3640_v48 }
 0x2f4   : > { %v5995_v40 = vpop.eup %5994  ;;  %6014 = vrcp.f32 %v3435_v55  ;;  %v3675_v47 = vmul.f32 %v5993_v24, %v8714_v39  ;;  %v3646_v55 = vld [vmem:[#allocation3 + $0xb8] sm:$0xff]  ;;  %v3795_v24 = vld [vmem:[%s9243_s4 + $0x20] sm:$0xff] }
 0x2f5   : > { %v5997_v0 = vpop.eup %5996  ;;  %6016 = vrcp.f32 %v3436_v30  ;;  %v3442_v59 = vadd.f32 1.0, %v5995_v40  ;;  %v3669_v30 = vmul.f32 %v8949_v63, %v3645_v38 }
 0x2f6   : > { %v5999_v53 = vpop.eup %5998  ;;  %v8954_v60 = vadd.f32 %v3675_v47, %v3651_v52  ;;  %6018 = vtanh.f32 %v8822_v5  ;;  %v3447_v13 = vadd.f32 1.0, %v5997_v0 }
 0x2f7   : > { %v6001_v45 = vpop.eup %6000  ;;  %v3676_v19 = vmul.f32 %v5999_v53, %v8745_v54  ;;  %6020 = vtanh.f32 %v8830_v56  ;;  %v3639_v54 = vld [vmem:[#allocation3 + $0x80] sm:$0xff]  ;;  %v3796_v53 = vld [vmem:[%s9243_s4 + $0x28] sm:$0xff] }
 0x2f8   : > { %v6003_v28 = vpop.eup %6002  ;;  %6022 = vtanh.f32 %v8954_v60  ;;  %3771 = vst [vmem:[#allocation3 + $0x20] sm:$0xff] %v8954_v60  ;;  %v3681_v39 = vmul.f32 %v6001_v45, %v8772_v61  ;;  %v3864_v61 = vpop.permute.xlu1 %3863  ;;  %4028 = vst [vmem:[%s6446_s23 + $0x20] sm:$0xff] (!%p4418_p8), %v8954_v60  ;;  %v9618_v60 = vld [vmem:[#allocation39_spill] sm:$0xff] (!%p4418_p8) }
 0x2f9   : > { %v6005_v18 = vpop.eup %6004  ;;  %v8962_v27 = vadd.f32 %v3676_v19, %v3652_v25  ;;  %6024 = vtanh.f32 %v8836_v37  ;;  %v3960_v26 = vsel %vm3911_vm11, 0.0, %v3864_v61  ;;  %v8975_v50 = vpop.permute.xlu0 %3865  ;;  %v3670_v0 = vmul.f32 %v6003_v28, %v3646_v55  ;;  %v3801_v25 = vld [vmem:[%s9243_s4 + $0x50] sm:$0xff]  ;;  %4042 = vst [vmem:[%s6446_s23 + $0x90] sm:$0xff] (!%p4418_p8), %v9618_v60 }
 0x2fa   : > { %v6007_v5 = vpop.eup %6006  ;;  %6026 = vrcp.f32 %v3441_v43  ;;  %v8965_v56 = vadd.f32 %v3681_v39, %v3657_v49  ;;  %v3682_v36 = vmul.f32 %v6005_v18, %v8788_v8  ;;  %v3663_v8 = vmul.f32 %v8941_v14, %v3639_v54  ;;  %3968 = vst [vmem:[#allocation2] sm:$0xff] %v3960_v26  ;;  %v3802_v39 = vld [vmem:[%s9243_s4 + $0x58] sm:$0xff] }
 0x2fb   : > { %v6009_v11 = vpop.eup %6008  ;;  %6028 = vtanh.f32 %v8962_v27  ;;  %3772 = vst [vmem:[#allocation3 + $0x28] sm:$0xff] %v8962_v27  ;;  %v3912_v31 = vsel %vm3911_vm11, %v3864_v61, %v8975_v50  ;;  %v3448_v34 = vadd.f32 1.0, %v6007_v5  ;;  %4029 = vst [vmem:[%s6446_s23 + $0x28] sm:$0xff] (!%p4418_p8), %v8962_v27 }
 0x2fc   : > { %v6011_v2 = vpop.eup %6010  ;;  %6030 = vtanh.f32 %v8965_v56  ;;  %3777 = vst [vmem:[#allocation3 + $0x50] sm:$0xff] %v8965_v56  ;;  %v8972_v37 = vadd.f32 %v3682_v36, %v3658_v10  ;;  %3969 = vst [vmem:[#allocation2 + $0x8] sm:$0xff] %v3912_v31  ;;  %v3453_v14 = vadd.f32 1.0, %v6009_v11  ;;  %v3807_v36 = vld [vmem:[%s9243_s4 + $0x80] sm:$0xff]  ;;  %v3813_v31 = vld [vmem:[%s9243_s4 + $0xb0] sm:$0xff] }
 0x2fd   : > { %v6013_v3 = vpop.eup %6012  ;;  %6032 = vrcp.f32 %v3442_v59  ;;  %v3687_v33 = vmul.f32 %v6011_v2, %v8811_v29  ;;  %4034 = vst [vmem:[%s6446_s23 + $0x50] sm:$0xff] (!%p4418_p8), %v8965_v56 }
 0x2fe   : > { %v6015_v17 = vpop.eup %6014  ;;  %6034 = vtanh.f32 %v8972_v37  ;;  %3778 = vst [vmem:[#allocation3 + $0x58] sm:$0xff] %v8972_v37  ;;  %v3454_v15 = vadd.f32 1.0, %v6013_v3  ;;  %v3808_v3 = vld [vmem:[%s9243_s4 + $0x88] sm:$0xff]  ;;  %4035 = vst [vmem:[%s6446_s23 + $0x58] sm:$0xff] (!%p4418_p8), %v8972_v37 }
 0x2ff   : > { %v6017_v58 = vpop.eup %6016  ;;  %v8983_v44 = vadd.f32 %v3687_v33, %v3663_v8  ;;  %6036 = vrcp.f32 %v3447_v13 }
 0x300   : > { %v6019_v12 = vpop.eup %6018 }
 0x301   : > { %v6021_v29 = vpop.eup %6020  ;;  %6038 = vtanh.f32 %v8983_v44  ;;  %3783 = vst [vmem:[#allocation3 + $0x80] sm:$0xff] %v8983_v44  ;;  %v3688_v35 = vmul.f32 %v6019_v12, %v8889_v32  ;;  %4040 = vst [vmem:[%s6446_s23 + $0x80] sm:$0xff] (!%p4418_p8), %v8983_v44 }
 0x302   : > { %v6023_v1 = vpop.eup %6022  ;;  %v3693_v4 = vmul.f32 %v6021_v29, %v8901_v46  ;;  %6040 = vrcp.f32 %v3448_v34  ;;  %v3814_v34 = vld [vmem:[%s9243_s4 + $0xb8] sm:$0xff] }
 0x303   : > { %v6025_v40 = vpop.eup %6024  ;;  %v8994_v52 = vadd.f32 %v3688_v35, %v3664_v9  ;;  %v3747_v6 = vmul.f32 %v6023_v1, %v6015_v17  ;;  %6042 = vrcp.f32 %v3453_v14 }
 0x304   : > { %v6027_v47 = vpop.eup %6026  ;;  %v8996_v32 = vadd.f32 %v3693_v4, %v3669_v30  ;;  %v3694_v63 = vmul.f32 %v6025_v40, %v8905_v62 }
 0x305   : > { %v6029_v16 = vpop.eup %6028  ;;  %6044 = vtanh.f32 %v8994_v52  ;;  %3784 = vst [vmem:[#allocation3 + $0x88] sm:$0xff] %v8994_v52  ;;  %v3819_v46 = vmul.f32 %v3795_v24, %v3747_v6  ;;  %4000 = vst [vmem:[%s6444_s11 + $0x20] sm:$0xff] %v3747_v6 }
 0x306   : > { %v6031_v43 = vpop.eup %6030  ;;  %6046 = vtanh.f32 %v8996_v32  ;;  %3789 = vst [vmem:[#allocation3 + $0xb0] sm:$0xff] %v8996_v32  ;;  %v9007_v45 = vadd.f32 %v3694_v63, %v3670_v0  ;;  %v3748_v62 = vmul.f32 %v6029_v16, %v6017_v58  ;;  %4041 = vst [vmem:[%s6446_s23 + $0x88] sm:$0xff] (!%p4418_p8), %v8994_v52 }
 0x307   : > { %v6033_v22 = vpop.eup %6032  ;;  %6048 = vrcp.f32 %v3454_v15  ;;  %3871 = vrot.lane.b32.xlu1 %v3819_v46, %s6255_s16  ;;  %v3753_v19 = vmul.f32 %v6031_v43, %v6027_v47  ;;  %4046 = vst [vmem:[%s6446_s23 + $0xb0] sm:$0xff] (!%p4418_p8), %v8996_v32 }
 0x308   : > { %v6035_v28 = vpop.eup %6034  ;;  %6050 = vtanh.f32 %v9007_v45  ;;  %3790 = vst [vmem:[#allocation3 + $0xb8] sm:$0xff] %v9007_v45  ;;  %v3820_v49 = vmul.f32 %v3796_v53, %v3748_v62  ;;  %4001 = vst [vmem:[%s6444_s11 + $0x28] sm:$0xff] %v3748_v62 }
 0x309   : > { %v3825_v18 = vmul.f32 %v3801_v25, %v3753_v19  ;;  %4006 = vst [vmem:[%s6444_s11 + $0x50] sm:$0xff] %v3753_v19  ;;  %v3754_v59 = vmul.f32 %v6035_v28, %v6033_v22  ;;  %v6037_v5 = vpop.eup %6036  ;;  %4047 = vst [vmem:[%s6446_s23 + $0xb8] sm:$0xff] (!%p4418_p8), %v9007_v45 }
 0x30a   : > { %3873 = vrot.lane.b32.xlu0 %v3820_v49, %s6255_s16 }
 0x30b   : > { %v6039_v10 = vpop.eup %6038  ;;  %3883 = vrot.lane.b32.xlu1 %v3825_v18, %s6255_s16  ;;  %v3826_v54 = vmul.f32 %v3802_v39, %v3754_v59  ;;  %4007 = vst [vmem:[%s6444_s11 + $0x58] sm:$0xff] %v3754_v59 }
 0x30c   : > { %v3759_v11 = vmul.f32 %v6039_v10, %v6037_v5  ;;  %v6041_v61 = vpop.eup %6040 }
 0x30d   : > { %v6043_v2 = vpop.eup %6042 }
 0x30e   : > { %3885 = vrot.lane.b32.xlu0 %v3826_v54, %s6255_s16  ;;  %v3831_v13 = vmul.f32 %v3807_v36, %v3759_v11  ;;  %4012 = vst [vmem:[%s6444_s11 + $0x80] sm:$0xff] %v3759_v11 }
 0x30f   : > { %v6045_v26 = vpop.eup %6044 }
 0x310   : > { %v6047_v8 = vpop.eup %6046  ;;  %3895 = vrot.lane.b32.xlu1 %v3831_v13, %s6255_s16  ;;  %v3760_v33 = vmul.f32 %v6045_v26, %v6041_v61 }
 0x311   : > { %v6049_v17 = vpop.eup %6048  ;;  %v3765_v48 = vmul.f32 %v6047_v8, %v6043_v2 }
 0x312   : > { %v6051_v58 = vpop.eup %6050  ;;  %v3832_v38 = vmul.f32 %v3808_v3, %v3760_v33  ;;  %4013 = vst [vmem:[%s6444_s11 + $0x88] sm:$0xff] %v3760_v33 }
 0x313   : > { %v3837_v12 = vmul.f32 %v3813_v31, %v3765_v48  ;;  %4018 = vst [vmem:[%s6444_s11 + $0xb0] sm:$0xff] %v3765_v48  ;;  %v3766_v14 = vmul.f32 %v6051_v58, %v6049_v17 }
 0x314   : > { %3897 = vrot.lane.b32.xlu0 %v3832_v38, %s6255_s16 }
 0x315   : > { %3907 = vrot.lane.b32.xlu1 %v3837_v12, %s6255_s16  ;;  %v3838_v29 = vmul.f32 %v3814_v34, %v3766_v14  ;;  %4019 = vst [vmem:[%s6444_s11 + $0xb8] sm:$0xff] %v3766_v14 }
 0x318   : > { %3909 = vrot.lane.b32.xlu0 %v3838_v29, %s6255_s16 }
 0x344   : > { %v3868_v9 = vpop.permute.xlu1 %3867 }
 0x345   : > { %v3913_v55 = vsel %vm3911_vm11, %v8975_v50, %v3868_v9 }
 0x346   : > { %3970 = vst [vmem:[#allocation2 + $0x10] sm:$0xff] %v3913_v55  ;;  %v9613_v55 = vld [vmem:[#allocation25_spill] sm:$0xff] (!%p4418_p8) }
 0x347   : > { %4025 = vst [vmem:[%s6446_s23 + $0x8] sm:$0xff] (!%p4418_p8), %v9613_v55 }
 0x348   : > { %v3870_v35 = vpop.permute.xlu0 %3869  ;;  %v3876_v1 = vpop.permute.xlu1 %3875 }
 0x349   : > { %v3914_v30 = vsel %vm3911_vm11, %v3868_v9, %v3870_v35  ;;  %v3961_v4 = vsel %vm3911_vm11, 0.0, %v3876_v1  ;;  %v9612_v9 = vld [vmem:[#allocation24_spill] sm:$0xff] (!%p4418_p8) }
 0x34a   : > { %3971 = vst [vmem:[#allocation2 + $0x18] sm:$0xff] %v3914_v30  ;;  %3975 = vst [vmem:[#allocation2 + $0x38] sm:$0xff] %v3961_v4 }
 0x34b   : > { %4024 = vst [vmem:[%s6446_s23] sm:$0xff] (!%p4418_p8), %v9612_v9 }
 0x34c   : > { %v3878_v24 = vpop.permute.xlu0 %3877 }
 0x34d   : > { %v3917_v40 = vsel %vm3911_vm11, %v3876_v1, %v3878_v24  ;;  %v9615_v1 = vld [vmem:[#allocation29_spill] sm:$0xff] (!%p4418_p8) }
 0x34e   : > { %3976 = vst [vmem:[#allocation2 + $0x40] sm:$0xff] %v3917_v40  ;;  %4031 = vst [vmem:[%s6446_s23 + $0x38] sm:$0xff] (!%p4418_p8), %v9615_v1 }
 0x351   : > { %v3880_v15 = vpop.permute.xlu1 %3879 }
 0x352   : > { %v3918_v6 = vsel %vm3911_vm11, %v3878_v24, %v3880_v15 }
 0x353   : > { %3977 = vst [vmem:[#allocation2 + $0x48] sm:$0xff] %v3918_v6 }
 0x355   : > { %v3882_v47 = vpop.permute.xlu0 %3881  ;;  %v3888_v0 = vpop.permute.xlu1 %3887 }
 0x356   : > { %v3919_v50 = vsel %vm3911_vm11, %v3880_v15, %v3882_v47  ;;  %v3962_v63 = vsel %vm3911_vm11, 0.0, %v3888_v0 }
 0x357   : > { %3978 = vst [vmem:[#allocation2 + $0x50] sm:$0xff] %v3919_v50  ;;  %3982 = vst [vmem:[#allocation2 + $0x70] sm:$0xff] %v3962_v63 }
 0x359   : > { %v3890_v16 = vpop.permute.xlu0 %3889  ;;  %v3892_v46 = vpop.permute.xlu1 %3891 }
 0x35a   : > { %v3922_v53 = vsel %vm3911_vm11, %v3888_v0, %v3890_v16  ;;  %v3923_v43 = vsel %vm3911_vm11, %v3890_v16, %v3892_v46 }
 0x35b   : > { %3983 = vst [vmem:[#allocation2 + $0x78] sm:$0xff] %v3922_v53  ;;  %3984 = vst [vmem:[#allocation2 + $0x80] sm:$0xff] %v3923_v43 }
 0x35d   : > { %v3894_v62 = vpop.permute.xlu0 %3893  ;;  %v3900_v25 = vpop.permute.xlu1 %3899 }
 0x35e   : > { %v3924_v22 = vsel %vm3911_vm11, %v3892_v46, %v3894_v62  ;;  %v3963_v19 = vsel %vm3911_vm11, 0.0, %v3900_v25 }
 0x35f   : > { %3985 = vst [vmem:[#allocation2 + $0x88] sm:$0xff] %v3924_v22  ;;  %3989 = vst [vmem:[#allocation2 + $0xa8] sm:$0xff] %v3963_v19 }
 0x361   : > { %v3902_v28 = vpop.permute.xlu0 %3901  ;;  %v3904_v49 = vpop.permute.xlu1 %3903 }
 0x362   : > { %v3927_v39 = vsel %vm3911_vm11, %v3900_v25, %v3902_v28  ;;  %v3928_v18 = vsel %vm3911_vm11, %v3902_v28, %v3904_v49 }
 0x363   : > { %3990 = vst [vmem:[#allocation2 + $0xb0] sm:$0xff] %v3927_v39  ;;  %3991 = vst [vmem:[#allocation2 + $0xb8] sm:$0xff] %v3928_v18 }
 0x365   : > { %v3906_v59 = vpop.permute.xlu0 %3905 }
 0x366   : > { %v3929_v5 = vsel %vm3911_vm11, %v3904_v49, %v3906_v59 }
 0x367   : > { %3992 = vst [vmem:[#allocation2 + $0xc0] sm:$0xff] %v3929_v5 }
 0x379   : > { %v3872_v10 = vpop.permute.xlu1 %3871 }
 0x37a   : > { %v3915_v54 = vsel %vm3911_vm11, %v3870_v35, %v3872_v10  ;;  %v9614_v35 = vld [vmem:[#allocation26_spill] sm:$0xff] (!%p4418_p8) }
 0x37b   : > { %3972 = vst [vmem:[#allocation2 + $0x20] sm:$0xff] %v3915_v54  ;;  %4030 = vst [vmem:[%s6446_s23 + $0x30] sm:$0xff] (!%p4418_p8), %v9614_v35 }
 0x37c   : > { %v3874_v36 = vpop.permute.xlu0 %3873 }
 0x37d   : > { %v3916_v11 = vsel %vm3911_vm11, %v3872_v10, %v3874_v36  ;;  %v3964_v61 = vsel %vm3911_vm11, %v3874_v36, 0.0  ;;  %v3884_v2 = vpop.permute.xlu1 %3883 }
 0x37e   : > { %3973 = vst [vmem:[#allocation2 + $0x28] sm:$0xff] %v3916_v11  ;;  %3974 = vst [vmem:[#allocation2 + $0x30] sm:$0xff] %v3964_v61  ;;  %v3920_v13 = vsel %vm3911_vm11, %v3882_v47, %v3884_v2 }
 0x37f   : > { %3979 = vst [vmem:[#allocation2 + $0x58] sm:$0xff] %v3920_v13 }
 0x380   : > { %v3886_v26 = vpop.permute.xlu0 %3885 }
 0x381   : > { %v3921_v3 = vsel %vm3911_vm11, %v3884_v2, %v3886_v26  ;;  %v3965_v8 = vsel %vm3911_vm11, %v3886_v26, 0.0 }
 0x382   : > { %3980 = vst [vmem:[#allocation2 + $0x60] sm:$0xff] %v3921_v3  ;;  %3981 = vst [vmem:[#allocation2 + $0x68] sm:$0xff] %v3965_v8  ;;  %v3896_v33 = vpop.permute.xlu1 %3895 }
 0x383   : > { %v3925_v31 = vsel %vm3911_vm11, %v3894_v62, %v3896_v33 }
 0x384   : > { %3986 = vst [vmem:[#allocation2 + $0x90] sm:$0xff] %v3925_v31 }
 0x386   : > { %v3898_v17 = vpop.permute.xlu0 %3897  ;;  %4023 = sbr.rel (%p4418_p8) target bundleno = 909 (0x38d), region = 48 }
 0x387   : > { %v3926_v48 = vsel %vm3911_vm11, %v3896_v33, %v3898_v17  ;;  %v3966_v58 = vsel %vm3911_vm11, %v3898_v17, 0.0  ;;  %v3908_v38 = vpop.permute.xlu1 %3907 }
 0x388   : > { %3987 = vst [vmem:[#allocation2 + $0x98] sm:$0xff] %v3926_v48  ;;  %3988 = vst [vmem:[#allocation2 + $0xa0] sm:$0xff] %v3966_v58  ;;  %v3930_v34 = vsel %vm3911_vm11, %v3906_v59, %v3908_v38 }
 0x389   : > { %3993 = vst [vmem:[#allocation2 + $0xc8] sm:$0xff] %v3930_v34 }
 0x38a   : > { %v3910_v12 = vpop.permute.xlu0 %3909 }
 0x38b   : > { %v3931_v14 = vsel %vm3911_vm11, %v3908_v38, %v3910_v12  ;;  %v3967_v29 = vsel %vm3911_vm11, %v3910_v12, 0.0 }
 0x38c   : > { %3994 = vst [vmem:[#allocation2 + $0xd0] sm:$0xff] %v3931_v14  ;;  %3995 = vst [vmem:[#allocation2 + $0xd8] sm:$0xff] %v3967_v29 }
 0x38d PF: > { %s4989_s16 = smul.u32 24, %s6226_s27  ;;  %s4069_s19 = sshll.u32 %s6444_s11, 4  ;;  %s9123_s19 = int_to_ptr.vmem [resolvable:$true] %s4069_s19 }
 0x38e   : > { %s4990_s17 = smul.u32 192, %s6230_s28  ;;  %s9620_s18 = sand.u32 1, %s6218_s25  }
 0x38f   : > { %s4991_s10 = smul.u32 3072, %s6230_s28  ;;  %s9133_s9 = scalar_lea.sflag [#allocation5], %s9620_s18 }
 0x390   : > { %s4066_s20 = sadd.s32 %s4990_s17, %s4989_s16  ;;  %s6092_s12 = scalar_lea.vmem %s9123_s19, 3072 }
 0x391   : > { %s4419_s30 = sshll.u32 %s4066_s20, 7  ;;  %p6093_p9 = scmp.ne.s32.totalorder %s9123_s19, %s6092_s12 }
 0x392   : > { %s9128_s7 = scalar_lea.hbm %s9244_s5, %s4419_s30  ;;  %s6256_s27 = smov [#allocation4]  }
 0x393   : > { %p6094_p10 = pnand %p6093_p9, %p6368_p3  ;;  %s6096_s11 = sshll.u32 %s6256_s27, 4  ;;  %s6097_s11 = int_to_ptr.vmem [resolvable:$false] %s6096_s11 }
 0x394   : > { %s6098_s21 = scalar_lea.vmem %s6097_s11, 6144  ;;  %p6099_p0 = scmp.lt.s32.totalorder %s9123_s19, %s6097_s11 }
 0x395   : > { %p6095_p11 = pneg %p6094_p10  ;;  %p6100_p1 = scmp.lt.s32.totalorder %s6098_s21, %s6092_s12 }
 0x397   : > { %p6101_p4 = por %p6100_p1, %p6099_p0 }
 0x399   : > { %p6102_p2 = pnand %p6101_p4, %p6095_p11 }
 0x39b   : > { %6105 = shalt.err (!%p6102_p2)
}
 0x39c   : > { %s6106_s24 = scalar_lea.hbm %s9128_s7, 3072  ;;  %s6110_s16 = scalar_lea.hbm %s9244_s5, 49152 }
 0x39d   : > { %p6107_p5 = scmp.ne.s32.totalorder %s9128_s7, %s6106_s24  ;;  %p6111_p9 = scmp.lt.u32.totalorder %s9128_s7, %s9244_s5 }
 0x39e   : > { %p6112_p10 = scmp.lt.u32.totalorder %s6110_s16, %s6106_s24  ;;  %p6114_p0 = scmp.lt.u32.totalorder %s6106_s24, %s9128_s7 }
 0x39f   : > { %p6108_p6 = pnand %p6107_p5, %p6368_p3 }
 0x3a0   : > { %p6113_p11 = por %p6112_p10, %p6111_p9 }
 0x3a1   : > { %p6109_p8 = pneg %p6108_p6 }
 0x3a2   : > { %p6115_p1 = por %p6114_p0, %p6113_p11 }
 0x3a4   : > { %p6116_p4 = pnand %p6115_p1, %p6109_p8 }
 0x3a6   : > { %6119 = shalt.err (!%p6116_p4)
}
 0x3a7   : > { %s6257_s30 = smov 768   ;;  %s6258_s26 = smov 48  }
 0x3a8   : > { %4992 = dma.vmem_to_hbm [thread:$0]  (%p6368_p3), %s9123_s19, 3072, %s9128_s7, %s9133_s9, %s6257_s30, %s6257_s30, %s6258_s26  }
 0x3a9   : > { %s9165_s12 = scalar_lea.hbm %s9245_s6, %s4991_s10  ;;  %s4085_s27 = sshll.u32 %s6446_s23, 4  ;;  %s9168_s27 = int_to_ptr.vmem [resolvable:$true] %s4085_s27 }
 0x3aa   : > { %s9621_s11 = sand.u32 1, %s6206_s22   ;;  %s6120_s15 = scalar_lea.vmem %s9168_s27, 3072 }
 0x3ab   : > { %s9172_s21 = scalar_lea.sflag [#allocation7], %s9621_s11  ;;  %p6121_p2 = scmp.ne.s32.totalorder %s9168_s27, %s6120_s15 }
 0x3ac   : > { %s6259_s28 = smov [#allocation6]  }
 0x3ad   : > { %p6122_p5 = pnand %p6121_p2, %p6395_p12  ;;  %s6124_s19 = sshll.u32 %s6259_s28, 4  ;;  %s6125_s19 = int_to_ptr.vmem [resolvable:$false] %s6124_s19 }
 0x3ae   : > { %s6126_s7 = scalar_lea.vmem %s6125_s19, 6144  ;;  %p6127_p6 = scmp.lt.s32.totalorder %s9168_s27, %s6125_s19 }
 0x3af   : > { %p6123_p3 = pneg %p6122_p5  ;;  %p6128_p8 = scmp.lt.s32.totalorder %s6126_s7, %s6120_s15 }
 0x3b1   : > { %p6129_p9 = por %p6128_p8, %p6127_p6 }
 0x3b3   : > { %p6130_p10 = pnand %p6129_p9, %p6123_p3 }
 0x3b5   : > { %6133 = shalt.err (!%p6130_p10)
}
 0x3b6   : > { %s6134_s23 = scalar_lea.hbm %s9165_s12, 3072  ;;  %s6138_s24 = scalar_lea.hbm %s9245_s6, 6144 }
 0x3b7   : > { %p6135_p11 = scmp.ne.s32.totalorder %s9165_s12, %s6134_s23  ;;  %p6139_p4 = scmp.lt.u32.totalorder %s9165_s12, %s9245_s6 }
 0x3b8   : > { %p6140_p2 = scmp.lt.u32.totalorder %s6138_s24, %s6134_s23  ;;  %p6142_p3 = scmp.lt.u32.totalorder %s6134_s23, %s9165_s12 }
 0x3b9   : > { %p6136_p0 = pnand %p6135_p11, %p6395_p12 }
 0x3ba   : > { %p6141_p5 = por %p6140_p2, %p6139_p4 }
 0x3bb   : > { %p6137_p1 = pneg %p6136_p0 }
 0x3bc   : > { %p6143_p6 = por %p6142_p3, %p6141_p5 }
 0x3be   : > { %p6144_p8 = pnand %p6143_p6, %p6137_p1 }
 0x3c0   : > { %6147 = shalt.err (!%p6144_p8)
}
 0x3c1   : > { %4993 = dma.vmem_to_hbm [thread:$0]  (%p6395_p12), %s9168_s27, 3072, %s9165_s12, %s9172_s21, %s6257_s30, %s6257_s30, %s6258_s26  }
 0x3c2 PF: > { %s9622_s16 = sld [smem:[#allocation16_spill]]  ;;  %s9623_s17 = sld [smem:[#allocation12_spill]] }
 0x3c8   : > { %p5003_p9 = scmp.ge.s32.totalorder %s9622_s16, 2  ;;  %s4100_s29 = sand.u32 1, %s9623_s17  }
 0x3c9   : > { %s4101_s18 = scalar_lea.sflag [#allocation5], %s4100_s29 }
 0x3ca   : > { %p4997_p10 = pnand %p5003_p9, %p6383_p7 }
 0x3cc   : > { %6193 = dma.done.wait (!%p4997_p10), %s4101_s18, 3072  }
 0x3cd   : > { %6195 = vsyncadd (!%p4997_p10), %s4101_s18, 4294964224  ;;  %s9625_s11 = sld [smem:[#allocation10_spill]]  ;;  %p5000_p11 = pnand %p5003_p9, %p6407_p13 }
 0x3d3   : > { %s4109_s15 = sand.u32 1, %s9625_s11  }
 0x3d4   : > { %s4110_s28 = scalar_lea.sflag [#allocation7], %s4109_s15 }
 0x3d5   : > { %6197 = dma.done.wait (!%p5000_p11), %s4110_s28, 3072  }
 0x3d6   : > { %6199 = vsyncadd (!%p5000_p11), %s4110_s28, 4294964224  ;;  %s23_s7 = sadd.s32 1, %s9622_s16   ;;  %s9627_s30 = sld [smem:[#allocation11_spill]] }
 0x3d7   : > { %p20_p12 = scmp.ge.s32.totalorder %s23_s7, 18   ;;  %s9628_s23 = sld [smem:[#allocation20_spill]] }
 0x3d8   : > { %s9629_s26 = sld [smem:[#allocation13_spill]]  ;;  %s9630_s12 = sld [smem:[#allocation21_spill]] }
 0x3d9   : > { %s9631_s27 = sld [smem:[#allocation14_spill]]  ;;  %s9632_s28 = sld [smem:[#allocation15_spill]] }
 0x3da   : > { %s9633_s29 = sld [smem:[#allocation17_spill]]  ;;  %s9634_s19 = sld [smem:[#allocation18_spill]] }
 0x3db   : > { %s9635_s21 = smov %s6206_s22  ;;  %s9637_s24 = smov %s6218_s25 }
 0x3dc   : > { %s9636_s22 = smov %s9627_s30  ;;  %22 = sbr.rel (!%p20_p12) target bundleno = 9 (0x9), region = 109 }
 0x3de   : > { %s9638_s25 = smov %s9629_s26  ;;  %s9639_s26 = smov %s9630_s12 }
 0x3e0   : > { %s9640_s30 = smov %s9634_s19 }
 0x3e3   :  { %4115 = vsyncpa [#allocation5], 1 }
 0x3e4   :  { %4117 = vsyncpa [#allocation5 + $0x1], 1 }
 0x3e5   :  { %4118 = vsyncpa [#allocation7], 1 }
 0x3e6   :  { %4120 = vsyncpa [#allocation7 + $0x1], 1 }

</bundles_post_ra>
